<compile_context>
chip_gen: v6e
topology: v6e:2x2x1
jax: 0.10.0
libtpu: 0.0.40
codegen_flags: <defaults>
</compile_context>

<pallas_src>
import math
import functools

import jax
import jax.numpy as jnp
from jax import lax
from jax.experimental import pallas as pl
from jax.experimental.pallas import tpu as pltpu

# ---- hyperparameters (match the reference module) ---------------------------
D_MODEL = 32
NHEAD = 4
HEAD_DIM = D_MODEL // NHEAD
NUM_LAYERS = 2
DIM_FF = 64
VOCAB = 3            # len([PAD, SOS, EOS])
VOCAB_PAD = 128      # lane-dense padded vocab for fc_out (sliced in wrapper)
MAX_SEQ = 32         # MAX_SEQUENCE_LENGTH
PAD_IDX = 0
EPS = 1e-5
NEG_INF = -1e30


# ============================ in-kernel helpers ==============================

def _gelu(x):
    # exact GELU (erf form) == PyTorch F.gelu default
    return 0.5 * x * (1.0 + lax.erf(x * (1.0 / math.sqrt(2.0))))


def _layernorm(x, g, b):
    mu = jnp.mean(x, axis=-1, keepdims=True)
    xc = x - mu
    var = jnp.mean(xc * xc, axis=-1, keepdims=True)
    return xc * lax.rsqrt(var + EPS) * g + b


def _mha(q, k, v, *, batch, seq_q, seq_k, causal_mask):
    """q: [B*Sq, D], k/v: [B*Sk, D].  Per-(batch, head) blocks via static slices;
    everything stays in VMEM/vregs, no transposes."""
    scale = 1.0 / math.sqrt(HEAD_DIM)
    out_rows = []
    for b in range(batch):
        qb = q[b * seq_q:(b + 1) * seq_q, :]
        kb = k[b * seq_k:(b + 1) * seq_k, :]
        vb = v[b * seq_k:(b + 1) * seq_k, :]
        heads = []
        for h in range(NHEAD):
            qh = qb[:, h * HEAD_DIM:(h + 1) * HEAD_DIM]
            kh = kb[:, h * HEAD_DIM:(h + 1) * HEAD_DIM]
            vh = vb[:, h * HEAD_DIM:(h + 1) * HEAD_DIM]
            # q @ k^T without an explicit transpose (contract dim 1 with dim 1)
            s = lax.dot_general(qh, kh, (((1,), (1,)), ((), ())),
                                preferred_element_type=jnp.float32) * scale
            if causal_mask is not None:
                s = jnp.where(causal_mask, s, NEG_INF)
            m = jnp.max(s, axis=-1, keepdims=True)
            p = jnp.exp(s - m)
            l = jnp.sum(p, axis=-1, keepdims=True)
            o = jnp.dot(p, vh, preferred_element_type=jnp.float32)
            o = o * pl.reciprocal(l, approx=True)
            heads.append(o)
        out_rows.append(jnp.concatenate(heads, axis=-1))   # [Sq, D]
    return jnp.concatenate(out_rows, axis=0)               # [B*Sq, D]


# ============================ fused forward kernel ===========================

def _fused_forward_kernel(
    src_ref, emb_ref, pe_ref,
    sa_wqkv_ref, sa_bqkv_ref, sa_wo_ref, sa_bo_ref,
    ca_wqkv_ref, ca_bqkv_ref, ca_wo_ref, ca_bo_ref,
    ln1_g_ref, ln1_b_ref, ln2_g_ref, ln2_b_ref, ln3_g_ref, ln3_b_ref,
    w1_ref, b1_ref, w2_ref, b2_ref,
    fc_w_ref, fc_b_ref,
    out_ref,
    *, batch, seq,
):
    D = D_MODEL
    M = batch * seq

    # ---- embedding lookup: select-sum over the tiny vocab (pad row is zero) ----
    ids = src_ref[...]                                      # [M, 1] int32
    x = jnp.zeros((M, D), jnp.float32)
    for tok in range(VOCAB):
        sel = (ids == tok).astype(jnp.float32)              # [M, 1]
        row = emb_ref[pl.ds(tok, 1), :]                     # [1, D]
        x = x + sel * row
    # scale + positional encoding (dropout is identity in eval mode)
    pe_rows = pe_ref[pl.ds(0, seq), :]                      # [S, D]
    x = x * math.sqrt(D) + jnp.concatenate([pe_rows] * batch, axis=0)

    memory = x                                              # cross-attn memory

    # ---- causal mask generated in-kernel (no HBM mask input) ----
    row_i = lax.broadcasted_iota(jnp.int32, (seq, seq), 0)
    col_i = lax.broadcasted_iota(jnp.int32, (seq, seq), 1)
    causal = row_i >= col_i

    for l in range(NUM_LAYERS):
        # ----- self-attention (fused QKV matmul, causal) -----
        qkv = jnp.dot(x, sa_wqkv_ref[l],
                      preferred_element_type=jnp.float32) + sa_bqkv_ref[l]
        att = _mha(qkv[:, 0:D], qkv[:, D:2 * D], qkv[:, 2 * D:3 * D],
                   batch=batch, seq_q=seq, seq_k=seq, causal_mask=causal)
        att = jnp.dot(att, sa_wo_ref[l],
                      preferred_element_type=jnp.float32) + sa_bo_ref[l]
        x = _layernorm(x + att, ln1_g_ref[l], ln1_b_ref[l])

        # ----- cross-attention (memory = pos-encoded src, no mask) -----
        w_c = ca_wqkv_ref[l]                                # [D, 3D]
        b_c = ca_bqkv_ref[l]                                # [1, 3D]
        q = jnp.dot(x, w_c[:, 0:D],
                    preferred_element_type=jnp.float32) + b_c[:, 0:D]
        kv = jnp.dot(memory, w_c[:, D:3 * D],
                     preferred_element_type=jnp.float32) + b_c[:, D:3 * D]
        att = _mha(q, kv[:, 0:D], kv[:, D:2 * D],
                   batch=batch, seq_q=seq, seq_k=seq, causal_mask=None)
        att = jnp.dot(att, ca_wo_ref[l],
                      preferred_element_type=jnp.float32) + ca_bo_ref[l]
        x = _layernorm(x + att, ln2_g_ref[l], ln2_b_ref[l])

        # ----- feed-forward (exact-erf gelu) -----
        h = jnp.dot(x, w1_ref[l], preferred_element_type=jnp.float32) + b1_ref[l]
        h = _gelu(h)
        h = jnp.dot(h, w2_ref[l], preferred_element_type=jnp.float32) + b2_ref[l]
        x = _layernorm(x + h, ln3_g_ref[l], ln3_b_ref[l])

    # ----- fc_out into a lane-dense padded vocab (unmasked stores) -----
    logits = jnp.dot(x, fc_w_ref[...],
                     preferred_element_type=jnp.float32) + fc_b_ref[...]
    out_ref[...] = logits.astype(out_ref.dtype)


# ================================ wrapper ====================================

def music_transformer_forward(src, params):
    # TODO(synk): src_padding_mask (key_padding_mask) not supported; call with None.
    B, S = src.shape
    M = B * S
    src_flat = src.reshape(M, 1).astype(jnp.int32)

    kernel = functools.partial(_fused_forward_kernel, batch=B, seq=S)
    logits_pad = pl.pallas_call(
        kernel,
        out_shape=jax.ShapeDtypeStruct((M, VOCAB_PAD), jnp.float32),
        # Tiny working set (<100 KiB); 32 MiB scoped limit is safe on v5e/v6e/v7x.
        compiler_params=pltpu.CompilerParams(vmem_limit_bytes=32 * 1024 * 1024),
    )(
        src_flat, params["embedding"], params["pe"],
        params["sa_wqkv"], params["sa_bqkv"], params["sa_wo"], params["sa_bo"],
        params["ca_wqkv"], params["ca_bqkv"], params["ca_wo"], params["ca_bo"],
        params["ln1_g"], params["ln1_b"], params["ln2_g"], params["ln2_b"],
        params["ln3_g"], params["ln3_b"],
        params["w1"], params["b1"], params["w2"], params["b2"],
        params["fc_w"], params["fc_b"],
    )
    return logits_pad[:, :VOCAB].reshape(B, S, VOCAB)


# ============================ parameter init =================================

def init_params(key):
    keys = iter(jax.random.split(key, 64))

    def nrm(shape, scale=0.02):
        return scale * jax.random.normal(next(keys), shape, dtype=jnp.float32)

    # embedding with padding_idx row zeroed
    emb = nrm((VOCAB, D_MODEL), scale=1.0)
    emb = emb.at[PAD_IDX].set(0.0)

    # sinusoidal positional encoding, max_len = MAX_SEQUENCE_LENGTH
    position = jnp.arange(MAX_SEQ, dtype=jnp.float32)[:, None]
    div_term = jnp.exp(jnp.arange(0, D_MODEL, 2, dtype=jnp.float32)
                       * (-math.log(10000.0) / D_MODEL))
    pe = jnp.zeros((MAX_SEQ, D_MODEL), jnp.float32)
    pe = pe.at[:, 0::2].set(jnp.sin(position * div_term))
    pe = pe.at[:, 1::2].set(jnp.cos(position * div_term))

    def stack(make):
        return jnp.stack([make() for _ in range(NUM_LAYERS)], axis=0)

    fc_w = jnp.zeros((D_MODEL, VOCAB_PAD), jnp.float32)
    fc_w = fc_w.at[:, :VOCAB].set(nrm((D_MODEL, VOCAB)))

    return dict(
        embedding=emb,
        pe=pe,
        # fused [wq|wk|wv] weights, layer-stacked along axis 0
        sa_wqkv=stack(lambda: nrm((D_MODEL, 3 * D_MODEL))),
        sa_bqkv=jnp.zeros((NUM_LAYERS, 1, 3 * D_MODEL), jnp.float32),
        sa_wo=stack(lambda: nrm((D_MODEL, D_MODEL))),
        sa_bo=jnp.zeros((NUM_LAYERS, 1, D_MODEL), jnp.float32),
        ca_wqkv=stack(lambda: nrm((D_MODEL, 3 * D_MODEL))),
        ca_bqkv=jnp.zeros((NUM_LAYERS, 1, 3 * D_MODEL), jnp.float32),
        ca_wo=stack(lambda: nrm((D_MODEL, D_MODEL))),
        ca_bo=jnp.zeros((NUM_LAYERS, 1, D_MODEL), jnp.float32),
        ln1_g=jnp.ones((NUM_LAYERS, 1, D_MODEL), jnp.float32),
        ln1_b=jnp.zeros((NUM_LAYERS, 1, D_MODEL), jnp.float32),
        ln2_g=jnp.ones((NUM_LAYERS, 1, D_MODEL), jnp.float32),
        ln2_b=jnp.zeros((NUM_LAYERS, 1, D_MODEL), jnp.float32),
        ln3_g=jnp.ones((NUM_LAYERS, 1, D_MODEL), jnp.float32),
        ln3_b=jnp.zeros((NUM_LAYERS, 1, D_MODEL), jnp.float32),
        w1=stack(lambda: nrm((D_MODEL, DIM_FF))),
        b1=jnp.zeros((NUM_LAYERS, 1, DIM_FF), jnp.float32),
        w2=stack(lambda: nrm((DIM_FF, D_MODEL))),
        b2=jnp.zeros((NUM_LAYERS, 1, D_MODEL), jnp.float32),
        fc_w=fc_w,
        fc_b=jnp.zeros((1, VOCAB_PAD), jnp.float32),
    )


# ================================== main =====================================

if __name__ == "__main__":
    key = jax.random.PRNGKey(0)
    params = init_params(key)

    B, S = 2, 8
    src = jax.random.randint(jax.random.fold_in(key, 123), (B, S), 0, VOCAB,
                             dtype=jnp.int32)

    fwd = jax.jit(music_transformer_forward)
    out = fwd(src, params)
    out = jax.block_until_ready(out)

    assert out.shape == (B, S, VOCAB), out.shape
    assert jnp.all(jnp.isfinite(out)), "non-finite output"
    print("KERNEL_OK")
</pallas_src>

<mosaic_0001>
module attributes {stable_mosaic.version = 11 : i64} {
  func.func @_fused_forward_kernel(%arg0: memref<16x1xi32, #tpu.memory_space<vmem>>, %arg1: memref<3x32xf32, #tpu.memory_space<vmem>>, %arg2: memref<32x32xf32, #tpu.memory_space<vmem>>, %arg3: memref<2x32x96xf32, #tpu.memory_space<vmem>>, %arg4: memref<2x1x96xf32, #tpu.memory_space<vmem>>, %arg5: memref<2x32x32xf32, #tpu.memory_space<vmem>>, %arg6: memref<2x1x32xf32, #tpu.memory_space<vmem>>, %arg7: memref<2x32x96xf32, #tpu.memory_space<vmem>>, %arg8: memref<2x1x96xf32, #tpu.memory_space<vmem>>, %arg9: memref<2x32x32xf32, #tpu.memory_space<vmem>>, %arg10: memref<2x1x32xf32, #tpu.memory_space<vmem>>, %arg11: memref<2x1x32xf32, #tpu.memory_space<vmem>>, %arg12: memref<2x1x32xf32, #tpu.memory_space<vmem>>, %arg13: memref<2x1x32xf32, #tpu.memory_space<vmem>>, %arg14: memref<2x1x32xf32, #tpu.memory_space<vmem>>, %arg15: memref<2x1x32xf32, #tpu.memory_space<vmem>>, %arg16: memref<2x1x32xf32, #tpu.memory_space<vmem>>, %arg17: memref<2x32x64xf32, #tpu.memory_space<vmem>>, %arg18: memref<2x1x64xf32, #tpu.memory_space<vmem>>, %arg19: memref<2x64x32xf32, #tpu.memory_space<vmem>>, %arg20: memref<2x1x32xf32, #tpu.memory_space<vmem>>, %arg21: memref<32x128xf32, #tpu.memory_space<vmem>>, %arg22: memref<1x128xf32, #tpu.memory_space<vmem>>, %arg23: memref<16x128xf32, #tpu.memory_space<vmem>>) attributes {dimension_semantics = [], scalar_prefetch = 0 : i64, scratch_operands = 0 : i64, tpu.core_type = #tpu.core_type<tc>} {
    %c0 = arith.constant 0 : index
    %c0_0 = arith.constant 0 : index
    %0 = vector.load %arg0[%c0, %c0_0] : memref<16x1xi32, #tpu.memory_space<vmem>>, vector<16x1xi32>
    %cst = arith.constant 0.000000e+00 : f32
    %1 = vector.broadcast %cst : f32 to vector<16x32xf32>
    %c0_i32 = arith.constant 0 : i32
    %2 = vector.broadcast %c0_i32 : i32 to vector<16x1xi32>
    %3 = arith.cmpi eq, %0, %2 : vector<16x1xi32>
    %4 = arith.extui %3 : vector<16x1xi1> to vector<16x1xi32>
    %5 = arith.sitofp %4 : vector<16x1xi32> to vector<16x1xf32>
    %c0_1 = arith.constant 0 : index
    %c0_2 = arith.constant 0 : index
    %6 = vector.load %arg1[%c0_1, %c0_2] : memref<3x32xf32, #tpu.memory_space<vmem>>, vector<1x32xf32>
    %7 = vector.broadcast %5 : vector<16x1xf32> to vector<16x32xf32>
    %8 = vector.broadcast %6 : vector<1x32xf32> to vector<16x32xf32>
    %9 = arith.mulf %7, %8 : vector<16x32xf32>
    %10 = arith.addf %1, %9 : vector<16x32xf32>
    %c1_i32 = arith.constant 1 : i32
    %11 = vector.broadcast %c1_i32 : i32 to vector<16x1xi32>
    %12 = arith.cmpi eq, %0, %11 : vector<16x1xi32>
    %13 = arith.extui %12 : vector<16x1xi1> to vector<16x1xi32>
    %14 = arith.sitofp %13 : vector<16x1xi32> to vector<16x1xf32>
    %c1 = arith.constant 1 : index
    %c0_3 = arith.constant 0 : index
    %15 = vector.load %arg1[%c1, %c0_3] : memref<3x32xf32, #tpu.memory_space<vmem>>, vector<1x32xf32>
    %16 = vector.broadcast %14 : vector<16x1xf32> to vector<16x32xf32>
    %17 = vector.broadcast %15 : vector<1x32xf32> to vector<16x32xf32>
    %18 = arith.mulf %16, %17 : vector<16x32xf32>
    %19 = arith.addf %10, %18 : vector<16x32xf32>
    %c2_i32 = arith.constant 2 : i32
    %20 = vector.broadcast %c2_i32 : i32 to vector<16x1xi32>
    %21 = arith.cmpi eq, %0, %20 : vector<16x1xi32>
    %22 = arith.extui %21 : vector<16x1xi1> to vector<16x1xi32>
    %23 = arith.sitofp %22 : vector<16x1xi32> to vector<16x1xf32>
    %c2 = arith.constant 2 : index
    %c0_4 = arith.constant 0 : index
    %24 = vector.load %arg1[%c2, %c0_4] : memref<3x32xf32, #tpu.memory_space<vmem>>, vector<1x32xf32>
    %25 = vector.broadcast %23 : vector<16x1xf32> to vector<16x32xf32>
    %26 = vector.broadcast %24 : vector<1x32xf32> to vector<16x32xf32>
    %27 = arith.mulf %25, %26 : vector<16x32xf32>
    %28 = arith.addf %19, %27 : vector<16x32xf32>
    %c0_5 = arith.constant 0 : index
    %c0_6 = arith.constant 0 : index
    %29 = vector.load %arg2[%c0_5, %c0_6] : memref<32x32xf32, #tpu.memory_space<vmem>>, vector<8x32xf32>
    %cst_7 = arith.constant 5.65685415 : f32
    %30 = vector.broadcast %cst_7 : f32 to vector<16x32xf32>
    %31 = arith.mulf %28, %30 : vector<16x32xf32>
    %32 = tpu.concatenate %29, %29 in 0 : vector<8x32xf32>, vector<8x32xf32> -> vector<16x32xf32>
    %33 = arith.addf %31, %32 : vector<16x32xf32>
    %34 = tpu.iota {dimensions = array<i32: 0>} : vector<8x8xi32>
    %35 = tpu.iota {dimensions = array<i32: 1>} : vector<8x8xi32>
    %36 = arith.cmpi sge, %34, %35 : vector<8x8xi32>
    %c0_8 = arith.constant 0 : index
    %c0_9 = arith.constant 0 : index
    %c0_10 = arith.constant 0 : index
    %37 = vector.load %arg3[%c0_8, %c0_9, %c0_10] : memref<2x32x96xf32, #tpu.memory_space<vmem>>, vector<1x32x96xf32>
    %38 = vector.shape_cast %37 : vector<1x32x96xf32> to vector<32x96xf32>
    %cst_11 = arith.constant dense<0.000000e+00> : vector<16x96xf32>
    %39 = tpu.matmul %33, %38, %cst_11 {dimension_numbers = #tpu.dot_dimension_numbers<[1], [0], [0], [1], [0, 0, 1, 1], [], []>} : vector<16x32xf32>, vector<32x96xf32>, vector<16x96xf32> -> vector<16x96xf32>
    %c0_12 = arith.constant 0 : index
    %c0_13 = arith.constant 0 : index
    %c0_14 = arith.constant 0 : index
    %40 = vector.load %arg4[%c0_12, %c0_13, %c0_14] : memref<2x1x96xf32, #tpu.memory_space<vmem>>, vector<1x1x96xf32>
    %41 = vector.shape_cast %40 : vector<1x1x96xf32> to vector<1x96xf32>
    %42 = vector.broadcast %41 : vector<1x96xf32> to vector<16x96xf32>
    %43 = arith.addf %39, %42 : vector<16x96xf32>
    %44 = vector.extract_strided_slice %43 {offsets = [0, 0], sizes = [16, 32], strides = [1, 1]} : vector<16x96xf32> to vector<16x32xf32>
    %45 = vector.extract_strided_slice %43 {offsets = [0, 32], sizes = [16, 32], strides = [1, 1]} : vector<16x96xf32> to vector<16x32xf32>
    %46 = vector.extract_strided_slice %43 {offsets = [0, 64], sizes = [16, 32], strides = [1, 1]} : vector<16x96xf32> to vector<16x32xf32>
    %47 = vector.extract_strided_slice %44 {offsets = [0, 0], sizes = [8, 32], strides = [1, 1]} : vector<16x32xf32> to vector<8x32xf32>
    %48 = vector.extract_strided_slice %45 {offsets = [0, 0], sizes = [8, 32], strides = [1, 1]} : vector<16x32xf32> to vector<8x32xf32>
    %49 = vector.extract_strided_slice %46 {offsets = [0, 0], sizes = [8, 32], strides = [1, 1]} : vector<16x32xf32> to vector<8x32xf32>
    %50 = vector.extract_strided_slice %47 {offsets = [0, 0], sizes = [8, 8], strides = [1, 1]} : vector<8x32xf32> to vector<8x8xf32>
    %51 = vector.extract_strided_slice %48 {offsets = [0, 0], sizes = [8, 8], strides = [1, 1]} : vector<8x32xf32> to vector<8x8xf32>
    %52 = vector.extract_strided_slice %49 {offsets = [0, 0], sizes = [8, 8], strides = [1, 1]} : vector<8x32xf32> to vector<8x8xf32>
    %cst_15 = arith.constant dense<0.000000e+00> : vector<8x8xf32>
    %53 = tpu.matmul %50, %51, %cst_15 {dimension_numbers = #tpu.dot_dimension_numbers<[1], [1], [0], [0], [0, 0, 1, 0], [], []>} : vector<8x8xf32>, vector<8x8xf32>, vector<8x8xf32> -> vector<8x8xf32>
    %cst_16 = arith.constant 0.353553385 : f32
    %54 = vector.broadcast %cst_16 : f32 to vector<8x8xf32>
    %55 = arith.mulf %53, %54 : vector<8x8xf32>
    %cst_17 = arith.constant -1.000000e+30 : f32
    %56 = vector.broadcast %cst_17 : f32 to vector<8x8xf32>
    %57 = arith.select %36, %55, %56 : vector<8x8xi1>, vector<8x8xf32>
    %cst_18 = arith.constant dense<0xFF800000> : vector<8xf32>
    %58 = vector.multi_reduction <maximumf>, %57, %cst_18 [1] : vector<8x8xf32> to vector<8xf32>
    %59 = vector.shape_cast %58 : vector<8xf32> to vector<8x1xf32>
    %60 = vector.broadcast %59 : vector<8x1xf32> to vector<8x8xf32>
    %61 = arith.subf %57, %60 : vector<8x8xf32>
    %62 = math.exp %61 : vector<8x8xf32>
    %cst_19 = arith.constant dense<0.000000e+00> : vector<8xf32>
    %63 = vector.multi_reduction <add>, %62, %cst_19 [1] : vector<8x8xf32> to vector<8xf32>
    %64 = vector.shape_cast %63 : vector<8xf32> to vector<8x1xf32>
    %cst_20 = arith.constant dense<0.000000e+00> : vector<8x8xf32>
    %65 = tpu.matmul %62, %52, %cst_20 {dimension_numbers = #tpu.dot_dimension_numbers<[1], [0], [0], [1], [0, 0, 1, 1], [], []>} : vector<8x8xf32>, vector<8x8xf32>, vector<8x8xf32> -> vector<8x8xf32>
    %66 = tpu.reciprocal %64 {approx = true} : vector<8x1xf32> -> vector<8x1xf32>
    %67 = vector.broadcast %66 : vector<8x1xf32> to vector<8x8xf32>
    %68 = arith.mulf %65, %67 : vector<8x8xf32>
    %69 = vector.extract_strided_slice %47 {offsets = [0, 8], sizes = [8, 8], strides = [1, 1]} : vector<8x32xf32> to vector<8x8xf32>
    %70 = vector.extract_strided_slice %48 {offsets = [0, 8], sizes = [8, 8], strides = [1, 1]} : vector<8x32xf32> to vector<8x8xf32>
    %71 = vector.extract_strided_slice %49 {offsets = [0, 8], sizes = [8, 8], strides = [1, 1]} : vector<8x32xf32> to vector<8x8xf32>
    %cst_21 = arith.constant dense<0.000000e+00> : vector<8x8xf32>
    %72 = tpu.matmul %69, %70, %cst_21 {dimension_numbers = #tpu.dot_dimension_numbers<[1], [1], [0], [0], [0, 0, 1, 0], [], []>} : vector<8x8xf32>, vector<8x8xf32>, vector<8x8xf32> -> vector<8x8xf32>
    %cst_22 = arith.constant 0.353553385 : f32
    %73 = vector.broadcast %cst_22 : f32 to vector<8x8xf32>
    %74 = arith.mulf %72, %73 : vector<8x8xf32>
    %cst_23 = arith.constant -1.000000e+30 : f32
    %75 = vector.broadcast %cst_23 : f32 to vector<8x8xf32>
    %76 = arith.select %36, %74, %75 : vector<8x8xi1>, vector<8x8xf32>
    %cst_24 = arith.constant dense<0xFF800000> : vector<8xf32>
    %77 = vector.multi_reduction <maximumf>, %76, %cst_24 [1] : vector<8x8xf32> to vector<8xf32>
    %78 = vector.shape_cast %77 : vector<8xf32> to vector<8x1xf32>
    %79 = vector.broadcast %78 : vector<8x1xf32> to vector<8x8xf32>
    %80 = arith.subf %76, %79 : vector<8x8xf32>
    %81 = math.exp %80 : vector<8x8xf32>
    %cst_25 = arith.constant dense<0.000000e+00> : vector<8xf32>
    %82 = vector.multi_reduction <add>, %81, %cst_25 [1] : vector<8x8xf32> to vector<8xf32>
    %83 = vector.shape_cast %82 : vector<8xf32> to vector<8x1xf32>
    %cst_26 = arith.constant dense<0.000000e+00> : vector<8x8xf32>
    %84 = tpu.matmul %81, %71, %cst_26 {dimension_numbers = #tpu.dot_dimension_numbers<[1], [0], [0], [1], [0, 0, 1, 1], [], []>} : vector<8x8xf32>, vector<8x8xf32>, vector<8x8xf32> -> vector<8x8xf32>
    %85 = tpu.reciprocal %83 {approx = true} : vector<8x1xf32> -> vector<8x1xf32>
    %86 = vector.broadcast %85 : vector<8x1xf32> to vector<8x8xf32>
    %87 = arith.mulf %84, %86 : vector<8x8xf32>
    %88 = vector.extract_strided_slice %47 {offsets = [0, 16], sizes = [8, 8], strides = [1, 1]} : vector<8x32xf32> to vector<8x8xf32>
    %89 = vector.extract_strided_slice %48 {offsets = [0, 16], sizes = [8, 8], strides = [1, 1]} : vector<8x32xf32> to vector<8x8xf32>
    %90 = vector.extract_strided_slice %49 {offsets = [0, 16], sizes = [8, 8], strides = [1, 1]} : vector<8x32xf32> to vector<8x8xf32>
    %cst_27 = arith.constant dense<0.000000e+00> : vector<8x8xf32>
    %91 = tpu.matmul %88, %89, %cst_27 {dimension_numbers = #tpu.dot_dimension_numbers<[1], [1], [0], [0], [0, 0, 1, 0], [], []>} : vector<8x8xf32>, vector<8x8xf32>, vector<8x8xf32> -> vector<8x8xf32>
    %cst_28 = arith.constant 0.353553385 : f32
    %92 = vector.broadcast %cst_28 : f32 to vector<8x8xf32>
    %93 = arith.mulf %91, %92 : vector<8x8xf32>
    %cst_29 = arith.constant -1.000000e+30 : f32
    %94 = vector.broadcast %cst_29 : f32 to vector<8x8xf32>
    %95 = arith.select %36, %93, %94 : vector<8x8xi1>, vector<8x8xf32>
    %cst_30 = arith.constant dense<0xFF800000> : vector<8xf32>
    %96 = vector.multi_reduction <maximumf>, %95, %cst_30 [1] : vector<8x8xf32> to vector<8xf32>
    %97 = vector.shape_cast %96 : vector<8xf32> to vector<8x1xf32>
    %98 = vector.broadcast %97 : vector<8x1xf32> to vector<8x8xf32>
    %99 = arith.subf %95, %98 : vector<8x8xf32>
    %100 = math.exp %99 : vector<8x8xf32>
    %cst_31 = arith.constant dense<0.000000e+00> : vector<8xf32>
    %101 = vector.multi_reduction <add>, %100, %cst_31 [1] : vector<8x8xf32> to vector<8xf32>
    %102 = vector.shape_cast %101 : vector<8xf32> to vector<8x1xf32>
    %cst_32 = arith.constant dense<0.000000e+00> : vector<8x8xf32>
    %103 = tpu.matmul %100, %90, %cst_32 {dimension_numbers = #tpu.dot_dimension_numbers<[1], [0], [0], [1], [0, 0, 1, 1], [], []>} : vector<8x8xf32>, vector<8x8xf32>, vector<8x8xf32> -> vector<8x8xf32>
    %104 = tpu.reciprocal %102 {approx = true} : vector<8x1xf32> -> vector<8x1xf32>
    %105 = vector.broadcast %104 : vector<8x1xf32> to vector<8x8xf32>
    %106 = arith.mulf %103, %105 : vector<8x8xf32>
    %107 = vector.extract_strided_slice %47 {offsets = [0, 24], sizes = [8, 8], strides = [1, 1]} : vector<8x32xf32> to vector<8x8xf32>
    %108 = vector.extract_strided_slice %48 {offsets = [0, 24], sizes = [8, 8], strides = [1, 1]} : vector<8x32xf32> to vector<8x8xf32>
    %109 = vector.extract_strided_slice %49 {offsets = [0, 24], sizes = [8, 8], strides = [1, 1]} : vector<8x32xf32> to vector<8x8xf32>
    %cst_33 = arith.constant dense<0.000000e+00> : vector<8x8xf32>
    %110 = tpu.matmul %107, %108, %cst_33 {dimension_numbers = #tpu.dot_dimension_numbers<[1], [1], [0], [0], [0, 0, 1, 0], [], []>} : vector<8x8xf32>, vector<8x8xf32>, vector<8x8xf32> -> vector<8x8xf32>
    %cst_34 = arith.constant 0.353553385 : f32
    %111 = vector.broadcast %cst_34 : f32 to vector<8x8xf32>
    %112 = arith.mulf %110, %111 : vector<8x8xf32>
    %cst_35 = arith.constant -1.000000e+30 : f32
    %113 = vector.broadcast %cst_35 : f32 to vector<8x8xf32>
    %114 = arith.select %36, %112, %113 : vector<8x8xi1>, vector<8x8xf32>
    %cst_36 = arith.constant dense<0xFF800000> : vector<8xf32>
    %115 = vector.multi_reduction <maximumf>, %114, %cst_36 [1] : vector<8x8xf32> to vector<8xf32>
    %116 = vector.shape_cast %115 : vector<8xf32> to vector<8x1xf32>
    %117 = vector.broadcast %116 : vector<8x1xf32> to vector<8x8xf32>
    %118 = arith.subf %114, %117 : vector<8x8xf32>
    %119 = math.exp %118 : vector<8x8xf32>
    %cst_37 = arith.constant dense<0.000000e+00> : vector<8xf32>
    %120 = vector.multi_reduction <add>, %119, %cst_37 [1] : vector<8x8xf32> to vector<8xf32>
    %121 = vector.shape_cast %120 : vector<8xf32> to vector<8x1xf32>
    %cst_38 = arith.constant dense<0.000000e+00> : vector<8x8xf32>
    %122 = tpu.matmul %119, %109, %cst_38 {dimension_numbers = #tpu.dot_dimension_numbers<[1], [0], [0], [1], [0, 0, 1, 1], [], []>} : vector<8x8xf32>, vector<8x8xf32>, vector<8x8xf32> -> vector<8x8xf32>
    %123 = tpu.reciprocal %121 {approx = true} : vector<8x1xf32> -> vector<8x1xf32>
    %124 = vector.broadcast %123 : vector<8x1xf32> to vector<8x8xf32>
    %125 = arith.mulf %122, %124 : vector<8x8xf32>
    %126 = tpu.concatenate %68, %87, %106, %125 in 1 : vector<8x8xf32>, vector<8x8xf32>, vector<8x8xf32>, vector<8x8xf32> -> vector<8x32xf32>
    %127 = vector.extract_strided_slice %44 {offsets = [8, 0], sizes = [8, 32], strides = [1, 1]} : vector<16x32xf32> to vector<8x32xf32>
    %128 = vector.extract_strided_slice %45 {offsets = [8, 0], sizes = [8, 32], strides = [1, 1]} : vector<16x32xf32> to vector<8x32xf32>
    %129 = vector.extract_strided_slice %46 {offsets = [8, 0], sizes = [8, 32], strides = [1, 1]} : vector<16x32xf32> to vector<8x32xf32>
    %130 = vector.extract_strided_slice %127 {offsets = [0, 0], sizes = [8, 8], strides = [1, 1]} : vector<8x32xf32> to vector<8x8xf32>
    %131 = vector.extract_strided_slice %128 {offsets = [0, 0], sizes = [8, 8], strides = [1, 1]} : vector<8x32xf32> to vector<8x8xf32>
    %132 = vector.extract_strided_slice %129 {offsets = [0, 0], sizes = [8, 8], strides = [1, 1]} : vector<8x32xf32> to vector<8x8xf32>
    %cst_39 = arith.constant dense<0.000000e+00> : vector<8x8xf32>
    %133 = tpu.matmul %130, %131, %cst_39 {dimension_numbers = #tpu.dot_dimension_numbers<[1], [1], [0], [0], [0, 0, 1, 0], [], []>} : vector<8x8xf32>, vector<8x8xf32>, vector<8x8xf32> -> vector<8x8xf32>
    %cst_40 = arith.constant 0.353553385 : f32
    %134 = vector.broadcast %cst_40 : f32 to vector<8x8xf32>
    %135 = arith.mulf %133, %134 : vector<8x8xf32>
    %cst_41 = arith.constant -1.000000e+30 : f32
    %136 = vector.broadcast %cst_41 : f32 to vector<8x8xf32>
    %137 = arith.select %36, %135, %136 : vector<8x8xi1>, vector<8x8xf32>
    %cst_42 = arith.constant dense<0xFF800000> : vector<8xf32>
    %138 = vector.multi_reduction <maximumf>, %137, %cst_42 [1] : vector<8x8xf32> to vector<8xf32>
    %139 = vector.shape_cast %138 : vector<8xf32> to vector<8x1xf32>
    %140 = vector.broadcast %139 : vector<8x1xf32> to vector<8x8xf32>
    %141 = arith.subf %137, %140 : vector<8x8xf32>
    %142 = math.exp %141 : vector<8x8xf32>
    %cst_43 = arith.constant dense<0.000000e+00> : vector<8xf32>
    %143 = vector.multi_reduction <add>, %142, %cst_43 [1] : vector<8x8xf32> to vector<8xf32>
    %144 = vector.shape_cast %143 : vector<8xf32> to vector<8x1xf32>
    %cst_44 = arith.constant dense<0.000000e+00> : vector<8x8xf32>
    %145 = tpu.matmul %142, %132, %cst_44 {dimension_numbers = #tpu.dot_dimension_numbers<[1], [0], [0], [1], [0, 0, 1, 1], [], []>} : vector<8x8xf32>, vector<8x8xf32>, vector<8x8xf32> -> vector<8x8xf32>
    %146 = tpu.reciprocal %144 {approx = true} : vector<8x1xf32> -> vector<8x1xf32>
    %147 = vector.broadcast %146 : vector<8x1xf32> to vector<8x8xf32>
    %148 = arith.mulf %145, %147 : vector<8x8xf32>
    %149 = vector.extract_strided_slice %127 {offsets = [0, 8], sizes = [8, 8], strides = [1, 1]} : vector<8x32xf32> to vector<8x8xf32>
    %150 = vector.extract_strided_slice %128 {offsets = [0, 8], sizes = [8, 8], strides = [1, 1]} : vector<8x32xf32> to vector<8x8xf32>
    %151 = vector.extract_strided_slice %129 {offsets = [0, 8], sizes = [8, 8], strides = [1, 1]} : vector<8x32xf32> to vector<8x8xf32>
    %cst_45 = arith.constant dense<0.000000e+00> : vector<8x8xf32>
    %152 = tpu.matmul %149, %150, %cst_45 {dimension_numbers = #tpu.dot_dimension_numbers<[1], [1], [0], [0], [0, 0, 1, 0], [], []>} : vector<8x8xf32>, vector<8x8xf32>, vector<8x8xf32> -> vector<8x8xf32>
    %cst_46 = arith.constant 0.353553385 : f32
    %153 = vector.broadcast %cst_46 : f32 to vector<8x8xf32>
    %154 = arith.mulf %152, %153 : vector<8x8xf32>
    %cst_47 = arith.constant -1.000000e+30 : f32
    %155 = vector.broadcast %cst_47 : f32 to vector<8x8xf32>
    %156 = arith.select %36, %154, %155 : vector<8x8xi1>, vector<8x8xf32>
    %cst_48 = arith.constant dense<0xFF800000> : vector<8xf32>
    %157 = vector.multi_reduction <maximumf>, %156, %cst_48 [1] : vector<8x8xf32> to vector<8xf32>
    %158 = vector.shape_cast %157 : vector<8xf32> to vector<8x1xf32>
    %159 = vector.broadcast %158 : vector<8x1xf32> to vector<8x8xf32>
    %160 = arith.subf %156, %159 : vector<8x8xf32>
    %161 = math.exp %160 : vector<8x8xf32>
    %cst_49 = arith.constant dense<0.000000e+00> : vector<8xf32>
    %162 = vector.multi_reduction <add>, %161, %cst_49 [1] : vector<8x8xf32> to vector<8xf32>
    %163 = vector.shape_cast %162 : vector<8xf32> to vector<8x1xf32>
    %cst_50 = arith.constant dense<0.000000e+00> : vector<8x8xf32>
    %164 = tpu.matmul %161, %151, %cst_50 {dimension_numbers = #tpu.dot_dimension_numbers<[1], [0], [0], [1], [0, 0, 1, 1], [], []>} : vector<8x8xf32>, vector<8x8xf32>, vector<8x8xf32> -> vector<8x8xf32>
    %165 = tpu.reciprocal %163 {approx = true} : vector<8x1xf32> -> vector<8x1xf32>
    %166 = vector.broadcast %165 : vector<8x1xf32> to vector<8x8xf32>
    %167 = arith.mulf %164, %166 : vector<8x8xf32>
    %168 = vector.extract_strided_slice %127 {offsets = [0, 16], sizes = [8, 8], strides = [1, 1]} : vector<8x32xf32> to vector<8x8xf32>
    %169 = vector.extract_strided_slice %128 {offsets = [0, 16], sizes = [8, 8], strides = [1, 1]} : vector<8x32xf32> to vector<8x8xf32>
    %170 = vector.extract_strided_slice %129 {offsets = [0, 16], sizes = [8, 8], strides = [1, 1]} : vector<8x32xf32> to vector<8x8xf32>
    %cst_51 = arith.constant dense<0.000000e+00> : vector<8x8xf32>
    %171 = tpu.matmul %168, %169, %cst_51 {dimension_numbers = #tpu.dot_dimension_numbers<[1], [1], [0], [0], [0, 0, 1, 0], [], []>} : vector<8x8xf32>, vector<8x8xf32>, vector<8x8xf32> -> vector<8x8xf32>
    %cst_52 = arith.constant 0.353553385 : f32
    %172 = vector.broadcast %cst_52 : f32 to vector<8x8xf32>
    %173 = arith.mulf %171, %172 : vector<8x8xf32>
    %cst_53 = arith.constant -1.000000e+30 : f32
    %174 = vector.broadcast %cst_53 : f32 to vector<8x8xf32>
    %175 = arith.select %36, %173, %174 : vector<8x8xi1>, vector<8x8xf32>
    %cst_54 = arith.constant dense<0xFF800000> : vector<8xf32>
    %176 = vector.multi_reduction <maximumf>, %175, %cst_54 [1] : vector<8x8xf32> to vector<8xf32>
    %177 = vector.shape_cast %176 : vector<8xf32> to vector<8x1xf32>
    %178 = vector.broadcast %177 : vector<8x1xf32> to vector<8x8xf32>
    %179 = arith.subf %175, %178 : vector<8x8xf32>
    %180 = math.exp %179 : vector<8x8xf32>
    %cst_55 = arith.constant dense<0.000000e+00> : vector<8xf32>
    %181 = vector.multi_reduction <add>, %180, %cst_55 [1] : vector<8x8xf32> to vector<8xf32>
    %182 = vector.shape_cast %181 : vector<8xf32> to vector<8x1xf32>
    %cst_56 = arith.constant dense<0.000000e+00> : vector<8x8xf32>
    %183 = tpu.matmul %180, %170, %cst_56 {dimension_numbers = #tpu.dot_dimension_numbers<[1], [0], [0], [1], [0, 0, 1, 1], [], []>} : vector<8x8xf32>, vector<8x8xf32>, vector<8x8xf32> -> vector<8x8xf32>
    %184 = tpu.reciprocal %182 {approx = true} : vector<8x1xf32> -> vector<8x1xf32>
    %185 = vector.broadcast %184 : vector<8x1xf32> to vector<8x8xf32>
    %186 = arith.mulf %183, %185 : vector<8x8xf32>
    %187 = vector.extract_strided_slice %127 {offsets = [0, 24], sizes = [8, 8], strides = [1, 1]} : vector<8x32xf32> to vector<8x8xf32>
    %188 = vector.extract_strided_slice %128 {offsets = [0, 24], sizes = [8, 8], strides = [1, 1]} : vector<8x32xf32> to vector<8x8xf32>
    %189 = vector.extract_strided_slice %129 {offsets = [0, 24], sizes = [8, 8], strides = [1, 1]} : vector<8x32xf32> to vector<8x8xf32>
    %cst_57 = arith.constant dense<0.000000e+00> : vector<8x8xf32>
    %190 = tpu.matmul %187, %188, %cst_57 {dimension_numbers = #tpu.dot_dimension_numbers<[1], [1], [0], [0], [0, 0, 1, 0], [], []>} : vector<8x8xf32>, vector<8x8xf32>, vector<8x8xf32> -> vector<8x8xf32>
    %cst_58 = arith.constant 0.353553385 : f32
    %191 = vector.broadcast %cst_58 : f32 to vector<8x8xf32>
    %192 = arith.mulf %190, %191 : vector<8x8xf32>
    %cst_59 = arith.constant -1.000000e+30 : f32
    %193 = vector.broadcast %cst_59 : f32 to vector<8x8xf32>
    %194 = arith.select %36, %192, %193 : vector<8x8xi1>, vector<8x8xf32>
    %cst_60 = arith.constant dense<0xFF800000> : vector<8xf32>
    %195 = vector.multi_reduction <maximumf>, %194, %cst_60 [1] : vector<8x8xf32> to vector<8xf32>
    %196 = vector.shape_cast %195 : vector<8xf32> to vector<8x1xf32>
    %197 = vector.broadcast %196 : vector<8x1xf32> to vector<8x8xf32>
    %198 = arith.subf %194, %197 : vector<8x8xf32>
    %199 = math.exp %198 : vector<8x8xf32>
    %cst_61 = arith.constant dense<0.000000e+00> : vector<8xf32>
    %200 = vector.multi_reduction <add>, %199, %cst_61 [1] : vector<8x8xf32> to vector<8xf32>
    %201 = vector.shape_cast %200 : vector<8xf32> to vector<8x1xf32>
    %cst_62 = arith.constant dense<0.000000e+00> : vector<8x8xf32>
    %202 = tpu.matmul %199, %189, %cst_62 {dimension_numbers = #tpu.dot_dimension_numbers<[1], [0], [0], [1], [0, 0, 1, 1], [], []>} : vector<8x8xf32>, vector<8x8xf32>, vector<8x8xf32> -> vector<8x8xf32>
    %203 = tpu.reciprocal %201 {approx = true} : vector<8x1xf32> -> vector<8x1xf32>
    %204 = vector.broadcast %203 : vector<8x1xf32> to vector<8x8xf32>
    %205 = arith.mulf %202, %204 : vector<8x8xf32>
    %206 = tpu.concatenate %148, %167, %186, %205 in 1 : vector<8x8xf32>, vector<8x8xf32>, vector<8x8xf32>, vector<8x8xf32> -> vector<8x32xf32>
    %207 = tpu.concatenate %126, %206 in 0 : vector<8x32xf32>, vector<8x32xf32> -> vector<16x32xf32>
    %c0_63 = arith.constant 0 : index
    %c0_64 = arith.constant 0 : index
    %c0_65 = arith.constant 0 : index
    %208 = vector.load %arg5[%c0_63, %c0_64, %c0_65] : memref<2x32x32xf32, #tpu.memory_space<vmem>>, vector<1x32x32xf32>
    %209 = vector.shape_cast %208 : vector<1x32x32xf32> to vector<32x32xf32>
    %cst_66 = arith.constant dense<0.000000e+00> : vector<16x32xf32>
    %210 = tpu.matmul %207, %209, %cst_66 {dimension_numbers = #tpu.dot_dimension_numbers<[1], [0], [0], [1], [0, 0, 1, 1], [], []>} : vector<16x32xf32>, vector<32x32xf32>, vector<16x32xf32> -> vector<16x32xf32>
    %c0_67 = arith.constant 0 : index
    %c0_68 = arith.constant 0 : index
    %c0_69 = arith.constant 0 : index
    %211 = vector.load %arg6[%c0_67, %c0_68, %c0_69] : memref<2x1x32xf32, #tpu.memory_space<vmem>>, vector<1x1x32xf32>
    %212 = vector.shape_cast %211 : vector<1x1x32xf32> to vector<1x32xf32>
    %213 = vector.broadcast %212 : vector<1x32xf32> to vector<16x32xf32>
    %214 = arith.addf %210, %213 : vector<16x32xf32>
    %215 = arith.addf %33, %214 : vector<16x32xf32>
    %c0_70 = arith.constant 0 : index
    %c0_71 = arith.constant 0 : index
    %c0_72 = arith.constant 0 : index
    %216 = vector.load %arg11[%c0_70, %c0_71, %c0_72] : memref<2x1x32xf32, #tpu.memory_space<vmem>>, vector<1x1x32xf32>
    %217 = vector.shape_cast %216 : vector<1x1x32xf32> to vector<1x32xf32>
    %c0_73 = arith.constant 0 : index
    %c0_74 = arith.constant 0 : index
    %c0_75 = arith.constant 0 : index
    %218 = vector.load %arg12[%c0_73, %c0_74, %c0_75] : memref<2x1x32xf32, #tpu.memory_space<vmem>>, vector<1x1x32xf32>
    %219 = vector.shape_cast %218 : vector<1x1x32xf32> to vector<1x32xf32>
    %cst_76 = arith.constant dense<0.000000e+00> : vector<16xf32>
    %220 = vector.multi_reduction <add>, %215, %cst_76 [1] : vector<16x32xf32> to vector<16xf32>
    %221 = vector.shape_cast %220 : vector<16xf32> to vector<16x1xf32>
    %cst_77 = arith.constant 3.200000e+01 : f32
    %222 = vector.broadcast %cst_77 : f32 to vector<16x1xf32>
    %223 = arith.divf %221, %222 : vector<16x1xf32>
    %224 = vector.broadcast %223 : vector<16x1xf32> to vector<16x32xf32>
    %225 = arith.subf %215, %224 : vector<16x32xf32>
    %226 = arith.mulf %225, %225 : vector<16x32xf32>
    %cst_78 = arith.constant dense<0.000000e+00> : vector<16xf32>
    %227 = vector.multi_reduction <add>, %226, %cst_78 [1] : vector<16x32xf32> to vector<16xf32>
    %228 = vector.shape_cast %227 : vector<16xf32> to vector<16x1xf32>
    %cst_79 = arith.constant 3.200000e+01 : f32
    %229 = vector.broadcast %cst_79 : f32 to vector<16x1xf32>
    %230 = arith.divf %228, %229 : vector<16x1xf32>
    %cst_80 = arith.constant 9.99999974E-6 : f32
    %231 = vector.broadcast %cst_80 : f32 to vector<16x1xf32>
    %232 = arith.addf %230, %231 : vector<16x1xf32>
    %233 = math.rsqrt %232 : vector<16x1xf32>
    %234 = vector.broadcast %233 : vector<16x1xf32> to vector<16x32xf32>
    %235 = arith.mulf %225, %234 : vector<16x32xf32>
    %236 = vector.broadcast %217 : vector<1x32xf32> to vector<16x32xf32>
    %237 = arith.mulf %235, %236 : vector<16x32xf32>
    %238 = vector.broadcast %219 : vector<1x32xf32> to vector<16x32xf32>
    %239 = arith.addf %237, %238 : vector<16x32xf32>
    %c0_81 = arith.constant 0 : index
    %c0_82 = arith.constant 0 : index
    %c0_83 = arith.constant 0 : index
    %240 = vector.load %arg7[%c0_81, %c0_82, %c0_83] : memref<2x32x96xf32, #tpu.memory_space<vmem>>, vector<1x32x96xf32>
    %241 = vector.shape_cast %240 : vector<1x32x96xf32> to vector<32x96xf32>
    %c0_84 = arith.constant 0 : index
    %c0_85 = arith.constant 0 : index
    %c0_86 = arith.constant 0 : index
    %242 = vector.load %arg8[%c0_84, %c0_85, %c0_86] : memref<2x1x96xf32, #tpu.memory_space<vmem>>, vector<1x1x96xf32>
    %243 = vector.shape_cast %242 : vector<1x1x96xf32> to vector<1x96xf32>
    %244 = vector.extract_strided_slice %241 {offsets = [0, 0], sizes = [32, 32], strides = [1, 1]} : vector<32x96xf32> to vector<32x32xf32>
    %cst_87 = arith.constant dense<0.000000e+00> : vector<16x32xf32>
    %245 = tpu.matmul %239, %244, %cst_87 {dimension_numbers = #tpu.dot_dimension_numbers<[1], [0], [0], [1], [0, 0, 1, 1], [], []>} : vector<16x32xf32>, vector<32x32xf32>, vector<16x32xf32> -> vector<16x32xf32>
    %246 = vector.extract_strided_slice %243 {offsets = [0, 0], sizes = [1, 32], strides = [1, 1]} : vector<1x96xf32> to vector<1x32xf32>
    %247 = vector.broadcast %246 : vector<1x32xf32> to vector<16x32xf32>
    %248 = arith.addf %245, %247 : vector<16x32xf32>
    %249 = vector.extract_strided_slice %241 {offsets = [0, 32], sizes = [32, 64], strides = [1, 1]} : vector<32x96xf32> to vector<32x64xf32>
    %cst_88 = arith.constant dense<0.000000e+00> : vector<16x64xf32>
    %250 = tpu.matmul %33, %249, %cst_88 {dimension_numbers = #tpu.dot_dimension_numbers<[1], [0], [0], [1], [0, 0, 1, 1], [], []>} : vector<16x32xf32>, vector<32x64xf32>, vector<16x64xf32> -> vector<16x64xf32>
    %251 = vector.extract_strided_slice %243 {offsets = [0, 32], sizes = [1, 64], strides = [1, 1]} : vector<1x96xf32> to vector<1x64xf32>
    %252 = vector.broadcast %251 : vector<1x64xf32> to vector<16x64xf32>
    %253 = arith.addf %250, %252 : vector<16x64xf32>
    %254 = vector.extract_strided_slice %253 {offsets = [0, 0], sizes = [16, 32], strides = [1, 1]} : vector<16x64xf32> to vector<16x32xf32>
    %255 = vector.extract_strided_slice %253 {offsets = [0, 32], sizes = [16, 32], strides = [1, 1]} : vector<16x64xf32> to vector<16x32xf32>
    %256 = vector.extract_strided_slice %248 {offsets = [0, 0], sizes = [8, 32], strides = [1, 1]} : vector<16x32xf32> to vector<8x32xf32>
    %257 = vector.extract_strided_slice %254 {offsets = [0, 0], sizes = [8, 32], strides = [1, 1]} : vector<16x32xf32> to vector<8x32xf32>
    %258 = vector.extract_strided_slice %255 {offsets = [0, 0], sizes = [8, 32], strides = [1, 1]} : vector<16x32xf32> to vector<8x32xf32>
    %259 = vector.extract_strided_slice %256 {offsets = [0, 0], sizes = [8, 8], strides = [1, 1]} : vector<8x32xf32> to vector<8x8xf32>
    %260 = vector.extract_strided_slice %257 {offsets = [0, 0], sizes = [8, 8], strides = [1, 1]} : vector<8x32xf32> to vector<8x8xf32>
    %261 = vector.extract_strided_slice %258 {offsets = [0, 0], sizes = [8, 8], strides = [1, 1]} : vector<8x32xf32> to vector<8x8xf32>
    %cst_89 = arith.constant dense<0.000000e+00> : vector<8x8xf32>
    %262 = tpu.matmul %259, %260, %cst_89 {dimension_numbers = #tpu.dot_dimension_numbers<[1], [1], [0], [0], [0, 0, 1, 0], [], []>} : vector<8x8xf32>, vector<8x8xf32>, vector<8x8xf32> -> vector<8x8xf32>
    %cst_90 = arith.constant 0.353553385 : f32
    %263 = vector.broadcast %cst_90 : f32 to vector<8x8xf32>
    %264 = arith.mulf %262, %263 : vector<8x8xf32>
    %cst_91 = arith.constant dense<0xFF800000> : vector<8xf32>
    %265 = vector.multi_reduction <maximumf>, %264, %cst_91 [1] : vector<8x8xf32> to vector<8xf32>
    %266 = vector.shape_cast %265 : vector<8xf32> to vector<8x1xf32>
    %267 = vector.broadcast %266 : vector<8x1xf32> to vector<8x8xf32>
    %268 = arith.subf %264, %267 : vector<8x8xf32>
    %269 = math.exp %268 : vector<8x8xf32>
    %cst_92 = arith.constant dense<0.000000e+00> : vector<8xf32>
    %270 = vector.multi_reduction <add>, %269, %cst_92 [1] : vector<8x8xf32> to vector<8xf32>
    %271 = vector.shape_cast %270 : vector<8xf32> to vector<8x1xf32>
    %cst_93 = arith.constant dense<0.000000e+00> : vector<8x8xf32>
    %272 = tpu.matmul %269, %261, %cst_93 {dimension_numbers = #tpu.dot_dimension_numbers<[1], [0], [0], [1], [0, 0, 1, 1], [], []>} : vector<8x8xf32>, vector<8x8xf32>, vector<8x8xf32> -> vector<8x8xf32>
    %273 = tpu.reciprocal %271 {approx = true} : vector<8x1xf32> -> vector<8x1xf32>
    %274 = vector.broadcast %273 : vector<8x1xf32> to vector<8x8xf32>
    %275 = arith.mulf %272, %274 : vector<8x8xf32>
    %276 = vector.extract_strided_slice %256 {offsets = [0, 8], sizes = [8, 8], strides = [1, 1]} : vector<8x32xf32> to vector<8x8xf32>
    %277 = vector.extract_strided_slice %257 {offsets = [0, 8], sizes = [8, 8], strides = [1, 1]} : vector<8x32xf32> to vector<8x8xf32>
    %278 = vector.extract_strided_slice %258 {offsets = [0, 8], sizes = [8, 8], strides = [1, 1]} : vector<8x32xf32> to vector<8x8xf32>
    %cst_94 = arith.constant dense<0.000000e+00> : vector<8x8xf32>
    %279 = tpu.matmul %276, %277, %cst_94 {dimension_numbers = #tpu.dot_dimension_numbers<[1], [1], [0], [0], [0, 0, 1, 0], [], []>} : vector<8x8xf32>, vector<8x8xf32>, vector<8x8xf32> -> vector<8x8xf32>
    %cst_95 = arith.constant 0.353553385 : f32
    %280 = vector.broadcast %cst_95 : f32 to vector<8x8xf32>
    %281 = arith.mulf %279, %280 : vector<8x8xf32>
    %cst_96 = arith.constant dense<0xFF800000> : vector<8xf32>
    %282 = vector.multi_reduction <maximumf>, %281, %cst_96 [1] : vector<8x8xf32> to vector<8xf32>
    %283 = vector.shape_cast %282 : vector<8xf32> to vector<8x1xf32>
    %284 = vector.broadcast %283 : vector<8x1xf32> to vector<8x8xf32>
    %285 = arith.subf %281, %284 : vector<8x8xf32>
    %286 = math.exp %285 : vector<8x8xf32>
    %cst_97 = arith.constant dense<0.000000e+00> : vector<8xf32>
    %287 = vector.multi_reduction <add>, %286, %cst_97 [1] : vector<8x8xf32> to vector<8xf32>
    %288 = vector.shape_cast %287 : vector<8xf32> to vector<8x1xf32>
    %cst_98 = arith.constant dense<0.000000e+00> : vector<8x8xf32>
    %289 = tpu.matmul %286, %278, %cst_98 {dimension_numbers = #tpu.dot_dimension_numbers<[1], [0], [0], [1], [0, 0, 1, 1], [], []>} : vector<8x8xf32>, vector<8x8xf32>, vector<8x8xf32> -> vector<8x8xf32>
    %290 = tpu.reciprocal %288 {approx = true} : vector<8x1xf32> -> vector<8x1xf32>
    %291 = vector.broadcast %290 : vector<8x1xf32> to vector<8x8xf32>
    %292 = arith.mulf %289, %291 : vector<8x8xf32>
    %293 = vector.extract_strided_slice %256 {offsets = [0, 16], sizes = [8, 8], strides = [1, 1]} : vector<8x32xf32> to vector<8x8xf32>
    %294 = vector.extract_strided_slice %257 {offsets = [0, 16], sizes = [8, 8], strides = [1, 1]} : vector<8x32xf32> to vector<8x8xf32>
    %295 = vector.extract_strided_slice %258 {offsets = [0, 16], sizes = [8, 8], strides = [1, 1]} : vector<8x32xf32> to vector<8x8xf32>
    %cst_99 = arith.constant dense<0.000000e+00> : vector<8x8xf32>
    %296 = tpu.matmul %293, %294, %cst_99 {dimension_numbers = #tpu.dot_dimension_numbers<[1], [1], [0], [0], [0, 0, 1, 0], [], []>} : vector<8x8xf32>, vector<8x8xf32>, vector<8x8xf32> -> vector<8x8xf32>
    %cst_100 = arith.constant 0.353553385 : f32
    %297 = vector.broadcast %cst_100 : f32 to vector<8x8xf32>
    %298 = arith.mulf %296, %297 : vector<8x8xf32>
    %cst_101 = arith.constant dense<0xFF800000> : vector<8xf32>
    %299 = vector.multi_reduction <maximumf>, %298, %cst_101 [1] : vector<8x8xf32> to vector<8xf32>
    %300 = vector.shape_cast %299 : vector<8xf32> to vector<8x1xf32>
    %301 = vector.broadcast %300 : vector<8x1xf32> to vector<8x8xf32>
    %302 = arith.subf %298, %301 : vector<8x8xf32>
    %303 = math.exp %302 : vector<8x8xf32>
    %cst_102 = arith.constant dense<0.000000e+00> : vector<8xf32>
    %304 = vector.multi_reduction <add>, %303, %cst_102 [1] : vector<8x8xf32> to vector<8xf32>
    %305 = vector.shape_cast %304 : vector<8xf32> to vector<8x1xf32>
    %cst_103 = arith.constant dense<0.000000e+00> : vector<8x8xf32>
    %306 = tpu.matmul %303, %295, %cst_103 {dimension_numbers = #tpu.dot_dimension_numbers<[1], [0], [0], [1], [0, 0, 1, 1], [], []>} : vector<8x8xf32>, vector<8x8xf32>, vector<8x8xf32> -> vector<8x8xf32>
    %307 = tpu.reciprocal %305 {approx = true} : vector<8x1xf32> -> vector<8x1xf32>
    %308 = vector.broadcast %307 : vector<8x1xf32> to vector<8x8xf32>
    %309 = arith.mulf %306, %308 : vector<8x8xf32>
    %310 = vector.extract_strided_slice %256 {offsets = [0, 24], sizes = [8, 8], strides = [1, 1]} : vector<8x32xf32> to vector<8x8xf32>
    %311 = vector.extract_strided_slice %257 {offsets = [0, 24], sizes = [8, 8], strides = [1, 1]} : vector<8x32xf32> to vector<8x8xf32>
    %312 = vector.extract_strided_slice %258 {offsets = [0, 24], sizes = [8, 8], strides = [1, 1]} : vector<8x32xf32> to vector<8x8xf32>
    %cst_104 = arith.constant dense<0.000000e+00> : vector<8x8xf32>
    %313 = tpu.matmul %310, %311, %cst_104 {dimension_numbers = #tpu.dot_dimension_numbers<[1], [1], [0], [0], [0, 0, 1, 0], [], []>} : vector<8x8xf32>, vector<8x8xf32>, vector<8x8xf32> -> vector<8x8xf32>
    %cst_105 = arith.constant 0.353553385 : f32
    %314 = vector.broadcast %cst_105 : f32 to vector<8x8xf32>
    %315 = arith.mulf %313, %314 : vector<8x8xf32>
    %cst_106 = arith.constant dense<0xFF800000> : vector<8xf32>
    %316 = vector.multi_reduction <maximumf>, %315, %cst_106 [1] : vector<8x8xf32> to vector<8xf32>
    %317 = vector.shape_cast %316 : vector<8xf32> to vector<8x1xf32>
    %318 = vector.broadcast %317 : vector<8x1xf32> to vector<8x8xf32>
    %319 = arith.subf %315, %318 : vector<8x8xf32>
    %320 = math.exp %319 : vector<8x8xf32>
    %cst_107 = arith.constant dense<0.000000e+00> : vector<8xf32>
    %321 = vector.multi_reduction <add>, %320, %cst_107 [1] : vector<8x8xf32> to vector<8xf32>
    %322 = vector.shape_cast %321 : vector<8xf32> to vector<8x1xf32>
    %cst_108 = arith.constant dense<0.000000e+00> : vector<8x8xf32>
    %323 = tpu.matmul %320, %312, %cst_108 {dimension_numbers = #tpu.dot_dimension_numbers<[1], [0], [0], [1], [0, 0, 1, 1], [], []>} : vector<8x8xf32>, vector<8x8xf32>, vector<8x8xf32> -> vector<8x8xf32>
    %324 = tpu.reciprocal %322 {approx = true} : vector<8x1xf32> -> vector<8x1xf32>
    %325 = vector.broadcast %324 : vector<8x1xf32> to vector<8x8xf32>
    %326 = arith.mulf %323, %325 : vector<8x8xf32>
    %327 = tpu.concatenate %275, %292, %309, %326 in 1 : vector<8x8xf32>, vector<8x8xf32>, vector<8x8xf32>, vector<8x8xf32> -> vector<8x32xf32>
    %328 = vector.extract_strided_slice %248 {offsets = [8, 0], sizes = [8, 32], strides = [1, 1]} : vector<16x32xf32> to vector<8x32xf32>
    %329 = vector.extract_strided_slice %254 {offsets = [8, 0], sizes = [8, 32], strides = [1, 1]} : vector<16x32xf32> to vector<8x32xf32>
    %330 = vector.extract_strided_slice %255 {offsets = [8, 0], sizes = [8, 32], strides = [1, 1]} : vector<16x32xf32> to vector<8x32xf32>
    %331 = vector.extract_strided_slice %328 {offsets = [0, 0], sizes = [8, 8], strides = [1, 1]} : vector<8x32xf32> to vector<8x8xf32>
    %332 = vector.extract_strided_slice %329 {offsets = [0, 0], sizes = [8, 8], strides = [1, 1]} : vector<8x32xf32> to vector<8x8xf32>
    %333 = vector.extract_strided_slice %330 {offsets = [0, 0], sizes = [8, 8], strides = [1, 1]} : vector<8x32xf32> to vector<8x8xf32>
    %cst_109 = arith.constant dense<0.000000e+00> : vector<8x8xf32>
    %334 = tpu.matmul %331, %332, %cst_109 {dimension_numbers = #tpu.dot_dimension_numbers<[1], [1], [0], [0], [0, 0, 1, 0], [], []>} : vector<8x8xf32>, vector<8x8xf32>, vector<8x8xf32> -> vector<8x8xf32>
    %cst_110 = arith.constant 0.353553385 : f32
    %335 = vector.broadcast %cst_110 : f32 to vector<8x8xf32>
    %336 = arith.mulf %334, %335 : vector<8x8xf32>
    %cst_111 = arith.constant dense<0xFF800000> : vector<8xf32>
    %337 = vector.multi_reduction <maximumf>, %336, %cst_111 [1] : vector<8x8xf32> to vector<8xf32>
    %338 = vector.shape_cast %337 : vector<8xf32> to vector<8x1xf32>
    %339 = vector.broadcast %338 : vector<8x1xf32> to vector<8x8xf32>
    %340 = arith.subf %336, %339 : vector<8x8xf32>
    %341 = math.exp %340 : vector<8x8xf32>
    %cst_112 = arith.constant dense<0.000000e+00> : vector<8xf32>
    %342 = vector.multi_reduction <add>, %341, %cst_112 [1] : vector<8x8xf32> to vector<8xf32>
    %343 = vector.shape_cast %342 : vector<8xf32> to vector<8x1xf32>
    %cst_113 = arith.constant dense<0.000000e+00> : vector<8x8xf32>
    %344 = tpu.matmul %341, %333, %cst_113 {dimension_numbers = #tpu.dot_dimension_numbers<[1], [0], [0], [1], [0, 0, 1, 1], [], []>} : vector<8x8xf32>, vector<8x8xf32>, vector<8x8xf32> -> vector<8x8xf32>
    %345 = tpu.reciprocal %343 {approx = true} : vector<8x1xf32> -> vector<8x1xf32>
    %346 = vector.broadcast %345 : vector<8x1xf32> to vector<8x8xf32>
    %347 = arith.mulf %344, %346 : vector<8x8xf32>
    %348 = vector.extract_strided_slice %328 {offsets = [0, 8], sizes = [8, 8], strides = [1, 1]} : vector<8x32xf32> to vector<8x8xf32>
    %349 = vector.extract_strided_slice %329 {offsets = [0, 8], sizes = [8, 8], strides = [1, 1]} : vector<8x32xf32> to vector<8x8xf32>
    %350 = vector.extract_strided_slice %330 {offsets = [0, 8], sizes = [8, 8], strides = [1, 1]} : vector<8x32xf32> to vector<8x8xf32>
    %cst_114 = arith.constant dense<0.000000e+00> : vector<8x8xf32>
    %351 = tpu.matmul %348, %349, %cst_114 {dimension_numbers = #tpu.dot_dimension_numbers<[1], [1], [0], [0], [0, 0, 1, 0], [], []>} : vector<8x8xf32>, vector<8x8xf32>, vector<8x8xf32> -> vector<8x8xf32>
    %cst_115 = arith.constant 0.353553385 : f32
    %352 = vector.broadcast %cst_115 : f32 to vector<8x8xf32>
    %353 = arith.mulf %351, %352 : vector<8x8xf32>
    %cst_116 = arith.constant dense<0xFF800000> : vector<8xf32>
    %354 = vector.multi_reduction <maximumf>, %353, %cst_116 [1] : vector<8x8xf32> to vector<8xf32>
    %355 = vector.shape_cast %354 : vector<8xf32> to vector<8x1xf32>
    %356 = vector.broadcast %355 : vector<8x1xf32> to vector<8x8xf32>
    %357 = arith.subf %353, %356 : vector<8x8xf32>
    %358 = math.exp %357 : vector<8x8xf32>
    %cst_117 = arith.constant dense<0.000000e+00> : vector<8xf32>
    %359 = vector.multi_reduction <add>, %358, %cst_117 [1] : vector<8x8xf32> to vector<8xf32>
    %360 = vector.shape_cast %359 : vector<8xf32> to vector<8x1xf32>
    %cst_118 = arith.constant dense<0.000000e+00> : vector<8x8xf32>
    %361 = tpu.matmul %358, %350, %cst_118 {dimension_numbers = #tpu.dot_dimension_numbers<[1], [0], [0], [1], [0, 0, 1, 1], [], []>} : vector<8x8xf32>, vector<8x8xf32>, vector<8x8xf32> -> vector<8x8xf32>
    %362 = tpu.reciprocal %360 {approx = true} : vector<8x1xf32> -> vector<8x1xf32>
    %363 = vector.broadcast %362 : vector<8x1xf32> to vector<8x8xf32>
    %364 = arith.mulf %361, %363 : vector<8x8xf32>
    %365 = vector.extract_strided_slice %328 {offsets = [0, 16], sizes = [8, 8], strides = [1, 1]} : vector<8x32xf32> to vector<8x8xf32>
    %366 = vector.extract_strided_slice %329 {offsets = [0, 16], sizes = [8, 8], strides = [1, 1]} : vector<8x32xf32> to vector<8x8xf32>
    %367 = vector.extract_strided_slice %330 {offsets = [0, 16], sizes = [8, 8], strides = [1, 1]} : vector<8x32xf32> to vector<8x8xf32>
    %cst_119 = arith.constant dense<0.000000e+00> : vector<8x8xf32>
    %368 = tpu.matmul %365, %366, %cst_119 {dimension_numbers = #tpu.dot_dimension_numbers<[1], [1], [0], [0], [0, 0, 1, 0], [], []>} : vector<8x8xf32>, vector<8x8xf32>, vector<8x8xf32> -> vector<8x8xf32>
    %cst_120 = arith.constant 0.353553385 : f32
    %369 = vector.broadcast %cst_120 : f32 to vector<8x8xf32>
    %370 = arith.mulf %368, %369 : vector<8x8xf32>
    %cst_121 = arith.constant dense<0xFF800000> : vector<8xf32>
    %371 = vector.multi_reduction <maximumf>, %370, %cst_121 [1] : vector<8x8xf32> to vector<8xf32>
    %372 = vector.shape_cast %371 : vector<8xf32> to vector<8x1xf32>
    %373 = vector.broadcast %372 : vector<8x1xf32> to vector<8x8xf32>
    %374 = arith.subf %370, %373 : vector<8x8xf32>
    %375 = math.exp %374 : vector<8x8xf32>
    %cst_122 = arith.constant dense<0.000000e+00> : vector<8xf32>
    %376 = vector.multi_reduction <add>, %375, %cst_122 [1] : vector<8x8xf32> to vector<8xf32>
    %377 = vector.shape_cast %376 : vector<8xf32> to vector<8x1xf32>
    %cst_123 = arith.constant dense<0.000000e+00> : vector<8x8xf32>
    %378 = tpu.matmul %375, %367, %cst_123 {dimension_numbers = #tpu.dot_dimension_numbers<[1], [0], [0], [1], [0, 0, 1, 1], [], []>} : vector<8x8xf32>, vector<8x8xf32>, vector<8x8xf32> -> vector<8x8xf32>
    %379 = tpu.reciprocal %377 {approx = true} : vector<8x1xf32> -> vector<8x1xf32>
    %380 = vector.broadcast %379 : vector<8x1xf32> to vector<8x8xf32>
    %381 = arith.mulf %378, %380 : vector<8x8xf32>
    %382 = vector.extract_strided_slice %328 {offsets = [0, 24], sizes = [8, 8], strides = [1, 1]} : vector<8x32xf32> to vector<8x8xf32>
    %383 = vector.extract_strided_slice %329 {offsets = [0, 24], sizes = [8, 8], strides = [1, 1]} : vector<8x32xf32> to vector<8x8xf32>
    %384 = vector.extract_strided_slice %330 {offsets = [0, 24], sizes = [8, 8], strides = [1, 1]} : vector<8x32xf32> to vector<8x8xf32>
    %cst_124 = arith.constant dense<0.000000e+00> : vector<8x8xf32>
    %385 = tpu.matmul %382, %383, %cst_124 {dimension_numbers = #tpu.dot_dimension_numbers<[1], [1], [0], [0], [0, 0, 1, 0], [], []>} : vector<8x8xf32>, vector<8x8xf32>, vector<8x8xf32> -> vector<8x8xf32>
    %cst_125 = arith.constant 0.353553385 : f32
    %386 = vector.broadcast %cst_125 : f32 to vector<8x8xf32>
    %387 = arith.mulf %385, %386 : vector<8x8xf32>
    %cst_126 = arith.constant dense<0xFF800000> : vector<8xf32>
    %388 = vector.multi_reduction <maximumf>, %387, %cst_126 [1] : vector<8x8xf32> to vector<8xf32>
    %389 = vector.shape_cast %388 : vector<8xf32> to vector<8x1xf32>
    %390 = vector.broadcast %389 : vector<8x1xf32> to vector<8x8xf32>
    %391 = arith.subf %387, %390 : vector<8x8xf32>
    %392 = math.exp %391 : vector<8x8xf32>
    %cst_127 = arith.constant dense<0.000000e+00> : vector<8xf32>
    %393 = vector.multi_reduction <add>, %392, %cst_127 [1] : vector<8x8xf32> to vector<8xf32>
    %394 = vector.shape_cast %393 : vector<8xf32> to vector<8x1xf32>
    %cst_128 = arith.constant dense<0.000000e+00> : vector<8x8xf32>
    %395 = tpu.matmul %392, %384, %cst_128 {dimension_numbers = #tpu.dot_dimension_numbers<[1], [0], [0], [1], [0, 0, 1, 1], [], []>} : vector<8x8xf32>, vector<8x8xf32>, vector<8x8xf32> -> vector<8x8xf32>
    %396 = tpu.reciprocal %394 {approx = true} : vector<8x1xf32> -> vector<8x1xf32>
    %397 = vector.broadcast %396 : vector<8x1xf32> to vector<8x8xf32>
    %398 = arith.mulf %395, %397 : vector<8x8xf32>
    %399 = tpu.concatenate %347, %364, %381, %398 in 1 : vector<8x8xf32>, vector<8x8xf32>, vector<8x8xf32>, vector<8x8xf32> -> vector<8x32xf32>
    %400 = tpu.concatenate %327, %399 in 0 : vector<8x32xf32>, vector<8x32xf32> -> vector<16x32xf32>
    %c0_129 = arith.constant 0 : index
    %c0_130 = arith.constant 0 : index
    %c0_131 = arith.constant 0 : index
    %401 = vector.load %arg9[%c0_129, %c0_130, %c0_131] : memref<2x32x32xf32, #tpu.memory_space<vmem>>, vector<1x32x32xf32>
    %402 = vector.shape_cast %401 : vector<1x32x32xf32> to vector<32x32xf32>
    %cst_132 = arith.constant dense<0.000000e+00> : vector<16x32xf32>
    %403 = tpu.matmul %400, %402, %cst_132 {dimension_numbers = #tpu.dot_dimension_numbers<[1], [0], [0], [1], [0, 0, 1, 1], [], []>} : vector<16x32xf32>, vector<32x32xf32>, vector<16x32xf32> -> vector<16x32xf32>
    %c0_133 = arith.constant 0 : index
    %c0_134 = arith.constant 0 : index
    %c0_135 = arith.constant 0 : index
    %404 = vector.load %arg10[%c0_133, %c0_134, %c0_135] : memref<2x1x32xf32, #tpu.memory_space<vmem>>, vector<1x1x32xf32>
    %405 = vector.shape_cast %404 : vector<1x1x32xf32> to vector<1x32xf32>
    %406 = vector.broadcast %405 : vector<1x32xf32> to vector<16x32xf32>
    %407 = arith.addf %403, %406 : vector<16x32xf32>
    %408 = arith.addf %239, %407 : vector<16x32xf32>
    %c0_136 = arith.constant 0 : index
    %c0_137 = arith.constant 0 : index
    %c0_138 = arith.constant 0 : index
    %409 = vector.load %arg13[%c0_136, %c0_137, %c0_138] : memref<2x1x32xf32, #tpu.memory_space<vmem>>, vector<1x1x32xf32>
    %410 = vector.shape_cast %409 : vector<1x1x32xf32> to vector<1x32xf32>
    %c0_139 = arith.constant 0 : index
    %c0_140 = arith.constant 0 : index
    %c0_141 = arith.constant 0 : index
    %411 = vector.load %arg14[%c0_139, %c0_140, %c0_141] : memref<2x1x32xf32, #tpu.memory_space<vmem>>, vector<1x1x32xf32>
    %412 = vector.shape_cast %411 : vector<1x1x32xf32> to vector<1x32xf32>
    %cst_142 = arith.constant dense<0.000000e+00> : vector<16xf32>
    %413 = vector.multi_reduction <add>, %408, %cst_142 [1] : vector<16x32xf32> to vector<16xf32>
    %414 = vector.shape_cast %413 : vector<16xf32> to vector<16x1xf32>
    %cst_143 = arith.constant 3.200000e+01 : f32
    %415 = vector.broadcast %cst_143 : f32 to vector<16x1xf32>
    %416 = arith.divf %414, %415 : vector<16x1xf32>
    %417 = vector.broadcast %416 : vector<16x1xf32> to vector<16x32xf32>
    %418 = arith.subf %408, %417 : vector<16x32xf32>
    %419 = arith.mulf %418, %418 : vector<16x32xf32>
    %cst_144 = arith.constant dense<0.000000e+00> : vector<16xf32>
    %420 = vector.multi_reduction <add>, %419, %cst_144 [1] : vector<16x32xf32> to vector<16xf32>
    %421 = vector.shape_cast %420 : vector<16xf32> to vector<16x1xf32>
    %cst_145 = arith.constant 3.200000e+01 : f32
    %422 = vector.broadcast %cst_145 : f32 to vector<16x1xf32>
    %423 = arith.divf %421, %422 : vector<16x1xf32>
    %cst_146 = arith.constant 9.99999974E-6 : f32
    %424 = vector.broadcast %cst_146 : f32 to vector<16x1xf32>
    %425 = arith.addf %423, %424 : vector<16x1xf32>
    %426 = math.rsqrt %425 : vector<16x1xf32>
    %427 = vector.broadcast %426 : vector<16x1xf32> to vector<16x32xf32>
    %428 = arith.mulf %418, %427 : vector<16x32xf32>
    %429 = vector.broadcast %410 : vector<1x32xf32> to vector<16x32xf32>
    %430 = arith.mulf %428, %429 : vector<16x32xf32>
    %431 = vector.broadcast %412 : vector<1x32xf32> to vector<16x32xf32>
    %432 = arith.addf %430, %431 : vector<16x32xf32>
    %c0_147 = arith.constant 0 : index
    %c0_148 = arith.constant 0 : index
    %c0_149 = arith.constant 0 : index
    %433 = vector.load %arg17[%c0_147, %c0_148, %c0_149] : memref<2x32x64xf32, #tpu.memory_space<vmem>>, vector<1x32x64xf32>
    %434 = vector.shape_cast %433 : vector<1x32x64xf32> to vector<32x64xf32>
    %cst_150 = arith.constant dense<0.000000e+00> : vector<16x64xf32>
    %435 = tpu.matmul %432, %434, %cst_150 {dimension_numbers = #tpu.dot_dimension_numbers<[1], [0], [0], [1], [0, 0, 1, 1], [], []>} : vector<16x32xf32>, vector<32x64xf32>, vector<16x64xf32> -> vector<16x64xf32>
    %c0_151 = arith.constant 0 : index
    %c0_152 = arith.constant 0 : index
    %c0_153 = arith.constant 0 : index
    %436 = vector.load %arg18[%c0_151, %c0_152, %c0_153] : memref<2x1x64xf32, #tpu.memory_space<vmem>>, vector<1x1x64xf32>
    %437 = vector.shape_cast %436 : vector<1x1x64xf32> to vector<1x64xf32>
    %438 = vector.broadcast %437 : vector<1x64xf32> to vector<16x64xf32>
    %439 = arith.addf %435, %438 : vector<16x64xf32>
    %cst_154 = arith.constant 5.000000e-01 : f32
    %440 = vector.broadcast %cst_154 : f32 to vector<16x64xf32>
    %441 = arith.mulf %440, %439 : vector<16x64xf32>
    %cst_155 = arith.constant 0.707106769 : f32
    %442 = vector.broadcast %cst_155 : f32 to vector<16x64xf32>
    %443 = arith.mulf %439, %442 : vector<16x64xf32>
    %444 = math.erf %443 : vector<16x64xf32>
    %cst_156 = arith.constant 1.000000e+00 : f32
    %445 = vector.broadcast %cst_156 : f32 to vector<16x64xf32>
    %446 = arith.addf %445, %444 : vector<16x64xf32>
    %447 = arith.mulf %441, %446 : vector<16x64xf32>
    %c0_157 = arith.constant 0 : index
    %c0_158 = arith.constant 0 : index
    %c0_159 = arith.constant 0 : index
    %448 = vector.load %arg19[%c0_157, %c0_158, %c0_159] : memref<2x64x32xf32, #tpu.memory_space<vmem>>, vector<1x64x32xf32>
    %449 = vector.shape_cast %448 : vector<1x64x32xf32> to vector<64x32xf32>
    %cst_160 = arith.constant dense<0.000000e+00> : vector<16x32xf32>
    %450 = tpu.matmul %447, %449, %cst_160 {dimension_numbers = #tpu.dot_dimension_numbers<[1], [0], [0], [1], [0, 0, 1, 1], [], []>} : vector<16x64xf32>, vector<64x32xf32>, vector<16x32xf32> -> vector<16x32xf32>
    %c0_161 = arith.constant 0 : index
    %c0_162 = arith.constant 0 : index
    %c0_163 = arith.constant 0 : index
    %451 = vector.load %arg20[%c0_161, %c0_162, %c0_163] : memref<2x1x32xf32, #tpu.memory_space<vmem>>, vector<1x1x32xf32>
    %452 = vector.shape_cast %451 : vector<1x1x32xf32> to vector<1x32xf32>
    %453 = vector.broadcast %452 : vector<1x32xf32> to vector<16x32xf32>
    %454 = arith.addf %450, %453 : vector<16x32xf32>
    %455 = arith.addf %432, %454 : vector<16x32xf32>
    %c0_164 = arith.constant 0 : index
    %c0_165 = arith.constant 0 : index
    %c0_166 = arith.constant 0 : index
    %456 = vector.load %arg15[%c0_164, %c0_165, %c0_166] : memref<2x1x32xf32, #tpu.memory_space<vmem>>, vector<1x1x32xf32>
    %457 = vector.shape_cast %456 : vector<1x1x32xf32> to vector<1x32xf32>
    %c0_167 = arith.constant 0 : index
    %c0_168 = arith.constant 0 : index
    %c0_169 = arith.constant 0 : index
    %458 = vector.load %arg16[%c0_167, %c0_168, %c0_169] : memref<2x1x32xf32, #tpu.memory_space<vmem>>, vector<1x1x32xf32>
    %459 = vector.shape_cast %458 : vector<1x1x32xf32> to vector<1x32xf32>
    %cst_170 = arith.constant dense<0.000000e+00> : vector<16xf32>
    %460 = vector.multi_reduction <add>, %455, %cst_170 [1] : vector<16x32xf32> to vector<16xf32>
    %461 = vector.shape_cast %460 : vector<16xf32> to vector<16x1xf32>
    %cst_171 = arith.constant 3.200000e+01 : f32
    %462 = vector.broadcast %cst_171 : f32 to vector<16x1xf32>
    %463 = arith.divf %461, %462 : vector<16x1xf32>
    %464 = vector.broadcast %463 : vector<16x1xf32> to vector<16x32xf32>
    %465 = arith.subf %455, %464 : vector<16x32xf32>
    %466 = arith.mulf %465, %465 : vector<16x32xf32>
    %cst_172 = arith.constant dense<0.000000e+00> : vector<16xf32>
    %467 = vector.multi_reduction <add>, %466, %cst_172 [1] : vector<16x32xf32> to vector<16xf32>
    %468 = vector.shape_cast %467 : vector<16xf32> to vector<16x1xf32>
    %cst_173 = arith.constant 3.200000e+01 : f32
    %469 = vector.broadcast %cst_173 : f32 to vector<16x1xf32>
    %470 = arith.divf %468, %469 : vector<16x1xf32>
    %cst_174 = arith.constant 9.99999974E-6 : f32
    %471 = vector.broadcast %cst_174 : f32 to vector<16x1xf32>
    %472 = arith.addf %470, %471 : vector<16x1xf32>
    %473 = math.rsqrt %472 : vector<16x1xf32>
    %474 = vector.broadcast %473 : vector<16x1xf32> to vector<16x32xf32>
    %475 = arith.mulf %465, %474 : vector<16x32xf32>
    %476 = vector.broadcast %457 : vector<1x32xf32> to vector<16x32xf32>
    %477 = arith.mulf %475, %476 : vector<16x32xf32>
    %478 = vector.broadcast %459 : vector<1x32xf32> to vector<16x32xf32>
    %479 = arith.addf %477, %478 : vector<16x32xf32>
    %c1_175 = arith.constant 1 : index
    %c0_176 = arith.constant 0 : index
    %c0_177 = arith.constant 0 : index
    %480 = vector.load %arg3[%c1_175, %c0_176, %c0_177] : memref<2x32x96xf32, #tpu.memory_space<vmem>>, vector<1x32x96xf32>
    %481 = vector.shape_cast %480 : vector<1x32x96xf32> to vector<32x96xf32>
    %cst_178 = arith.constant dense<0.000000e+00> : vector<16x96xf32>
    %482 = tpu.matmul %479, %481, %cst_178 {dimension_numbers = #tpu.dot_dimension_numbers<[1], [0], [0], [1], [0, 0, 1, 1], [], []>} : vector<16x32xf32>, vector<32x96xf32>, vector<16x96xf32> -> vector<16x96xf32>
    %c1_179 = arith.constant 1 : index
    %c0_180 = arith.constant 0 : index
    %c0_181 = arith.constant 0 : index
    %483 = vector.load %arg4[%c1_179, %c0_180, %c0_181] : memref<2x1x96xf32, #tpu.memory_space<vmem>>, vector<1x1x96xf32>
    %484 = vector.shape_cast %483 : vector<1x1x96xf32> to vector<1x96xf32>
    %485 = vector.broadcast %484 : vector<1x96xf32> to vector<16x96xf32>
    %486 = arith.addf %482, %485 : vector<16x96xf32>
    %487 = vector.extract_strided_slice %486 {offsets = [0, 0], sizes = [16, 32], strides = [1, 1]} : vector<16x96xf32> to vector<16x32xf32>
    %488 = vector.extract_strided_slice %486 {offsets = [0, 32], sizes = [16, 32], strides = [1, 1]} : vector<16x96xf32> to vector<16x32xf32>
    %489 = vector.extract_strided_slice %486 {offsets = [0, 64], sizes = [16, 32], strides = [1, 1]} : vector<16x96xf32> to vector<16x32xf32>
    %490 = vector.extract_strided_slice %487 {offsets = [0, 0], sizes = [8, 32], strides = [1, 1]} : vector<16x32xf32> to vector<8x32xf32>
    %491 = vector.extract_strided_slice %488 {offsets = [0, 0], sizes = [8, 32], strides = [1, 1]} : vector<16x32xf32> to vector<8x32xf32>
    %492 = vector.extract_strided_slice %489 {offsets = [0, 0], sizes = [8, 32], strides = [1, 1]} : vector<16x32xf32> to vector<8x32xf32>
    %493 = vector.extract_strided_slice %490 {offsets = [0, 0], sizes = [8, 8], strides = [1, 1]} : vector<8x32xf32> to vector<8x8xf32>
    %494 = vector.extract_strided_slice %491 {offsets = [0, 0], sizes = [8, 8], strides = [1, 1]} : vector<8x32xf32> to vector<8x8xf32>
    %495 = vector.extract_strided_slice %492 {offsets = [0, 0], sizes = [8, 8], strides = [1, 1]} : vector<8x32xf32> to vector<8x8xf32>
    %cst_182 = arith.constant dense<0.000000e+00> : vector<8x8xf32>
    %496 = tpu.matmul %493, %494, %cst_182 {dimension_numbers = #tpu.dot_dimension_numbers<[1], [1], [0], [0], [0, 0, 1, 0], [], []>} : vector<8x8xf32>, vector<8x8xf32>, vector<8x8xf32> -> vector<8x8xf32>
    %cst_183 = arith.constant 0.353553385 : f32
    %497 = vector.broadcast %cst_183 : f32 to vector<8x8xf32>
    %498 = arith.mulf %496, %497 : vector<8x8xf32>
    %cst_184 = arith.constant -1.000000e+30 : f32
    %499 = vector.broadcast %cst_184 : f32 to vector<8x8xf32>
    %500 = arith.select %36, %498, %499 : vector<8x8xi1>, vector<8x8xf32>
    %cst_185 = arith.constant dense<0xFF800000> : vector<8xf32>
    %501 = vector.multi_reduction <maximumf>, %500, %cst_185 [1] : vector<8x8xf32> to vector<8xf32>
    %502 = vector.shape_cast %501 : vector<8xf32> to vector<8x1xf32>
    %503 = vector.broadcast %502 : vector<8x1xf32> to vector<8x8xf32>
    %504 = arith.subf %500, %503 : vector<8x8xf32>
    %505 = math.exp %504 : vector<8x8xf32>
    %cst_186 = arith.constant dense<0.000000e+00> : vector<8xf32>
    %506 = vector.multi_reduction <add>, %505, %cst_186 [1] : vector<8x8xf32> to vector<8xf32>
    %507 = vector.shape_cast %506 : vector<8xf32> to vector<8x1xf32>
    %cst_187 = arith.constant dense<0.000000e+00> : vector<8x8xf32>
    %508 = tpu.matmul %505, %495, %cst_187 {dimension_numbers = #tpu.dot_dimension_numbers<[1], [0], [0], [1], [0, 0, 1, 1], [], []>} : vector<8x8xf32>, vector<8x8xf32>, vector<8x8xf32> -> vector<8x8xf32>
    %509 = tpu.reciprocal %507 {approx = true} : vector<8x1xf32> -> vector<8x1xf32>
    %510 = vector.broadcast %509 : vector<8x1xf32> to vector<8x8xf32>
    %511 = arith.mulf %508, %510 : vector<8x8xf32>
    %512 = vector.extract_strided_slice %490 {offsets = [0, 8], sizes = [8, 8], strides = [1, 1]} : vector<8x32xf32> to vector<8x8xf32>
    %513 = vector.extract_strided_slice %491 {offsets = [0, 8], sizes = [8, 8], strides = [1, 1]} : vector<8x32xf32> to vector<8x8xf32>
    %514 = vector.extract_strided_slice %492 {offsets = [0, 8], sizes = [8, 8], strides = [1, 1]} : vector<8x32xf32> to vector<8x8xf32>
    %cst_188 = arith.constant dense<0.000000e+00> : vector<8x8xf32>
    %515 = tpu.matmul %512, %513, %cst_188 {dimension_numbers = #tpu.dot_dimension_numbers<[1], [1], [0], [0], [0, 0, 1, 0], [], []>} : vector<8x8xf32>, vector<8x8xf32>, vector<8x8xf32> -> vector<8x8xf32>
    %cst_189 = arith.constant 0.353553385 : f32
    %516 = vector.broadcast %cst_189 : f32 to vector<8x8xf32>
    %517 = arith.mulf %515, %516 : vector<8x8xf32>
    %cst_190 = arith.constant -1.000000e+30 : f32
    %518 = vector.broadcast %cst_190 : f32 to vector<8x8xf32>
    %519 = arith.select %36, %517, %518 : vector<8x8xi1>, vector<8x8xf32>
    %cst_191 = arith.constant dense<0xFF800000> : vector<8xf32>
    %520 = vector.multi_reduction <maximumf>, %519, %cst_191 [1] : vector<8x8xf32> to vector<8xf32>
    %521 = vector.shape_cast %520 : vector<8xf32> to vector<8x1xf32>
    %522 = vector.broadcast %521 : vector<8x1xf32> to vector<8x8xf32>
    %523 = arith.subf %519, %522 : vector<8x8xf32>
    %524 = math.exp %523 : vector<8x8xf32>
    %cst_192 = arith.constant dense<0.000000e+00> : vector<8xf32>
    %525 = vector.multi_reduction <add>, %524, %cst_192 [1] : vector<8x8xf32> to vector<8xf32>
    %526 = vector.shape_cast %525 : vector<8xf32> to vector<8x1xf32>
    %cst_193 = arith.constant dense<0.000000e+00> : vector<8x8xf32>
    %527 = tpu.matmul %524, %514, %cst_193 {dimension_numbers = #tpu.dot_dimension_numbers<[1], [0], [0], [1], [0, 0, 1, 1], [], []>} : vector<8x8xf32>, vector<8x8xf32>, vector<8x8xf32> -> vector<8x8xf32>
    %528 = tpu.reciprocal %526 {approx = true} : vector<8x1xf32> -> vector<8x1xf32>
    %529 = vector.broadcast %528 : vector<8x1xf32> to vector<8x8xf32>
    %530 = arith.mulf %527, %529 : vector<8x8xf32>
    %531 = vector.extract_strided_slice %490 {offsets = [0, 16], sizes = [8, 8], strides = [1, 1]} : vector<8x32xf32> to vector<8x8xf32>
    %532 = vector.extract_strided_slice %491 {offsets = [0, 16], sizes = [8, 8], strides = [1, 1]} : vector<8x32xf32> to vector<8x8xf32>
    %533 = vector.extract_strided_slice %492 {offsets = [0, 16], sizes = [8, 8], strides = [1, 1]} : vector<8x32xf32> to vector<8x8xf32>
    %cst_194 = arith.constant dense<0.000000e+00> : vector<8x8xf32>
    %534 = tpu.matmul %531, %532, %cst_194 {dimension_numbers = #tpu.dot_dimension_numbers<[1], [1], [0], [0], [0, 0, 1, 0], [], []>} : vector<8x8xf32>, vector<8x8xf32>, vector<8x8xf32> -> vector<8x8xf32>
    %cst_195 = arith.constant 0.353553385 : f32
    %535 = vector.broadcast %cst_195 : f32 to vector<8x8xf32>
    %536 = arith.mulf %534, %535 : vector<8x8xf32>
    %cst_196 = arith.constant -1.000000e+30 : f32
    %537 = vector.broadcast %cst_196 : f32 to vector<8x8xf32>
    %538 = arith.select %36, %536, %537 : vector<8x8xi1>, vector<8x8xf32>
    %cst_197 = arith.constant dense<0xFF800000> : vector<8xf32>
    %539 = vector.multi_reduction <maximumf>, %538, %cst_197 [1] : vector<8x8xf32> to vector<8xf32>
    %540 = vector.shape_cast %539 : vector<8xf32> to vector<8x1xf32>
    %541 = vector.broadcast %540 : vector<8x1xf32> to vector<8x8xf32>
    %542 = arith.subf %538, %541 : vector<8x8xf32>
    %543 = math.exp %542 : vector<8x8xf32>
    %cst_198 = arith.constant dense<0.000000e+00> : vector<8xf32>
    %544 = vector.multi_reduction <add>, %543, %cst_198 [1] : vector<8x8xf32> to vector<8xf32>
    %545 = vector.shape_cast %544 : vector<8xf32> to vector<8x1xf32>
    %cst_199 = arith.constant dense<0.000000e+00> : vector<8x8xf32>
    %546 = tpu.matmul %543, %533, %cst_199 {dimension_numbers = #tpu.dot_dimension_numbers<[1], [0], [0], [1], [0, 0, 1, 1], [], []>} : vector<8x8xf32>, vector<8x8xf32>, vector<8x8xf32> -> vector<8x8xf32>
    %547 = tpu.reciprocal %545 {approx = true} : vector<8x1xf32> -> vector<8x1xf32>
    %548 = vector.broadcast %547 : vector<8x1xf32> to vector<8x8xf32>
    %549 = arith.mulf %546, %548 : vector<8x8xf32>
    %550 = vector.extract_strided_slice %490 {offsets = [0, 24], sizes = [8, 8], strides = [1, 1]} : vector<8x32xf32> to vector<8x8xf32>
    %551 = vector.extract_strided_slice %491 {offsets = [0, 24], sizes = [8, 8], strides = [1, 1]} : vector<8x32xf32> to vector<8x8xf32>
    %552 = vector.extract_strided_slice %492 {offsets = [0, 24], sizes = [8, 8], strides = [1, 1]} : vector<8x32xf32> to vector<8x8xf32>
    %cst_200 = arith.constant dense<0.000000e+00> : vector<8x8xf32>
    %553 = tpu.matmul %550, %551, %cst_200 {dimension_numbers = #tpu.dot_dimension_numbers<[1], [1], [0], [0], [0, 0, 1, 0], [], []>} : vector<8x8xf32>, vector<8x8xf32>, vector<8x8xf32> -> vector<8x8xf32>
    %cst_201 = arith.constant 0.353553385 : f32
    %554 = vector.broadcast %cst_201 : f32 to vector<8x8xf32>
    %555 = arith.mulf %553, %554 : vector<8x8xf32>
    %cst_202 = arith.constant -1.000000e+30 : f32
    %556 = vector.broadcast %cst_202 : f32 to vector<8x8xf32>
    %557 = arith.select %36, %555, %556 : vector<8x8xi1>, vector<8x8xf32>
    %cst_203 = arith.constant dense<0xFF800000> : vector<8xf32>
    %558 = vector.multi_reduction <maximumf>, %557, %cst_203 [1] : vector<8x8xf32> to vector<8xf32>
    %559 = vector.shape_cast %558 : vector<8xf32> to vector<8x1xf32>
    %560 = vector.broadcast %559 : vector<8x1xf32> to vector<8x8xf32>
    %561 = arith.subf %557, %560 : vector<8x8xf32>
    %562 = math.exp %561 : vector<8x8xf32>
    %cst_204 = arith.constant dense<0.000000e+00> : vector<8xf32>
    %563 = vector.multi_reduction <add>, %562, %cst_204 [1] : vector<8x8xf32> to vector<8xf32>
    %564 = vector.shape_cast %563 : vector<8xf32> to vector<8x1xf32>
    %cst_205 = arith.constant dense<0.000000e+00> : vector<8x8xf32>
    %565 = tpu.matmul %562, %552, %cst_205 {dimension_numbers = #tpu.dot_dimension_numbers<[1], [0], [0], [1], [0, 0, 1, 1], [], []>} : vector<8x8xf32>, vector<8x8xf32>, vector<8x8xf32> -> vector<8x8xf32>
    %566 = tpu.reciprocal %564 {approx = true} : vector<8x1xf32> -> vector<8x1xf32>
    %567 = vector.broadcast %566 : vector<8x1xf32> to vector<8x8xf32>
    %568 = arith.mulf %565, %567 : vector<8x8xf32>
    %569 = tpu.concatenate %511, %530, %549, %568 in 1 : vector<8x8xf32>, vector<8x8xf32>, vector<8x8xf32>, vector<8x8xf32> -> vector<8x32xf32>
    %570 = vector.extract_strided_slice %487 {offsets = [8, 0], sizes = [8, 32], strides = [1, 1]} : vector<16x32xf32> to vector<8x32xf32>
    %571 = vector.extract_strided_slice %488 {offsets = [8, 0], sizes = [8, 32], strides = [1, 1]} : vector<16x32xf32> to vector<8x32xf32>
    %572 = vector.extract_strided_slice %489 {offsets = [8, 0], sizes = [8, 32], strides = [1, 1]} : vector<16x32xf32> to vector<8x32xf32>
    %573 = vector.extract_strided_slice %570 {offsets = [0, 0], sizes = [8, 8], strides = [1, 1]} : vector<8x32xf32> to vector<8x8xf32>
    %574 = vector.extract_strided_slice %571 {offsets = [0, 0], sizes = [8, 8], strides = [1, 1]} : vector<8x32xf32> to vector<8x8xf32>
    %575 = vector.extract_strided_slice %572 {offsets = [0, 0], sizes = [8, 8], strides = [1, 1]} : vector<8x32xf32> to vector<8x8xf32>
    %cst_206 = arith.constant dense<0.000000e+00> : vector<8x8xf32>
    %576 = tpu.matmul %573, %574, %cst_206 {dimension_numbers = #tpu.dot_dimension_numbers<[1], [1], [0], [0], [0, 0, 1, 0], [], []>} : vector<8x8xf32>, vector<8x8xf32>, vector<8x8xf32> -> vector<8x8xf32>
    %cst_207 = arith.constant 0.353553385 : f32
    %577 = vector.broadcast %cst_207 : f32 to vector<8x8xf32>
    %578 = arith.mulf %576, %577 : vector<8x8xf32>
    %cst_208 = arith.constant -1.000000e+30 : f32
    %579 = vector.broadcast %cst_208 : f32 to vector<8x8xf32>
    %580 = arith.select %36, %578, %579 : vector<8x8xi1>, vector<8x8xf32>
    %cst_209 = arith.constant dense<0xFF800000> : vector<8xf32>
    %581 = vector.multi_reduction <maximumf>, %580, %cst_209 [1] : vector<8x8xf32> to vector<8xf32>
    %582 = vector.shape_cast %581 : vector<8xf32> to vector<8x1xf32>
    %583 = vector.broadcast %582 : vector<8x1xf32> to vector<8x8xf32>
    %584 = arith.subf %580, %583 : vector<8x8xf32>
    %585 = math.exp %584 : vector<8x8xf32>
    %cst_210 = arith.constant dense<0.000000e+00> : vector<8xf32>
    %586 = vector.multi_reduction <add>, %585, %cst_210 [1] : vector<8x8xf32> to vector<8xf32>
    %587 = vector.shape_cast %586 : vector<8xf32> to vector<8x1xf32>
    %cst_211 = arith.constant dense<0.000000e+00> : vector<8x8xf32>
    %588 = tpu.matmul %585, %575, %cst_211 {dimension_numbers = #tpu.dot_dimension_numbers<[1], [0], [0], [1], [0, 0, 1, 1], [], []>} : vector<8x8xf32>, vector<8x8xf32>, vector<8x8xf32> -> vector<8x8xf32>
    %589 = tpu.reciprocal %587 {approx = true} : vector<8x1xf32> -> vector<8x1xf32>
    %590 = vector.broadcast %589 : vector<8x1xf32> to vector<8x8xf32>
    %591 = arith.mulf %588, %590 : vector<8x8xf32>
    %592 = vector.extract_strided_slice %570 {offsets = [0, 8], sizes = [8, 8], strides = [1, 1]} : vector<8x32xf32> to vector<8x8xf32>
    %593 = vector.extract_strided_slice %571 {offsets = [0, 8], sizes = [8, 8], strides = [1, 1]} : vector<8x32xf32> to vector<8x8xf32>
    %594 = vector.extract_strided_slice %572 {offsets = [0, 8], sizes = [8, 8], strides = [1, 1]} : vector<8x32xf32> to vector<8x8xf32>
    %cst_212 = arith.constant dense<0.000000e+00> : vector<8x8xf32>
    %595 = tpu.matmul %592, %593, %cst_212 {dimension_numbers = #tpu.dot_dimension_numbers<[1], [1], [0], [0], [0, 0, 1, 0], [], []>} : vector<8x8xf32>, vector<8x8xf32>, vector<8x8xf32> -> vector<8x8xf32>
    %cst_213 = arith.constant 0.353553385 : f32
    %596 = vector.broadcast %cst_213 : f32 to vector<8x8xf32>
    %597 = arith.mulf %595, %596 : vector<8x8xf32>
    %cst_214 = arith.constant -1.000000e+30 : f32
    %598 = vector.broadcast %cst_214 : f32 to vector<8x8xf32>
    %599 = arith.select %36, %597, %598 : vector<8x8xi1>, vector<8x8xf32>
    %cst_215 = arith.constant dense<0xFF800000> : vector<8xf32>
    %600 = vector.multi_reduction <maximumf>, %599, %cst_215 [1] : vector<8x8xf32> to vector<8xf32>
    %601 = vector.shape_cast %600 : vector<8xf32> to vector<8x1xf32>
    %602 = vector.broadcast %601 : vector<8x1xf32> to vector<8x8xf32>
    %603 = arith.subf %599, %602 : vector<8x8xf32>
    %604 = math.exp %603 : vector<8x8xf32>
    %cst_216 = arith.constant dense<0.000000e+00> : vector<8xf32>
    %605 = vector.multi_reduction <add>, %604, %cst_216 [1] : vector<8x8xf32> to vector<8xf32>
    %606 = vector.shape_cast %605 : vector<8xf32> to vector<8x1xf32>
    %cst_217 = arith.constant dense<0.000000e+00> : vector<8x8xf32>
    %607 = tpu.matmul %604, %594, %cst_217 {dimension_numbers = #tpu.dot_dimension_numbers<[1], [0], [0], [1], [0, 0, 1, 1], [], []>} : vector<8x8xf32>, vector<8x8xf32>, vector<8x8xf32> -> vector<8x8xf32>
    %608 = tpu.reciprocal %606 {approx = true} : vector<8x1xf32> -> vector<8x1xf32>
    %609 = vector.broadcast %608 : vector<8x1xf32> to vector<8x8xf32>
    %610 = arith.mulf %607, %609 : vector<8x8xf32>
    %611 = vector.extract_strided_slice %570 {offsets = [0, 16], sizes = [8, 8], strides = [1, 1]} : vector<8x32xf32> to vector<8x8xf32>
    %612 = vector.extract_strided_slice %571 {offsets = [0, 16], sizes = [8, 8], strides = [1, 1]} : vector<8x32xf32> to vector<8x8xf32>
    %613 = vector.extract_strided_slice %572 {offsets = [0, 16], sizes = [8, 8], strides = [1, 1]} : vector<8x32xf32> to vector<8x8xf32>
    %cst_218 = arith.constant dense<0.000000e+00> : vector<8x8xf32>
    %614 = tpu.matmul %611, %612, %cst_218 {dimension_numbers = #tpu.dot_dimension_numbers<[1], [1], [0], [0], [0, 0, 1, 0], [], []>} : vector<8x8xf32>, vector<8x8xf32>, vector<8x8xf32> -> vector<8x8xf32>
    %cst_219 = arith.constant 0.353553385 : f32
    %615 = vector.broadcast %cst_219 : f32 to vector<8x8xf32>
    %616 = arith.mulf %614, %615 : vector<8x8xf32>
    %cst_220 = arith.constant -1.000000e+30 : f32
    %617 = vector.broadcast %cst_220 : f32 to vector<8x8xf32>
    %618 = arith.select %36, %616, %617 : vector<8x8xi1>, vector<8x8xf32>
    %cst_221 = arith.constant dense<0xFF800000> : vector<8xf32>
    %619 = vector.multi_reduction <maximumf>, %618, %cst_221 [1] : vector<8x8xf32> to vector<8xf32>
    %620 = vector.shape_cast %619 : vector<8xf32> to vector<8x1xf32>
    %621 = vector.broadcast %620 : vector<8x1xf32> to vector<8x8xf32>
    %622 = arith.subf %618, %621 : vector<8x8xf32>
    %623 = math.exp %622 : vector<8x8xf32>
    %cst_222 = arith.constant dense<0.000000e+00> : vector<8xf32>
    %624 = vector.multi_reduction <add>, %623, %cst_222 [1] : vector<8x8xf32> to vector<8xf32>
    %625 = vector.shape_cast %624 : vector<8xf32> to vector<8x1xf32>
    %cst_223 = arith.constant dense<0.000000e+00> : vector<8x8xf32>
    %626 = tpu.matmul %623, %613, %cst_223 {dimension_numbers = #tpu.dot_dimension_numbers<[1], [0], [0], [1], [0, 0, 1, 1], [], []>} : vector<8x8xf32>, vector<8x8xf32>, vector<8x8xf32> -> vector<8x8xf32>
    %627 = tpu.reciprocal %625 {approx = true} : vector<8x1xf32> -> vector<8x1xf32>
    %628 = vector.broadcast %627 : vector<8x1xf32> to vector<8x8xf32>
    %629 = arith.mulf %626, %628 : vector<8x8xf32>
    %630 = vector.extract_strided_slice %570 {offsets = [0, 24], sizes = [8, 8], strides = [1, 1]} : vector<8x32xf32> to vector<8x8xf32>
    %631 = vector.extract_strided_slice %571 {offsets = [0, 24], sizes = [8, 8], strides = [1, 1]} : vector<8x32xf32> to vector<8x8xf32>
    %632 = vector.extract_strided_slice %572 {offsets = [0, 24], sizes = [8, 8], strides = [1, 1]} : vector<8x32xf32> to vector<8x8xf32>
    %cst_224 = arith.constant dense<0.000000e+00> : vector<8x8xf32>
    %633 = tpu.matmul %630, %631, %cst_224 {dimension_numbers = #tpu.dot_dimension_numbers<[1], [1], [0], [0], [0, 0, 1, 0], [], []>} : vector<8x8xf32>, vector<8x8xf32>, vector<8x8xf32> -> vector<8x8xf32>
    %cst_225 = arith.constant 0.353553385 : f32
    %634 = vector.broadcast %cst_225 : f32 to vector<8x8xf32>
    %635 = arith.mulf %633, %634 : vector<8x8xf32>
    %cst_226 = arith.constant -1.000000e+30 : f32
    %636 = vector.broadcast %cst_226 : f32 to vector<8x8xf32>
    %637 = arith.select %36, %635, %636 : vector<8x8xi1>, vector<8x8xf32>
    %cst_227 = arith.constant dense<0xFF800000> : vector<8xf32>
    %638 = vector.multi_reduction <maximumf>, %637, %cst_227 [1] : vector<8x8xf32> to vector<8xf32>
    %639 = vector.shape_cast %638 : vector<8xf32> to vector<8x1xf32>
    %640 = vector.broadcast %639 : vector<8x1xf32> to vector<8x8xf32>
    %641 = arith.subf %637, %640 : vector<8x8xf32>
    %642 = math.exp %641 : vector<8x8xf32>
    %cst_228 = arith.constant dense<0.000000e+00> : vector<8xf32>
    %643 = vector.multi_reduction <add>, %642, %cst_228 [1] : vector<8x8xf32> to vector<8xf32>
    %644 = vector.shape_cast %643 : vector<8xf32> to vector<8x1xf32>
    %cst_229 = arith.constant dense<0.000000e+00> : vector<8x8xf32>
    %645 = tpu.matmul %642, %632, %cst_229 {dimension_numbers = #tpu.dot_dimension_numbers<[1], [0], [0], [1], [0, 0, 1, 1], [], []>} : vector<8x8xf32>, vector<8x8xf32>, vector<8x8xf32> -> vector<8x8xf32>
    %646 = tpu.reciprocal %644 {approx = true} : vector<8x1xf32> -> vector<8x1xf32>
    %647 = vector.broadcast %646 : vector<8x1xf32> to vector<8x8xf32>
    %648 = arith.mulf %645, %647 : vector<8x8xf32>
    %649 = tpu.concatenate %591, %610, %629, %648 in 1 : vector<8x8xf32>, vector<8x8xf32>, vector<8x8xf32>, vector<8x8xf32> -> vector<8x32xf32>
    %650 = tpu.concatenate %569, %649 in 0 : vector<8x32xf32>, vector<8x32xf32> -> vector<16x32xf32>
    %c1_230 = arith.constant 1 : index
    %c0_231 = arith.constant 0 : index
    %c0_232 = arith.constant 0 : index
    %651 = vector.load %arg5[%c1_230, %c0_231, %c0_232] : memref<2x32x32xf32, #tpu.memory_space<vmem>>, vector<1x32x32xf32>
    %652 = vector.shape_cast %651 : vector<1x32x32xf32> to vector<32x32xf32>
    %cst_233 = arith.constant dense<0.000000e+00> : vector<16x32xf32>
    %653 = tpu.matmul %650, %652, %cst_233 {dimension_numbers = #tpu.dot_dimension_numbers<[1], [0], [0], [1], [0, 0, 1, 1], [], []>} : vector<16x32xf32>, vector<32x32xf32>, vector<16x32xf32> -> vector<16x32xf32>
    %c1_234 = arith.constant 1 : index
    %c0_235 = arith.constant 0 : index
    %c0_236 = arith.constant 0 : index
    %654 = vector.load %arg6[%c1_234, %c0_235, %c0_236] : memref<2x1x32xf32, #tpu.memory_space<vmem>>, vector<1x1x32xf32>
    %655 = vector.shape_cast %654 : vector<1x1x32xf32> to vector<1x32xf32>
    %656 = vector.broadcast %655 : vector<1x32xf32> to vector<16x32xf32>
    %657 = arith.addf %653, %656 : vector<16x32xf32>
    %658 = arith.addf %479, %657 : vector<16x32xf32>
    %c1_237 = arith.constant 1 : index
    %c0_238 = arith.constant 0 : index
    %c0_239 = arith.constant 0 : index
    %659 = vector.load %arg11[%c1_237, %c0_238, %c0_239] : memref<2x1x32xf32, #tpu.memory_space<vmem>>, vector<1x1x32xf32>
    %660 = vector.shape_cast %659 : vector<1x1x32xf32> to vector<1x32xf32>
    %c1_240 = arith.constant 1 : index
    %c0_241 = arith.constant 0 : index
    %c0_242 = arith.constant 0 : index
    %661 = vector.load %arg12[%c1_240, %c0_241, %c0_242] : memref<2x1x32xf32, #tpu.memory_space<vmem>>, vector<1x1x32xf32>
    %662 = vector.shape_cast %661 : vector<1x1x32xf32> to vector<1x32xf32>
    %cst_243 = arith.constant dense<0.000000e+00> : vector<16xf32>
    %663 = vector.multi_reduction <add>, %658, %cst_243 [1] : vector<16x32xf32> to vector<16xf32>
    %664 = vector.shape_cast %663 : vector<16xf32> to vector<16x1xf32>
    %cst_244 = arith.constant 3.200000e+01 : f32
    %665 = vector.broadcast %cst_244 : f32 to vector<16x1xf32>
    %666 = arith.divf %664, %665 : vector<16x1xf32>
    %667 = vector.broadcast %666 : vector<16x1xf32> to vector<16x32xf32>
    %668 = arith.subf %658, %667 : vector<16x32xf32>
    %669 = arith.mulf %668, %668 : vector<16x32xf32>
    %cst_245 = arith.constant dense<0.000000e+00> : vector<16xf32>
    %670 = vector.multi_reduction <add>, %669, %cst_245 [1] : vector<16x32xf32> to vector<16xf32>
    %671 = vector.shape_cast %670 : vector<16xf32> to vector<16x1xf32>
    %cst_246 = arith.constant 3.200000e+01 : f32
    %672 = vector.broadcast %cst_246 : f32 to vector<16x1xf32>
    %673 = arith.divf %671, %672 : vector<16x1xf32>
    %cst_247 = arith.constant 9.99999974E-6 : f32
    %674 = vector.broadcast %cst_247 : f32 to vector<16x1xf32>
    %675 = arith.addf %673, %674 : vector<16x1xf32>
    %676 = math.rsqrt %675 : vector<16x1xf32>
    %677 = vector.broadcast %676 : vector<16x1xf32> to vector<16x32xf32>
    %678 = arith.mulf %668, %677 : vector<16x32xf32>
    %679 = vector.broadcast %660 : vector<1x32xf32> to vector<16x32xf32>
    %680 = arith.mulf %678, %679 : vector<16x32xf32>
    %681 = vector.broadcast %662 : vector<1x32xf32> to vector<16x32xf32>
    %682 = arith.addf %680, %681 : vector<16x32xf32>
    %c1_248 = arith.constant 1 : index
    %c0_249 = arith.constant 0 : index
    %c0_250 = arith.constant 0 : index
    %683 = vector.load %arg7[%c1_248, %c0_249, %c0_250] : memref<2x32x96xf32, #tpu.memory_space<vmem>>, vector<1x32x96xf32>
    %684 = vector.shape_cast %683 : vector<1x32x96xf32> to vector<32x96xf32>
    %c1_251 = arith.constant 1 : index
    %c0_252 = arith.constant 0 : index
    %c0_253 = arith.constant 0 : index
    %685 = vector.load %arg8[%c1_251, %c0_252, %c0_253] : memref<2x1x96xf32, #tpu.memory_space<vmem>>, vector<1x1x96xf32>
    %686 = vector.shape_cast %685 : vector<1x1x96xf32> to vector<1x96xf32>
    %687 = vector.extract_strided_slice %684 {offsets = [0, 0], sizes = [32, 32], strides = [1, 1]} : vector<32x96xf32> to vector<32x32xf32>
    %cst_254 = arith.constant dense<0.000000e+00> : vector<16x32xf32>
    %688 = tpu.matmul %682, %687, %cst_254 {dimension_numbers = #tpu.dot_dimension_numbers<[1], [0], [0], [1], [0, 0, 1, 1], [], []>} : vector<16x32xf32>, vector<32x32xf32>, vector<16x32xf32> -> vector<16x32xf32>
    %689 = vector.extract_strided_slice %686 {offsets = [0, 0], sizes = [1, 32], strides = [1, 1]} : vector<1x96xf32> to vector<1x32xf32>
    %690 = vector.broadcast %689 : vector<1x32xf32> to vector<16x32xf32>
    %691 = arith.addf %688, %690 : vector<16x32xf32>
    %692 = vector.extract_strided_slice %684 {offsets = [0, 32], sizes = [32, 64], strides = [1, 1]} : vector<32x96xf32> to vector<32x64xf32>
    %cst_255 = arith.constant dense<0.000000e+00> : vector<16x64xf32>
    %693 = tpu.matmul %33, %692, %cst_255 {dimension_numbers = #tpu.dot_dimension_numbers<[1], [0], [0], [1], [0, 0, 1, 1], [], []>} : vector<16x32xf32>, vector<32x64xf32>, vector<16x64xf32> -> vector<16x64xf32>
    %694 = vector.extract_strided_slice %686 {offsets = [0, 32], sizes = [1, 64], strides = [1, 1]} : vector<1x96xf32> to vector<1x64xf32>
    %695 = vector.broadcast %694 : vector<1x64xf32> to vector<16x64xf32>
    %696 = arith.addf %693, %695 : vector<16x64xf32>
    %697 = vector.extract_strided_slice %696 {offsets = [0, 0], sizes = [16, 32], strides = [1, 1]} : vector<16x64xf32> to vector<16x32xf32>
    %698 = vector.extract_strided_slice %696 {offsets = [0, 32], sizes = [16, 32], strides = [1, 1]} : vector<16x64xf32> to vector<16x32xf32>
    %699 = vector.extract_strided_slice %691 {offsets = [0, 0], sizes = [8, 32], strides = [1, 1]} : vector<16x32xf32> to vector<8x32xf32>
    %700 = vector.extract_strided_slice %697 {offsets = [0, 0], sizes = [8, 32], strides = [1, 1]} : vector<16x32xf32> to vector<8x32xf32>
    %701 = vector.extract_strided_slice %698 {offsets = [0, 0], sizes = [8, 32], strides = [1, 1]} : vector<16x32xf32> to vector<8x32xf32>
    %702 = vector.extract_strided_slice %699 {offsets = [0, 0], sizes = [8, 8], strides = [1, 1]} : vector<8x32xf32> to vector<8x8xf32>
    %703 = vector.extract_strided_slice %700 {offsets = [0, 0], sizes = [8, 8], strides = [1, 1]} : vector<8x32xf32> to vector<8x8xf32>
    %704 = vector.extract_strided_slice %701 {offsets = [0, 0], sizes = [8, 8], strides = [1, 1]} : vector<8x32xf32> to vector<8x8xf32>
    %cst_256 = arith.constant dense<0.000000e+00> : vector<8x8xf32>
    %705 = tpu.matmul %702, %703, %cst_256 {dimension_numbers = #tpu.dot_dimension_numbers<[1], [1], [0], [0], [0, 0, 1, 0], [], []>} : vector<8x8xf32>, vector<8x8xf32>, vector<8x8xf32> -> vector<8x8xf32>
    %cst_257 = arith.constant 0.353553385 : f32
    %706 = vector.broadcast %cst_257 : f32 to vector<8x8xf32>
    %707 = arith.mulf %705, %706 : vector<8x8xf32>
    %cst_258 = arith.constant dense<0xFF800000> : vector<8xf32>
    %708 = vector.multi_reduction <maximumf>, %707, %cst_258 [1] : vector<8x8xf32> to vector<8xf32>
    %709 = vector.shape_cast %708 : vector<8xf32> to vector<8x1xf32>
    %710 = vector.broadcast %709 : vector<8x1xf32> to vector<8x8xf32>
    %711 = arith.subf %707, %710 : vector<8x8xf32>
    %712 = math.exp %711 : vector<8x8xf32>
    %cst_259 = arith.constant dense<0.000000e+00> : vector<8xf32>
    %713 = vector.multi_reduction <add>, %712, %cst_259 [1] : vector<8x8xf32> to vector<8xf32>
    %714 = vector.shape_cast %713 : vector<8xf32> to vector<8x1xf32>
    %cst_260 = arith.constant dense<0.000000e+00> : vector<8x8xf32>
    %715 = tpu.matmul %712, %704, %cst_260 {dimension_numbers = #tpu.dot_dimension_numbers<[1], [0], [0], [1], [0, 0, 1, 1], [], []>} : vector<8x8xf32>, vector<8x8xf32>, vector<8x8xf32> -> vector<8x8xf32>
    %716 = tpu.reciprocal %714 {approx = true} : vector<8x1xf32> -> vector<8x1xf32>
    %717 = vector.broadcast %716 : vector<8x1xf32> to vector<8x8xf32>
    %718 = arith.mulf %715, %717 : vector<8x8xf32>
    %719 = vector.extract_strided_slice %699 {offsets = [0, 8], sizes = [8, 8], strides = [1, 1]} : vector<8x32xf32> to vector<8x8xf32>
    %720 = vector.extract_strided_slice %700 {offsets = [0, 8], sizes = [8, 8], strides = [1, 1]} : vector<8x32xf32> to vector<8x8xf32>
    %721 = vector.extract_strided_slice %701 {offsets = [0, 8], sizes = [8, 8], strides = [1, 1]} : vector<8x32xf32> to vector<8x8xf32>
    %cst_261 = arith.constant dense<0.000000e+00> : vector<8x8xf32>
    %722 = tpu.matmul %719, %720, %cst_261 {dimension_numbers = #tpu.dot_dimension_numbers<[1], [1], [0], [0], [0, 0, 1, 0], [], []>} : vector<8x8xf32>, vector<8x8xf32>, vector<8x8xf32> -> vector<8x8xf32>
    %cst_262 = arith.constant 0.353553385 : f32
    %723 = vector.broadcast %cst_262 : f32 to vector<8x8xf32>
    %724 = arith.mulf %722, %723 : vector<8x8xf32>
    %cst_263 = arith.constant dense<0xFF800000> : vector<8xf32>
    %725 = vector.multi_reduction <maximumf>, %724, %cst_263 [1] : vector<8x8xf32> to vector<8xf32>
    %726 = vector.shape_cast %725 : vector<8xf32> to vector<8x1xf32>
    %727 = vector.broadcast %726 : vector<8x1xf32> to vector<8x8xf32>
    %728 = arith.subf %724, %727 : vector<8x8xf32>
    %729 = math.exp %728 : vector<8x8xf32>
    %cst_264 = arith.constant dense<0.000000e+00> : vector<8xf32>
    %730 = vector.multi_reduction <add>, %729, %cst_264 [1] : vector<8x8xf32> to vector<8xf32>
    %731 = vector.shape_cast %730 : vector<8xf32> to vector<8x1xf32>
    %cst_265 = arith.constant dense<0.000000e+00> : vector<8x8xf32>
    %732 = tpu.matmul %729, %721, %cst_265 {dimension_numbers = #tpu.dot_dimension_numbers<[1], [0], [0], [1], [0, 0, 1, 1], [], []>} : vector<8x8xf32>, vector<8x8xf32>, vector<8x8xf32> -> vector<8x8xf32>
    %733 = tpu.reciprocal %731 {approx = true} : vector<8x1xf32> -> vector<8x1xf32>
    %734 = vector.broadcast %733 : vector<8x1xf32> to vector<8x8xf32>
    %735 = arith.mulf %732, %734 : vector<8x8xf32>
    %736 = vector.extract_strided_slice %699 {offsets = [0, 16], sizes = [8, 8], strides = [1, 1]} : vector<8x32xf32> to vector<8x8xf32>
    %737 = vector.extract_strided_slice %700 {offsets = [0, 16], sizes = [8, 8], strides = [1, 1]} : vector<8x32xf32> to vector<8x8xf32>
    %738 = vector.extract_strided_slice %701 {offsets = [0, 16], sizes = [8, 8], strides = [1, 1]} : vector<8x32xf32> to vector<8x8xf32>
    %cst_266 = arith.constant dense<0.000000e+00> : vector<8x8xf32>
    %739 = tpu.matmul %736, %737, %cst_266 {dimension_numbers = #tpu.dot_dimension_numbers<[1], [1], [0], [0], [0, 0, 1, 0], [], []>} : vector<8x8xf32>, vector<8x8xf32>, vector<8x8xf32> -> vector<8x8xf32>
    %cst_267 = arith.constant 0.353553385 : f32
    %740 = vector.broadcast %cst_267 : f32 to vector<8x8xf32>
    %741 = arith.mulf %739, %740 : vector<8x8xf32>
    %cst_268 = arith.constant dense<0xFF800000> : vector<8xf32>
    %742 = vector.multi_reduction <maximumf>, %741, %cst_268 [1] : vector<8x8xf32> to vector<8xf32>
    %743 = vector.shape_cast %742 : vector<8xf32> to vector<8x1xf32>
    %744 = vector.broadcast %743 : vector<8x1xf32> to vector<8x8xf32>
    %745 = arith.subf %741, %744 : vector<8x8xf32>
    %746 = math.exp %745 : vector<8x8xf32>
    %cst_269 = arith.constant dense<0.000000e+00> : vector<8xf32>
    %747 = vector.multi_reduction <add>, %746, %cst_269 [1] : vector<8x8xf32> to vector<8xf32>
    %748 = vector.shape_cast %747 : vector<8xf32> to vector<8x1xf32>
    %cst_270 = arith.constant dense<0.000000e+00> : vector<8x8xf32>
    %749 = tpu.matmul %746, %738, %cst_270 {dimension_numbers = #tpu.dot_dimension_numbers<[1], [0], [0], [1], [0, 0, 1, 1], [], []>} : vector<8x8xf32>, vector<8x8xf32>, vector<8x8xf32> -> vector<8x8xf32>
    %750 = tpu.reciprocal %748 {approx = true} : vector<8x1xf32> -> vector<8x1xf32>
    %751 = vector.broadcast %750 : vector<8x1xf32> to vector<8x8xf32>
    %752 = arith.mulf %749, %751 : vector<8x8xf32>
    %753 = vector.extract_strided_slice %699 {offsets = [0, 24], sizes = [8, 8], strides = [1, 1]} : vector<8x32xf32> to vector<8x8xf32>
    %754 = vector.extract_strided_slice %700 {offsets = [0, 24], sizes = [8, 8], strides = [1, 1]} : vector<8x32xf32> to vector<8x8xf32>
    %755 = vector.extract_strided_slice %701 {offsets = [0, 24], sizes = [8, 8], strides = [1, 1]} : vector<8x32xf32> to vector<8x8xf32>
    %cst_271 = arith.constant dense<0.000000e+00> : vector<8x8xf32>
    %756 = tpu.matmul %753, %754, %cst_271 {dimension_numbers = #tpu.dot_dimension_numbers<[1], [1], [0], [0], [0, 0, 1, 0], [], []>} : vector<8x8xf32>, vector<8x8xf32>, vector<8x8xf32> -> vector<8x8xf32>
    %cst_272 = arith.constant 0.353553385 : f32
    %757 = vector.broadcast %cst_272 : f32 to vector<8x8xf32>
    %758 = arith.mulf %756, %757 : vector<8x8xf32>
    %cst_273 = arith.constant dense<0xFF800000> : vector<8xf32>
    %759 = vector.multi_reduction <maximumf>, %758, %cst_273 [1] : vector<8x8xf32> to vector<8xf32>
    %760 = vector.shape_cast %759 : vector<8xf32> to vector<8x1xf32>
    %761 = vector.broadcast %760 : vector<8x1xf32> to vector<8x8xf32>
    %762 = arith.subf %758, %761 : vector<8x8xf32>
    %763 = math.exp %762 : vector<8x8xf32>
    %cst_274 = arith.constant dense<0.000000e+00> : vector<8xf32>
    %764 = vector.multi_reduction <add>, %763, %cst_274 [1] : vector<8x8xf32> to vector<8xf32>
    %765 = vector.shape_cast %764 : vector<8xf32> to vector<8x1xf32>
    %cst_275 = arith.constant dense<0.000000e+00> : vector<8x8xf32>
    %766 = tpu.matmul %763, %755, %cst_275 {dimension_numbers = #tpu.dot_dimension_numbers<[1], [0], [0], [1], [0, 0, 1, 1], [], []>} : vector<8x8xf32>, vector<8x8xf32>, vector<8x8xf32> -> vector<8x8xf32>
    %767 = tpu.reciprocal %765 {approx = true} : vector<8x1xf32> -> vector<8x1xf32>
    %768 = vector.broadcast %767 : vector<8x1xf32> to vector<8x8xf32>
    %769 = arith.mulf %766, %768 : vector<8x8xf32>
    %770 = tpu.concatenate %718, %735, %752, %769 in 1 : vector<8x8xf32>, vector<8x8xf32>, vector<8x8xf32>, vector<8x8xf32> -> vector<8x32xf32>
    %771 = vector.extract_strided_slice %691 {offsets = [8, 0], sizes = [8, 32], strides = [1, 1]} : vector<16x32xf32> to vector<8x32xf32>
    %772 = vector.extract_strided_slice %697 {offsets = [8, 0], sizes = [8, 32], strides = [1, 1]} : vector<16x32xf32> to vector<8x32xf32>
    %773 = vector.extract_strided_slice %698 {offsets = [8, 0], sizes = [8, 32], strides = [1, 1]} : vector<16x32xf32> to vector<8x32xf32>
    %774 = vector.extract_strided_slice %771 {offsets = [0, 0], sizes = [8, 8], strides = [1, 1]} : vector<8x32xf32> to vector<8x8xf32>
    %775 = vector.extract_strided_slice %772 {offsets = [0, 0], sizes = [8, 8], strides = [1, 1]} : vector<8x32xf32> to vector<8x8xf32>
    %776 = vector.extract_strided_slice %773 {offsets = [0, 0], sizes = [8, 8], strides = [1, 1]} : vector<8x32xf32> to vector<8x8xf32>
    %cst_276 = arith.constant dense<0.000000e+00> : vector<8x8xf32>
    %777 = tpu.matmul %774, %775, %cst_276 {dimension_numbers = #tpu.dot_dimension_numbers<[1], [1], [0], [0], [0, 0, 1, 0], [], []>} : vector<8x8xf32>, vector<8x8xf32>, vector<8x8xf32> -> vector<8x8xf32>
    %cst_277 = arith.constant 0.353553385 : f32
    %778 = vector.broadcast %cst_277 : f32 to vector<8x8xf32>
    %779 = arith.mulf %777, %778 : vector<8x8xf32>
    %cst_278 = arith.constant dense<0xFF800000> : vector<8xf32>
    %780 = vector.multi_reduction <maximumf>, %779, %cst_278 [1] : vector<8x8xf32> to vector<8xf32>
    %781 = vector.shape_cast %780 : vector<8xf32> to vector<8x1xf32>
    %782 = vector.broadcast %781 : vector<8x1xf32> to vector<8x8xf32>
    %783 = arith.subf %779, %782 : vector<8x8xf32>
    %784 = math.exp %783 : vector<8x8xf32>
    %cst_279 = arith.constant dense<0.000000e+00> : vector<8xf32>
    %785 = vector.multi_reduction <add>, %784, %cst_279 [1] : vector<8x8xf32> to vector<8xf32>
    %786 = vector.shape_cast %785 : vector<8xf32> to vector<8x1xf32>
    %cst_280 = arith.constant dense<0.000000e+00> : vector<8x8xf32>
    %787 = tpu.matmul %784, %776, %cst_280 {dimension_numbers = #tpu.dot_dimension_numbers<[1], [0], [0], [1], [0, 0, 1, 1], [], []>} : vector<8x8xf32>, vector<8x8xf32>, vector<8x8xf32> -> vector<8x8xf32>
    %788 = tpu.reciprocal %786 {approx = true} : vector<8x1xf32> -> vector<8x1xf32>
    %789 = vector.broadcast %788 : vector<8x1xf32> to vector<8x8xf32>
    %790 = arith.mulf %787, %789 : vector<8x8xf32>
    %791 = vector.extract_strided_slice %771 {offsets = [0, 8], sizes = [8, 8], strides = [1, 1]} : vector<8x32xf32> to vector<8x8xf32>
    %792 = vector.extract_strided_slice %772 {offsets = [0, 8], sizes = [8, 8], strides = [1, 1]} : vector<8x32xf32> to vector<8x8xf32>
    %793 = vector.extract_strided_slice %773 {offsets = [0, 8], sizes = [8, 8], strides = [1, 1]} : vector<8x32xf32> to vector<8x8xf32>
    %cst_281 = arith.constant dense<0.000000e+00> : vector<8x8xf32>
    %794 = tpu.matmul %791, %792, %cst_281 {dimension_numbers = #tpu.dot_dimension_numbers<[1], [1], [0], [0], [0, 0, 1, 0], [], []>} : vector<8x8xf32>, vector<8x8xf32>, vector<8x8xf32> -> vector<8x8xf32>
    %cst_282 = arith.constant 0.353553385 : f32
    %795 = vector.broadcast %cst_282 : f32 to vector<8x8xf32>
    %796 = arith.mulf %794, %795 : vector<8x8xf32>
    %cst_283 = arith.constant dense<0xFF800000> : vector<8xf32>
    %797 = vector.multi_reduction <maximumf>, %796, %cst_283 [1] : vector<8x8xf32> to vector<8xf32>
    %798 = vector.shape_cast %797 : vector<8xf32> to vector<8x1xf32>
    %799 = vector.broadcast %798 : vector<8x1xf32> to vector<8x8xf32>
    %800 = arith.subf %796, %799 : vector<8x8xf32>
    %801 = math.exp %800 : vector<8x8xf32>
    %cst_284 = arith.constant dense<0.000000e+00> : vector<8xf32>
    %802 = vector.multi_reduction <add>, %801, %cst_284 [1] : vector<8x8xf32> to vector<8xf32>
    %803 = vector.shape_cast %802 : vector<8xf32> to vector<8x1xf32>
    %cst_285 = arith.constant dense<0.000000e+00> : vector<8x8xf32>
    %804 = tpu.matmul %801, %793, %cst_285 {dimension_numbers = #tpu.dot_dimension_numbers<[1], [0], [0], [1], [0, 0, 1, 1], [], []>} : vector<8x8xf32>, vector<8x8xf32>, vector<8x8xf32> -> vector<8x8xf32>
    %805 = tpu.reciprocal %803 {approx = true} : vector<8x1xf32> -> vector<8x1xf32>
    %806 = vector.broadcast %805 : vector<8x1xf32> to vector<8x8xf32>
    %807 = arith.mulf %804, %806 : vector<8x8xf32>
    %808 = vector.extract_strided_slice %771 {offsets = [0, 16], sizes = [8, 8], strides = [1, 1]} : vector<8x32xf32> to vector<8x8xf32>
    %809 = vector.extract_strided_slice %772 {offsets = [0, 16], sizes = [8, 8], strides = [1, 1]} : vector<8x32xf32> to vector<8x8xf32>
    %810 = vector.extract_strided_slice %773 {offsets = [0, 16], sizes = [8, 8], strides = [1, 1]} : vector<8x32xf32> to vector<8x8xf32>
    %cst_286 = arith.constant dense<0.000000e+00> : vector<8x8xf32>
    %811 = tpu.matmul %808, %809, %cst_286 {dimension_numbers = #tpu.dot_dimension_numbers<[1], [1], [0], [0], [0, 0, 1, 0], [], []>} : vector<8x8xf32>, vector<8x8xf32>, vector<8x8xf32> -> vector<8x8xf32>
    %cst_287 = arith.constant 0.353553385 : f32
    %812 = vector.broadcast %cst_287 : f32 to vector<8x8xf32>
    %813 = arith.mulf %811, %812 : vector<8x8xf32>
    %cst_288 = arith.constant dense<0xFF800000> : vector<8xf32>
    %814 = vector.multi_reduction <maximumf>, %813, %cst_288 [1] : vector<8x8xf32> to vector<8xf32>
    %815 = vector.shape_cast %814 : vector<8xf32> to vector<8x1xf32>
    %816 = vector.broadcast %815 : vector<8x1xf32> to vector<8x8xf32>
    %817 = arith.subf %813, %816 : vector<8x8xf32>
    %818 = math.exp %817 : vector<8x8xf32>
    %cst_289 = arith.constant dense<0.000000e+00> : vector<8xf32>
    %819 = vector.multi_reduction <add>, %818, %cst_289 [1] : vector<8x8xf32> to vector<8xf32>
    %820 = vector.shape_cast %819 : vector<8xf32> to vector<8x1xf32>
    %cst_290 = arith.constant dense<0.000000e+00> : vector<8x8xf32>
    %821 = tpu.matmul %818, %810, %cst_290 {dimension_numbers = #tpu.dot_dimension_numbers<[1], [0], [0], [1], [0, 0, 1, 1], [], []>} : vector<8x8xf32>, vector<8x8xf32>, vector<8x8xf32> -> vector<8x8xf32>
    %822 = tpu.reciprocal %820 {approx = true} : vector<8x1xf32> -> vector<8x1xf32>
    %823 = vector.broadcast %822 : vector<8x1xf32> to vector<8x8xf32>
    %824 = arith.mulf %821, %823 : vector<8x8xf32>
    %825 = vector.extract_strided_slice %771 {offsets = [0, 24], sizes = [8, 8], strides = [1, 1]} : vector<8x32xf32> to vector<8x8xf32>
    %826 = vector.extract_strided_slice %772 {offsets = [0, 24], sizes = [8, 8], strides = [1, 1]} : vector<8x32xf32> to vector<8x8xf32>
    %827 = vector.extract_strided_slice %773 {offsets = [0, 24], sizes = [8, 8], strides = [1, 1]} : vector<8x32xf32> to vector<8x8xf32>
    %cst_291 = arith.constant dense<0.000000e+00> : vector<8x8xf32>
    %828 = tpu.matmul %825, %826, %cst_291 {dimension_numbers = #tpu.dot_dimension_numbers<[1], [1], [0], [0], [0, 0, 1, 0], [], []>} : vector<8x8xf32>, vector<8x8xf32>, vector<8x8xf32> -> vector<8x8xf32>
    %cst_292 = arith.constant 0.353553385 : f32
    %829 = vector.broadcast %cst_292 : f32 to vector<8x8xf32>
    %830 = arith.mulf %828, %829 : vector<8x8xf32>
    %cst_293 = arith.constant dense<0xFF800000> : vector<8xf32>
    %831 = vector.multi_reduction <maximumf>, %830, %cst_293 [1] : vector<8x8xf32> to vector<8xf32>
    %832 = vector.shape_cast %831 : vector<8xf32> to vector<8x1xf32>
    %833 = vector.broadcast %832 : vector<8x1xf32> to vector<8x8xf32>
    %834 = arith.subf %830, %833 : vector<8x8xf32>
    %835 = math.exp %834 : vector<8x8xf32>
    %cst_294 = arith.constant dense<0.000000e+00> : vector<8xf32>
    %836 = vector.multi_reduction <add>, %835, %cst_294 [1] : vector<8x8xf32> to vector<8xf32>
    %837 = vector.shape_cast %836 : vector<8xf32> to vector<8x1xf32>
    %cst_295 = arith.constant dense<0.000000e+00> : vector<8x8xf32>
    %838 = tpu.matmul %835, %827, %cst_295 {dimension_numbers = #tpu.dot_dimension_numbers<[1], [0], [0], [1], [0, 0, 1, 1], [], []>} : vector<8x8xf32>, vector<8x8xf32>, vector<8x8xf32> -> vector<8x8xf32>
    %839 = tpu.reciprocal %837 {approx = true} : vector<8x1xf32> -> vector<8x1xf32>
    %840 = vector.broadcast %839 : vector<8x1xf32> to vector<8x8xf32>
    %841 = arith.mulf %838, %840 : vector<8x8xf32>
    %842 = tpu.concatenate %790, %807, %824, %841 in 1 : vector<8x8xf32>, vector<8x8xf32>, vector<8x8xf32>, vector<8x8xf32> -> vector<8x32xf32>
    %843 = tpu.concatenate %770, %842 in 0 : vector<8x32xf32>, vector<8x32xf32> -> vector<16x32xf32>
    %c1_296 = arith.constant 1 : index
    %c0_297 = arith.constant 0 : index
    %c0_298 = arith.constant 0 : index
    %844 = vector.load %arg9[%c1_296, %c0_297, %c0_298] : memref<2x32x32xf32, #tpu.memory_space<vmem>>, vector<1x32x32xf32>
    %845 = vector.shape_cast %844 : vector<1x32x32xf32> to vector<32x32xf32>
    %cst_299 = arith.constant dense<0.000000e+00> : vector<16x32xf32>
    %846 = tpu.matmul %843, %845, %cst_299 {dimension_numbers = #tpu.dot_dimension_numbers<[1], [0], [0], [1], [0, 0, 1, 1], [], []>} : vector<16x32xf32>, vector<32x32xf32>, vector<16x32xf32> -> vector<16x32xf32>
    %c1_300 = arith.constant 1 : index
    %c0_301 = arith.constant 0 : index
    %c0_302 = arith.constant 0 : index
    %847 = vector.load %arg10[%c1_300, %c0_301, %c0_302] : memref<2x1x32xf32, #tpu.memory_space<vmem>>, vector<1x1x32xf32>
    %848 = vector.shape_cast %847 : vector<1x1x32xf32> to vector<1x32xf32>
    %849 = vector.broadcast %848 : vector<1x32xf32> to vector<16x32xf32>
    %850 = arith.addf %846, %849 : vector<16x32xf32>
    %851 = arith.addf %682, %850 : vector<16x32xf32>
    %c1_303 = arith.constant 1 : index
    %c0_304 = arith.constant 0 : index
    %c0_305 = arith.constant 0 : index
    %852 = vector.load %arg13[%c1_303, %c0_304, %c0_305] : memref<2x1x32xf32, #tpu.memory_space<vmem>>, vector<1x1x32xf32>
    %853 = vector.shape_cast %852 : vector<1x1x32xf32> to vector<1x32xf32>
    %c1_306 = arith.constant 1 : index
    %c0_307 = arith.constant 0 : index
    %c0_308 = arith.constant 0 : index
    %854 = vector.load %arg14[%c1_306, %c0_307, %c0_308] : memref<2x1x32xf32, #tpu.memory_space<vmem>>, vector<1x1x32xf32>
    %855 = vector.shape_cast %854 : vector<1x1x32xf32> to vector<1x32xf32>
    %cst_309 = arith.constant dense<0.000000e+00> : vector<16xf32>
    %856 = vector.multi_reduction <add>, %851, %cst_309 [1] : vector<16x32xf32> to vector<16xf32>
    %857 = vector.shape_cast %856 : vector<16xf32> to vector<16x1xf32>
    %cst_310 = arith.constant 3.200000e+01 : f32
    %858 = vector.broadcast %cst_310 : f32 to vector<16x1xf32>
    %859 = arith.divf %857, %858 : vector<16x1xf32>
    %860 = vector.broadcast %859 : vector<16x1xf32> to vector<16x32xf32>
    %861 = arith.subf %851, %860 : vector<16x32xf32>
    %862 = arith.mulf %861, %861 : vector<16x32xf32>
    %cst_311 = arith.constant dense<0.000000e+00> : vector<16xf32>
    %863 = vector.multi_reduction <add>, %862, %cst_311 [1] : vector<16x32xf32> to vector<16xf32>
    %864 = vector.shape_cast %863 : vector<16xf32> to vector<16x1xf32>
    %cst_312 = arith.constant 3.200000e+01 : f32
    %865 = vector.broadcast %cst_312 : f32 to vector<16x1xf32>
    %866 = arith.divf %864, %865 : vector<16x1xf32>
    %cst_313 = arith.constant 9.99999974E-6 : f32
    %867 = vector.broadcast %cst_313 : f32 to vector<16x1xf32>
    %868 = arith.addf %866, %867 : vector<16x1xf32>
    %869 = math.rsqrt %868 : vector<16x1xf32>
    %870 = vector.broadcast %869 : vector<16x1xf32> to vector<16x32xf32>
    %871 = arith.mulf %861, %870 : vector<16x32xf32>
    %872 = vector.broadcast %853 : vector<1x32xf32> to vector<16x32xf32>
    %873 = arith.mulf %871, %872 : vector<16x32xf32>
    %874 = vector.broadcast %855 : vector<1x32xf32> to vector<16x32xf32>
    %875 = arith.addf %873, %874 : vector<16x32xf32>
    %c1_314 = arith.constant 1 : index
    %c0_315 = arith.constant 0 : index
    %c0_316 = arith.constant 0 : index
    %876 = vector.load %arg17[%c1_314, %c0_315, %c0_316] : memref<2x32x64xf32, #tpu.memory_space<vmem>>, vector<1x32x64xf32>
    %877 = vector.shape_cast %876 : vector<1x32x64xf32> to vector<32x64xf32>
    %cst_317 = arith.constant dense<0.000000e+00> : vector<16x64xf32>
    %878 = tpu.matmul %875, %877, %cst_317 {dimension_numbers = #tpu.dot_dimension_numbers<[1], [0], [0], [1], [0, 0, 1, 1], [], []>} : vector<16x32xf32>, vector<32x64xf32>, vector<16x64xf32> -> vector<16x64xf32>
    %c1_318 = arith.constant 1 : index
    %c0_319 = arith.constant 0 : index
    %c0_320 = arith.constant 0 : index
    %879 = vector.load %arg18[%c1_318, %c0_319, %c0_320] : memref<2x1x64xf32, #tpu.memory_space<vmem>>, vector<1x1x64xf32>
    %880 = vector.shape_cast %879 : vector<1x1x64xf32> to vector<1x64xf32>
    %881 = vector.broadcast %880 : vector<1x64xf32> to vector<16x64xf32>
    %882 = arith.addf %878, %881 : vector<16x64xf32>
    %cst_321 = arith.constant 5.000000e-01 : f32
    %883 = vector.broadcast %cst_321 : f32 to vector<16x64xf32>
    %884 = arith.mulf %883, %882 : vector<16x64xf32>
    %cst_322 = arith.constant 0.707106769 : f32
    %885 = vector.broadcast %cst_322 : f32 to vector<16x64xf32>
    %886 = arith.mulf %882, %885 : vector<16x64xf32>
    %887 = math.erf %886 : vector<16x64xf32>
    %cst_323 = arith.constant 1.000000e+00 : f32
    %888 = vector.broadcast %cst_323 : f32 to vector<16x64xf32>
    %889 = arith.addf %888, %887 : vector<16x64xf32>
    %890 = arith.mulf %884, %889 : vector<16x64xf32>
    %c1_324 = arith.constant 1 : index
    %c0_325 = arith.constant 0 : index
    %c0_326 = arith.constant 0 : index
    %891 = vector.load %arg19[%c1_324, %c0_325, %c0_326] : memref<2x64x32xf32, #tpu.memory_space<vmem>>, vector<1x64x32xf32>
    %892 = vector.shape_cast %891 : vector<1x64x32xf32> to vector<64x32xf32>
    %cst_327 = arith.constant dense<0.000000e+00> : vector<16x32xf32>
    %893 = tpu.matmul %890, %892, %cst_327 {dimension_numbers = #tpu.dot_dimension_numbers<[1], [0], [0], [1], [0, 0, 1, 1], [], []>} : vector<16x64xf32>, vector<64x32xf32>, vector<16x32xf32> -> vector<16x32xf32>
    %c1_328 = arith.constant 1 : index
    %c0_329 = arith.constant 0 : index
    %c0_330 = arith.constant 0 : index
    %894 = vector.load %arg20[%c1_328, %c0_329, %c0_330] : memref<2x1x32xf32, #tpu.memory_space<vmem>>, vector<1x1x32xf32>
    %895 = vector.shape_cast %894 : vector<1x1x32xf32> to vector<1x32xf32>
    %896 = vector.broadcast %895 : vector<1x32xf32> to vector<16x32xf32>
    %897 = arith.addf %893, %896 : vector<16x32xf32>
    %898 = arith.addf %875, %897 : vector<16x32xf32>
    %c1_331 = arith.constant 1 : index
    %c0_332 = arith.constant 0 : index
    %c0_333 = arith.constant 0 : index
    %899 = vector.load %arg15[%c1_331, %c0_332, %c0_333] : memref<2x1x32xf32, #tpu.memory_space<vmem>>, vector<1x1x32xf32>
    %900 = vector.shape_cast %899 : vector<1x1x32xf32> to vector<1x32xf32>
    %c1_334 = arith.constant 1 : index
    %c0_335 = arith.constant 0 : index
    %c0_336 = arith.constant 0 : index
    %901 = vector.load %arg16[%c1_334, %c0_335, %c0_336] : memref<2x1x32xf32, #tpu.memory_space<vmem>>, vector<1x1x32xf32>
    %902 = vector.shape_cast %901 : vector<1x1x32xf32> to vector<1x32xf32>
    %cst_337 = arith.constant dense<0.000000e+00> : vector<16xf32>
    %903 = vector.multi_reduction <add>, %898, %cst_337 [1] : vector<16x32xf32> to vector<16xf32>
    %904 = vector.shape_cast %903 : vector<16xf32> to vector<16x1xf32>
    %cst_338 = arith.constant 3.200000e+01 : f32
    %905 = vector.broadcast %cst_338 : f32 to vector<16x1xf32>
    %906 = arith.divf %904, %905 : vector<16x1xf32>
    %907 = vector.broadcast %906 : vector<16x1xf32> to vector<16x32xf32>
    %908 = arith.subf %898, %907 : vector<16x32xf32>
    %909 = arith.mulf %908, %908 : vector<16x32xf32>
    %cst_339 = arith.constant dense<0.000000e+00> : vector<16xf32>
    %910 = vector.multi_reduction <add>, %909, %cst_339 [1] : vector<16x32xf32> to vector<16xf32>
    %911 = vector.shape_cast %910 : vector<16xf32> to vector<16x1xf32>
    %cst_340 = arith.constant 3.200000e+01 : f32
    %912 = vector.broadcast %cst_340 : f32 to vector<16x1xf32>
    %913 = arith.divf %911, %912 : vector<16x1xf32>
    %cst_341 = arith.constant 9.99999974E-6 : f32
    %914 = vector.broadcast %cst_341 : f32 to vector<16x1xf32>
    %915 = arith.addf %913, %914 : vector<16x1xf32>
    %916 = math.rsqrt %915 : vector<16x1xf32>
    %917 = vector.broadcast %916 : vector<16x1xf32> to vector<16x32xf32>
    %918 = arith.mulf %908, %917 : vector<16x32xf32>
    %919 = vector.broadcast %900 : vector<1x32xf32> to vector<16x32xf32>
    %920 = arith.mulf %918, %919 : vector<16x32xf32>
    %921 = vector.broadcast %902 : vector<1x32xf32> to vector<16x32xf32>
    %922 = arith.addf %920, %921 : vector<16x32xf32>
    %c0_342 = arith.constant 0 : index
    %c0_343 = arith.constant 0 : index
    %923 = vector.load %arg21[%c0_342, %c0_343] : memref<32x128xf32, #tpu.memory_space<vmem>>, vector<32x128xf32>
    %cst_344 = arith.constant dense<0.000000e+00> : vector<16x128xf32>
    %924 = tpu.matmul %922, %923, %cst_344 {dimension_numbers = #tpu.dot_dimension_numbers<[1], [0], [0], [1], [0, 0, 1, 1], [], []>} : vector<16x32xf32>, vector<32x128xf32>, vector<16x128xf32> -> vector<16x128xf32>
    %c0_345 = arith.constant 0 : index
    %c0_346 = arith.constant 0 : index
    %925 = vector.load %arg22[%c0_345, %c0_346] : memref<1x128xf32, #tpu.memory_space<vmem>>, vector<1x128xf32>
    %926 = vector.broadcast %925 : vector<1x128xf32> to vector<16x128xf32>
    %927 = arith.addf %924, %926 : vector<16x128xf32>
    %c0_347 = arith.constant 0 : index
    %c0_348 = arith.constant 0 : index
    %928 = vector.load %arg23[%c0_347, %c0_348] : memref<16x128xf32, #tpu.memory_space<vmem>>, vector<16x128xf32>
    tpu.vector_store %arg23[%c0_347, %c0_348], %927 {strides = array<i32>} : memref<16x128xf32, #tpu.memory_space<vmem>>, vector<16x128xf32>,
    return
  }
}

</mosaic_0001>

<bundles_post_ra>
// kernel: music_transformer_forward.1
= control target key start
LH: loop header
LB: loop body
LE: loop exit
PB: predicated region body
PF: predicated region fallthrough
CT: control target
= control target key end

     0   :  { %s9984_s0 = inlined_call_operand.vmem [shape: s32[16,1], index: 0, kind: input, shape index: {}]   ;;  %s9985_s1 = inlined_call_operand.hbm [shape: f32[3,32], index: 1, kind: input, shape index: {}]   ;;  %s9986_s2 = inlined_call_operand.vmem [shape: f32[32,32], index: 2, kind: input, shape index: {}]   ;;  %s9987_s3 = inlined_call_operand.vmem [shape: f32[2,32,96], index: 3, kind: input, shape index: {}]   ;;  %s9988_s4 = inlined_call_operand.vmem [shape: f32[2,1,96], index: 4, kind: input, shape index: {}]   ;;  %s9989_s5 = inlined_call_operand.vmem [shape: f32[2,32,32], index: 5, kind: input, shape index: {}]   ;;  %s9990_s6 = inlined_call_operand.vmem [shape: f32[2,1,32], index: 6, kind: input, shape index: {}]   ;;  %s9991_s7 = inlined_call_operand.vmem [shape: f32[2,32,96], index: 7, kind: input, shape index: {}]   ;;  %s9992_s8 = inlined_call_operand.hbm [shape: f32[2,1,96], index: 8, kind: input, shape index: {}]   ;;  %s9993_s9 = inlined_call_operand.hbm [shape: f32[2,32,32], index: 9, kind: input, shape index: {}]   ;;  %s9994_s10 = inlined_call_operand.hbm [shape: f32[2,1,32], index: 10, kind: input, shape index: {}]   ;;  %s9995_s11 = inlined_call_operand.hbm [shape: f32[2,1,32], index: 11, kind: input, shape index: {}]   ;;  %s9996_s12 = inlined_call_operand.hbm [shape: f32[2,1,32], index: 12, kind: input, shape index: {}]   ;;  %s9997_s13 = inlined_call_operand.vmem [shape: f32[2,1,32], index: 13, kind: input, shape index: {}]   ;;  %s9998_s14 = inlined_call_operand.hbm [shape: f32[2,1,32], index: 14, kind: input, shape index: {}]   ;;  %s9999_s15 = inlined_call_operand.vmem [shape: f32[2,1,32], index: 15, kind: input, shape index: {}]   ;;  %s10000_s16 = inlined_call_operand.vmem [shape: f32[2,1,32], index: 16, kind: input, shape index: {}]   ;;  %s10001_s17 = inlined_call_operand.hbm [shape: f32[2,32,64], index: 17, kind: input, shape index: {}]   ;;  %s10002_s18 = inlined_call_operand.hbm [shape: f32[2,1,64], index: 18, kind: input, shape index: {}]   ;;  %s10003_s19 = inlined_call_operand.vmem [shape: f32[2,64,32], index: 19, kind: input, shape index: {}]   ;;  %s10004_s20 = inlined_call_operand.hbm [shape: f32[2,1,32], index: 20, kind: input, shape index: {}]   ;;  %s10005_s21 = inlined_call_operand.hbm [shape: f32[32,128], index: 21, kind: input, shape index: {}]   ;;  %s10006_s22 = inlined_call_operand.hbm [shape: f32[1,128], index: 22, kind: input, shape index: {}]   ;;  %s10007_s23 = inlined_call_operand.vmem [shape: f32[16,128], index: 23, kind: output, shape index: {}]  }
   0x1   :  { %10016 = sst [smem:[#allocation28_spill]] %s9984_s0 }
   0x2   :  { %10017 = sst [smem:[#allocation29_spill]] %s9985_s1 }
   0x3   :  { %10018 = sst [smem:[#allocation30_spill]] %s9986_s2 }
   0x4   :  { %10019 = sst [smem:[#allocation31_spill]] %s9987_s3 }
   0x5   :  { %10020 = sst [smem:[#allocation32_spill]] %s9988_s4 }
   0x6   :  { %10021 = sst [smem:[#allocation33_spill]] %s9989_s5 }
   0x7   :  { %10022 = sst [smem:[#allocation34_spill]] %s9990_s6 }
   0x8   :  { %10023 = sst [smem:[#allocation35_spill]] %s9991_s7 }
   0x9   :  { %28 = vsyncpa [#allocation3], 0 }
   0xa   :  { %29 = vsyncpa [#allocation5], 0 }
   0xb   :  { %30 = vsyncpa [#allocation8], 0 }
   0xc   :  { %31 = vsyncpa [#allocation11], 0 }
   0xd   :  { %32 = vsyncpa [#allocation14], 0 }
   0xe   :  { %33 = vsyncpa [#allocation17], 0 }
   0xf   :  { %34 = vsyncpa [#allocation20], 0  ;;  %s8855_s4 = smov [#allocation4]  }
  0x10   :  { %s64_s30 = sshll.u32 %s8855_s4, 4  ;;  %s65_s30 = int_to_ptr.vmem [resolvable:$true] %s64_s30 }
  0x11   :  { %s8609_s24 = scalar_lea.vmem %s65_s30, 32  ;;  %p8614_p1 = scmp.lt.s32.totalorder %s65_s30, %s65_s30 }
  0x12   :  { %p8610_p0 = scmp.ne.s32.totalorder %s65_s30, %s8609_s24  ;;  %p8615_p2 = scmp.lt.s32.totalorder %s8609_s24, %s8609_s24 }
  0x14   :  { %p8616_p3 = por %p8615_p2, %p8614_p1 }
  0x16   :  { %p8617_p4 = pnand %p8616_p3, %p8610_p0 }
  0x18   :  { %8620 = shalt.err (!%p8617_p4)
}
  0x19   :  { %s8856_s25 = smov 16   ;;  %s8857_s5 = smov 1  }
  0x1a   :  { %70 = dma.hbm_to_vmem [thread:$0]  %s9992_s8, 32, %s65_s30, [#allocation5], %s8856_s25, %s8856_s25, %s8857_s5  }
  0x1b   :  { %s8858_s2 = smov [#allocation7]   ;;  %s8859_s27 = smov [#allocation10]  }
  0x1c   :  { %s88_s6 = sshll.u32 %s8858_s2, 4  ;;  %s112_s7 = sshll.u32 %s8859_s27, 4  ;;  %s89_s6 = int_to_ptr.vmem [resolvable:$true] %s88_s6  ;;  %s113_s7 = int_to_ptr.vmem [resolvable:$true] %s112_s7 }
  0x1d   :  { %s8629_s28 = scalar_lea.vmem %s89_s6, 32  ;;  %p8634_p6 = scmp.lt.s32.totalorder %s89_s6, %s89_s6 }
  0x1e   :  { %p8630_p5 = scmp.ne.s32.totalorder %s89_s6, %s8629_s28  ;;  %p8635_p7 = scmp.lt.s32.totalorder %s8629_s28, %s8629_s28 }
  0x20   :  { %p8636_p8 = por %p8635_p7, %p8634_p6 }
  0x22   :  { %p8637_p9 = pnand %p8636_p8, %p8630_p5 }
  0x24   :  { %8640 = shalt.err (!%p8637_p9)
}
  0x25   :  { %94 = dma.hbm_to_vmem [thread:$0]  %s9994_s10, 32, %s89_s6, [#allocation8], %s8856_s25, %s8856_s25, %s8857_s5  }
  0x26   :  { %s8649_s8 = scalar_lea.vmem %s113_s7, 32  ;;  %p8654_p11 = scmp.lt.s32.totalorder %s113_s7, %s113_s7 }
  0x27   :  { %p8650_p10 = scmp.ne.s32.totalorder %s113_s7, %s8649_s8  ;;  %p8655_p12 = scmp.lt.s32.totalorder %s8649_s8, %s8649_s8 }
  0x29   :  { %p8656_p13 = por %p8655_p12, %p8654_p11 }
  0x2b   :  { %p8657_p0 = pnand %p8656_p13, %p8650_p10 }
  0x2d   :  { %8660 = shalt.err (!%p8657_p0)
}
  0x2e   :  { %118 = dma.hbm_to_vmem [thread:$0]  %s9996_s12, 32, %s113_s7, [#allocation11], %s8856_s25, %s8856_s25, %s8857_s5  }
  0x2f   :  { %s8860_s30 = smov [#allocation13]   ;;  %s8861_s1 = smov [#allocation16]  }
  0x30   :  { %s142_s24 = sshll.u32 %s8860_s30, 4  ;;  %s168_s10 = sshll.u32 %s8861_s1, 4  ;;  %s143_s24 = int_to_ptr.vmem [resolvable:$true] %s142_s24  ;;  %s169_s10 = int_to_ptr.vmem [resolvable:$true] %s168_s10 }
  0x31   :  { %s8669_s26 = scalar_lea.vmem %s143_s24, 1024  ;;  %p8674_p2 = scmp.lt.s32.totalorder %s143_s24, %s143_s24 }
  0x32   :  { %p8670_p1 = scmp.ne.s32.totalorder %s143_s24, %s8669_s26  ;;  %p8675_p3 = scmp.lt.s32.totalorder %s8669_s26, %s8669_s26 }
  0x34   :  { %p8676_p4 = por %p8675_p3, %p8674_p2 }
  0x36   :  { %p8677_p5 = pnand %p8676_p4, %p8670_p1 }
  0x38   :  { %8680 = shalt.err (!%p8677_p5)
}
  0x39   :  { %s8862_s2 = smov 128   ;;  %s8863_s6 = smov 8  }
  0x3a   :  { %148 = dma.hbm_to_vmem [thread:$0]  %s10001_s17, 1024, %s143_s24, [#allocation14], %s8862_s2, %s8862_s2, %s8863_s6  }
  0x3b   :  { %s8689_s12 = scalar_lea.vmem %s169_s10, 32  ;;  %p8694_p7 = scmp.lt.s32.totalorder %s169_s10, %s169_s10 }
  0x3c   :  { %p8690_p6 = scmp.ne.s32.totalorder %s169_s10, %s8689_s12  ;;  %p8695_p8 = scmp.lt.s32.totalorder %s8689_s12, %s8689_s12 }
  0x3e   :  { %p8696_p9 = por %p8695_p8, %p8694_p7 }
  0x40   :  { %p8697_p10 = pnand %p8696_p9, %p8690_p6 }
  0x42   :  { %8700 = shalt.err (!%p8697_p10)
}
  0x43   :  { %174 = dma.hbm_to_vmem [thread:$0]  %s10004_s20, 32, %s169_s10, [#allocation17], %s8856_s25, %s8856_s25, %s8857_s5  }
  0x44   :  { %s8864_s3 = smov [#allocation2]   ;;  %s8865_s0 = smov [#allocation6]  }
  0x45   :  { %s43_s8 = sshll.u32 %s8864_s3, 4  ;;  %s76_s17 = sshll.u32 %s8865_s0, 4  ;;  %s44_s8 = int_to_ptr.vmem [resolvable:$true] %s43_s8  ;;  %s77_s17 = int_to_ptr.vmem [resolvable:$true] %s76_s17 }
  0x46   :  { %s8709_s4 = scalar_lea.vmem %s44_s8, 64  ;;  %p8714_p12 = scmp.lt.s32.totalorder %s44_s8, %s44_s8 }
  0x47   :  { %p8710_p11 = scmp.ne.s32.totalorder %s44_s8, %s8709_s4  ;;  %p8715_p13 = scmp.lt.s32.totalorder %s8709_s4, %s8709_s4 }
  0x49   :  { %p8716_p0 = por %p8715_p13, %p8714_p12 }
  0x4b   :  { %p8717_p1 = pnand %p8716_p0, %p8710_p11 }
  0x4d   :  { %8720 = shalt.err (!%p8717_p1)
}
  0x4e   :  { %s10024_s1 = sld [smem:[#allocation29_spill]]  ;;  %s8729_s26 = scalar_lea.vmem %s77_s17, 1024 }
  0x4f   :  { %p8730_p2 = scmp.ne.s32.totalorder %s77_s17, %s8729_s26  ;;  %p8734_p3 = scmp.lt.s32.totalorder %s77_s17, %s77_s17 }
  0x50   :  { %p8735_p4 = scmp.lt.s32.totalorder %s8729_s26, %s8729_s26 }
  0x52   :  { %p8736_p5 = por %p8735_p4, %p8734_p3 }
  0x54   :  { %46 = dma.hbm_to_vmem [thread:$0]  %s10024_s1, 64, %s44_s8, [#allocation3]  }
  0x55   :  { %p8737_p6 = pnand %p8736_p5, %p8730_p2 }
  0x57   :  { %8740 = shalt.err (!%p8737_p6)
}
  0x58   :  { %82 = dma.hbm_to_vmem [thread:$0]  %s9993_s9, 1024, %s77_s17, [#allocation5], %s8862_s2, %s8862_s2, %s8863_s6  }
  0x59   :  { %s8866_s27 = smov [#allocation9]   ;;  %s8867_s12 = smov [#allocation12]  }
  0x5a   :  { %s100_s28 = sshll.u32 %s8866_s27, 4  ;;  %s126_s7 = sshll.u32 %s8867_s12, 4  ;;  %s101_s28 = int_to_ptr.vmem [resolvable:$true] %s100_s28  ;;  %s127_s7 = int_to_ptr.vmem [resolvable:$true] %s126_s7 }
  0x5b   :  { %s8749_s29 = scalar_lea.vmem %s101_s28, 32  ;;  %p8754_p8 = scmp.lt.s32.totalorder %s101_s28, %s101_s28 }
  0x5c   :  { %p8750_p7 = scmp.ne.s32.totalorder %s101_s28, %s8749_s29  ;;  %p8755_p9 = scmp.lt.s32.totalorder %s8749_s29, %s8749_s29 }
  0x5e   :  { %p8756_p10 = por %p8755_p9, %p8754_p8 }
  0x60   :  { %p8757_p11 = pnand %p8756_p10, %p8750_p7 }
  0x62   :  { %8760 = shalt.err (!%p8757_p11)
}
  0x63   :  { %106 = dma.hbm_to_vmem [thread:$0]  %s9995_s11, 32, %s101_s28, [#allocation8], %s8856_s25, %s8856_s25, %s8857_s5  }
  0x64   :  { %s8769_s9 = scalar_lea.vmem %s127_s7, 32  ;;  %p8774_p13 = scmp.lt.s32.totalorder %s127_s7, %s127_s7 }
  0x65   :  { %p8770_p12 = scmp.ne.s32.totalorder %s127_s7, %s8769_s9  ;;  %p8775_p0 = scmp.lt.s32.totalorder %s8769_s9, %s8769_s9 }
  0x67   :  { %p8776_p1 = por %p8775_p0, %p8774_p13 }
  0x69   :  { %p8777_p2 = pnand %p8776_p1, %p8770_p12 }
  0x6b   :  { %8780 = shalt.err (!%p8777_p2)
}
  0x6c   :  { %132 = dma.hbm_to_vmem [thread:$0]  %s9998_s14, 32, %s127_s7, [#allocation11], %s8856_s25, %s8856_s25, %s8857_s5  }
  0x6d   :  { %s8868_s4 = smov [#allocation15]   ;;  %s8869_s24 = smov [#allocation18]  }
  0x6e   :  { %s154_s30 = sshll.u32 %s8868_s4, 4  ;;  %s180_s11 = sshll.u32 %s8869_s24, 4  ;;  %s155_s30 = int_to_ptr.vmem [resolvable:$true] %s154_s30  ;;  %s181_s11 = int_to_ptr.vmem [resolvable:$true] %s180_s11 }
  0x6f   :  { %s8789_s1 = scalar_lea.vmem %s155_s30, 32  ;;  %p8794_p4 = scmp.lt.s32.totalorder %s155_s30, %s155_s30 }
  0x70   :  { %p8790_p3 = scmp.ne.s32.totalorder %s155_s30, %s8789_s1  ;;  %p8795_p5 = scmp.lt.s32.totalorder %s8789_s1, %s8789_s1 }
  0x72   :  { %p8796_p6 = por %p8795_p5, %p8794_p4 }
  0x74   :  { %p8797_p7 = pnand %p8796_p6, %p8790_p3 }
  0x76   :  { %8800 = shalt.err (!%p8797_p7)
}
  0x77   :  { %160 = dma.hbm_to_vmem [thread:$0]  %s10002_s18, 32, %s155_s30, [#allocation14], %s8856_s25, %s8856_s25, %s8857_s5  }
  0x78   :  { %s8809_s14 = scalar_lea.vmem %s181_s11, 512  ;;  %p8814_p9 = scmp.lt.s32.totalorder %s181_s11, %s181_s11 }
  0x79   :  { %p8810_p8 = scmp.ne.s32.totalorder %s181_s11, %s8809_s14  ;;  %p8815_p10 = scmp.lt.s32.totalorder %s8809_s14, %s8809_s14 }
  0x7b   :  { %p8816_p11 = por %p8815_p10, %p8814_p9 }
  0x7d   :  { %p8817_p12 = pnand %p8816_p11, %p8810_p8 }
  0x7f   :  { %8820 = shalt.err (!%p8817_p12)
}
  0x80   :  { %186 = dma.hbm_to_vmem [thread:$0]  %s10005_s21, 512, %s181_s11, [#allocation17], %s8862_s2, %s8862_s2, %s8863_s6  }
  0x81   :  { %s8870_s28 = smov [#allocation19]  }
  0x82   :  { %s193_s12 = sshll.u32 %s8870_s28, 4  ;;  %s194_s12 = int_to_ptr.vmem [resolvable:$true] %s193_s12 }
  0x83   :  { %s8829_s7 = scalar_lea.vmem %s194_s12, 16  ;;  %s8833_s18 = scalar_lea.vmem %s194_s12, 32 }
  0x84   :  { %p8830_p13 = scmp.ne.s32.totalorder %s194_s12, %s8829_s7  ;;  %p8834_p0 = scmp.lt.s32.totalorder %s194_s12, %s194_s12 }
  0x85   :  { %p8835_p1 = scmp.lt.s32.totalorder %s8833_s18, %s8829_s7 }
  0x87   :  { %p8836_p2 = por %p8835_p1, %p8834_p0 }
  0x89   :  { %p8837_p3 = pnand %p8836_p2, %p8830_p13 }
  0x8b   :  { %8840 = shalt.err (!%p8837_p3)
}
  0x8c   :  { %196 = dma.hbm_to_vmem [thread:$0]  %s10006_s22, 16, %s194_s12, [#allocation20]  }
  0x8d   :  { %8841 = dma.done.wait [#allocation3], 64  }
  0x8e   :  { %8842 = vsyncadd [#allocation3], 4294967232 }
  0x8f   :  { %8843 = dma.done.wait [#allocation5], 1056  }
  0x90   :  { %8844 = vsyncadd [#allocation5], 4294966240 }
  0x91   :  { %8845 = dma.done.wait [#allocation8], 64  }
  0x92   :  { %8846 = vsyncadd [#allocation8], 4294967232 }
  0x93   :  { %8847 = dma.done.wait [#allocation11], 64  }
  0x94   :  { %8848 = vsyncadd [#allocation11], 4294967232 }
  0x95   :  { %8849 = dma.done.wait [#allocation14], 1056  }
  0x96   :  { %8850 = vsyncadd [#allocation14], 4294966240 }
  0x97   :  { %8851 = dma.done.wait [#allocation17], 544  }
  0x98   :  { %8852 = vsyncadd [#allocation17], 4294966752 }
  0x99   :  { %8853 = dma.done.wait [#allocation20], 16  }
  0x9a   :  { %8854 = vsyncadd [#allocation20], 4294967280  ;;  %v8871_v0 = vmov 0   ;;  %v8872_v1 = vmov 0.0   ;;  %s10025_s2 = sld [smem:[#allocation28_spill]]  ;;  %vm331_vm6 = vcmask 261120   ;;  %v315_v58 = vlaneseq }
  0x9b   :  { %8424 = vset.pattern.permute.xlu0 %v8871_v0  ;;  %8435 = vset.pattern.permute.xlu1 %v8871_v0  ;;  %s10026_s17 = sld [smem:[#allocation31_spill]]  ;;  %v7483_v17 = vld [vmem:[#allocation2] ss:$0 sm:$0xff]  ;;  %v7486_v18 = vld [vmem:[#allocation2 + $0x1] ss:$0 sm:$0xff]  ;;  %vm8873_vm7 = vmmov 0  }
  0x9c   :  { %7903 = vmatprep.subr.mxu1 %v8872_v1  ;;  %v7489_v20 = vld [vmem:[#allocation2 + $0x2] ss:$0 sm:$0xff]  ;;  %s10027_s10 = sld [smem:[#allocation30_spill]]  ;;  %7905 = vmatprep.mubr.msk.f32.mxu1 %vm8873_vm7, %v8872_v1  ;;  %s8874_s7 = smov 96   ;;  %vm416_vm8 = vcmask 64512   ;;  %v316_v59 = vshrl.u32 %v315_v58, 7 }
  0x9d   :  { %s10028_s12 = sld [smem:[#allocation32_spill]]  ;;  %s8875_s18 = smov 64   ;;  %v318_v60 = vand.u32 127, %v315_v58  ;;  %vm1094_vm10 = vcmask 130048   ;;  %vm1096_vm11 = vcmask 195584   ;;  %vm3714_vm12 = vcmask 523264  }
  0x9e   :  { %s8876_s5 = smov 88   ;;  %s8877_s29 = smov 120  }
  0x9f   :  { %s8878_s21 = smov 80   ;;  %s8879_s22 = smov 112   ;;  %vm9175_vm9 = vcmp.ge.s32.totalorder %v316_v59, %v318_v60 }
  0xa0   :  { %v233_v2 = vld [vmem:[%s10025_s2] sm:$0xff]  ;;  %v234_v3 = vld [vmem:[%s10025_s2 + $0x8] sm:$0xff]  ;;  %s8880_s2 = smov 72   ;;  %s8881_s3 = smov 104  }
  0xa1   :  { %vm235_vm0 = vcmp.eq.s32.totalorder %v233_v2, 0  ;;  %vm260_vm1 = vcmp.eq.s32.totalorder %v233_v2, 1  ;;  %vm285_vm2 = vcmp.eq.s32.totalorder %v233_v2, 2  ;;  %vm286_vm3 = vcmp.eq.s32.totalorder %v234_v3, 2  ;;  %v323_v13 = vld [vmem:[%s10026_s17 + $0x18] sm:$0xff]  ;;  %v322_v14 = vld [vmem:[%s10026_s17 + $0x10] sm:$0xff] }
  0xa2   :  { %v7481_v4 = vsel %vm235_vm0, 1.0, %v8872_v1  ;;  %v7484_v5 = vsel %vm260_vm1, 1.0, %v8872_v1  ;;  %v7487_v6 = vsel %vm285_vm2, 1.0, %v8872_v1  ;;  %v7488_v7 = vsel %vm286_vm3, 1.0, %v8872_v1  ;;  %7892 = vmatprep.subr.mxu0 %v323_v13  ;;  %v321_v15 = vld [vmem:[%s10026_s17 + $0x8] sm:$0xff]  ;;  %v320_v16 = vld [vmem:[%s10026_s17] sm:$0xff] }
  0xa3   :  { %v8425_v8 = vpack.i.bf16 %v7484_v5, %v7481_v4  ;;  %v8436_v9 = vpack.i.bf16 %v7488_v7, %v7487_v6  ;;  %vm236_vm4 = vcmp.eq.s32.totalorder %v234_v3, 0  ;;  %vm261_vm5 = vcmp.eq.s32.totalorder %v234_v3, 1  ;;  %7893 = vmatpush3.msra.mxu0 %v323_v13  ;;  %v310_v37 = vld [vmem:[%s10027_s10] sm:$0xff]  ;;  %s8882_s8 = smov 56   ;;  %s8883_s9 = smov 40  }
  0xa4   :  { %v7482_v10 = vsel %vm236_vm4, 1.0, %v8872_v1  ;;  %v7485_v11 = vsel %vm261_vm5, 1.0, %v8872_v1  ;;  %7894 = vmatprep.subr.mxu0 %v322_v14  ;;  %v7490_v45 = vld [vmem:[%s10028_s12] ss:$0 sm:$0xff]  ;;  %s8884_s0 = smov 48   ;;  %s10031_s24 = sld [smem:[#allocation33_spill]] }
  0xa5   :  { %8426 = vperm.xlu0 %8424, %v8425_v8   ;;  %8437 = vperm.xlu1 %8435, %v8436_v9   ;;  %v8430_v12 = vpack.i.bf16 %v7485_v11, %v7482_v10  ;;  %s10014_s27 = smov 24   ;;  %s10032_s30 = sld [smem:[#allocation34_spill]] }
  0xa6   :  { %7895 = vmatpush3.msra.mxu0 %v322_v14  ;;  %s10033_s26 = sld [smem:[#allocation35_spill]] }
  0xa7   :  { %7896 = vmatprep.subr.mxu0 %v321_v15 }
  0xa8   :  { %7897 = vmatpush3.msra.mxu0 %v321_v15 }
  0xa9   :  { %8431 = vperm.xlu0 %8424, %v8430_v12   ;;  %7898 = vmatprep.subr.mxu0 %v320_v16 }
  0xaa   :  { %7899 = vmatpush3.msra.mxu0 %v320_v16 }
  0xab   :  { %7923 = vmatprep.subr.mxu0 %v8872_v1 }
 0x120   :  { %v8427_v19 = vpop.permute.xlu0 %8426  ;;  %v8438_v21 = vpop.permute.xlu1 %8437 }
 0x121   :  { %v8429_v22 = vunpack.i.h.bf16 %v8427_v19  ;;  %v8428_v23 = vunpack.i.l.bf16 %v8427_v19  ;;  %v8439_v24 = vunpack.i.l.bf16 %v8438_v21  ;;  %v8440_v27 = vunpack.i.h.bf16 %v8438_v21 }
 0x123   :  { %v281_v25 = vmul.f32 %v8429_v22, %v7486_v18  ;;  %v256_v26 = vmul.f32 %v8428_v23, %v7483_v17  ;;  %v306_v28 = vmul.f32 %v8439_v24, %v7489_v20  ;;  %v307_v33 = vmul.f32 %v8440_v27, %v7489_v20 }
 0x124   :  { %v8432_v29 = vpop.permute.xlu0 %8431 }
 0x125   :  { %v283_v30 = vadd.f32 %v281_v25, %v256_v26  ;;  %v8434_v31 = vunpack.i.h.bf16 %v8432_v29  ;;  %v8433_v32 = vunpack.i.l.bf16 %v8432_v29 }
 0x127   :  { %v308_v34 = vadd.f32 %v306_v28, %v283_v30  ;;  %v282_v35 = vmul.f32 %v8434_v31, %v7486_v18  ;;  %v257_v36 = vmul.f32 %v8433_v32, %v7483_v17 }
 0x129   :  { %v311_v38 = vmul.f32 5.656854, %v308_v34  ;;  %v284_v39 = vadd.f32 %v282_v35, %v257_v36 }
 0x12b   :  { %v309_v40 = vadd.f32 %v307_v33, %v284_v39  ;;  %v9101_v41 = vadd.f32 %v311_v38, %v310_v37 }
 0x12d   :  { %7900 = vmatprep.mubr.msk.f32.mxu0 %vm331_vm6, %v9101_v41  ;;  %v312_v42 = vmul.f32 5.656854, %v309_v40 }
 0x12f   :  { %v9105_v43 = vadd.f32 %v312_v42, %v310_v37 }
 0x131   :  { %7901 = vmatmul.mubr.msk.f32.vlgmr.msra.gmra.mxu0 %vm331_vm6, %v9105_v43 }
 0x132   :  { %7925 = vmatprep.mubr.msk.f32.mxu0 %vm8873_vm7, %v8872_v1 }
 0x1f1   :  { %v7902_v44 = vpop.f32.mrf.mxu0 }
 0x1f2   :  { %v9134_v48 = vadd.f32 %v7902_v44, %v7490_v45 }
 0x1f3   :  { %v404_v46 = vpop.f32.mrf.mxu0 }
 0x1f4   :  { %v9116_v47 = vadd.f32 %v7490_v45, %v404_v46 }
 0x1f6   :  { %414 = vrot.lane.b32.xlu1 %v9116_v47, %s8874_s7 }
 0x1fa   :  { %502 = vrot.lane.b32.xlu1 %v9116_v47, %s8875_s18 }
 0x1fe   :  { %582 = vrot.lane.b32.xlu1 %v9116_v47, %s8876_s5 }
 0x202   :  { %580 = vrot.lane.b32.xlu1 %v9116_v47, %s8877_s29 }
 0x206   :  { %749 = vrot.lane.b32.xlu1 %v9116_v47, %s8878_s21 }
 0x20a   :  { %747 = vrot.lane.b32.xlu1 %v9116_v47, %s8879_s22 }
 0x20e   :  { %916 = vrot.lane.b32.xlu1 %v9116_v47, %s8880_s2 }
 0x212   :  { %914 = vrot.lane.b32.xlu1 %v9116_v47, %s8881_s3 }
 0x216   :  { %1099 = vrot.lane.b32.xlu1 %v9134_v48, %s8874_s7 }
 0x21a   :  { %1264 = vrot.lane.b32.xlu1 %v9134_v48, %s8877_s29 }
 0x21e   :  { %1433 = vrot.lane.b32.xlu1 %v9134_v48, %s8878_s21 }
 0x222   :  { %1431 = vrot.lane.b32.xlu1 %v9134_v48, %s8879_s22 }
 0x226   :  { %1600 = vrot.lane.b32.xlu1 %v9134_v48, %s8880_s2 }
 0x22a   :  { %1598 = vrot.lane.b32.xlu1 %v9134_v48, %s8881_s3 }
 0x268   :  { %v415_v49 = vpop.permute.xlu1 %414 }
 0x269   :  { %7904 = vmatpush3.xpose.msk.msra.mxu1 %vm416_vm8, %v415_v49 }
 0x26a   :  { %7908 = vmatprep.subr.mxu1 %v8872_v1 }
 0x26c   :  { %7906 = vmatmul.mubr.msk.f32.vlgmr.msra.gmra.mxu1 %vm416_vm8, %v9116_v47  ;;  %v503_v50 = vpop.permute.xlu1 %502 }
 0x26d   :  { %7909 = vmatpush3.msra.mxu1 %v503_v50  ;;  %7910 = vmatprep.mubr.msk.f32.mxu1 %vm8873_vm7, %v8872_v1 }
 0x26e   :  { %7913 = vmatprep.subr.mxu1 %v8872_v1 }
 0x270   :  { %v9155_v51 = vpop.permute.xlu1 %582 }
 0x274   :  { %v9157_v52 = vpop.permute.xlu1 %580 }
 0x278   :  { %v750_v53 = vpop.permute.xlu1 %749 }
 0x279   :  { %7924 = vmatpush3.xpose.msk.msra.mxu0 %vm416_vm8, %v750_v53 }
 0x27a   :  { %7933 = vmatprep.subr.mxu0 %v8872_v1 }
 0x27c   :  { %v748_v54 = vpop.permute.xlu1 %747 }
 0x27d   :  { %7926 = vmatmul.mubr.msk.f32.vlgmr.msra.gmra.mxu0 %vm416_vm8, %v748_v54 }
 0x27e   :  { %7935 = vmatprep.mubr.msk.f32.mxu0 %vm8873_vm7, %v8872_v1 }
 0x280   :  { %v917_v55 = vpop.permute.xlu1 %916 }
 0x281   :  { %7934 = vmatpush3.xpose.msk.msra.mxu0 %vm416_vm8, %v917_v55 }
 0x282   :  { %7943 = vmatprep.subr.mxu0 %v8872_v1 }
 0x284   :  { %v915_v56 = vpop.permute.xlu1 %914 }
 0x285   :  { %7936 = vmatmul.mubr.msk.f32.vlgmr.msra.gmra.mxu0 %vm416_vm8, %v915_v56 }
 0x286   :  { %7945 = vmatprep.mubr.msk.f32.mxu0 %vm8873_vm7, %v8872_v1 }
 0x288   :  { %v1100_v57 = vpop.permute.xlu1 %1099 }
 0x289   :  { %7944 = vmatpush3.xpose.msk.msra.mxu0 %vm416_vm8, %v1100_v57 }
 0x28a   :  { %7953 = vmatprep.subr.mxu0 %v8872_v1 }
 0x28c   :  { %7946 = vmatmul.mubr.msk.f32.vlgmr.msra.gmra.mxu0 %vm416_vm8, %v9134_v48  ;;  %v1265_v19 = vpop.permute.xlu1 %1264 }
 0x28d   :  { %7955 = vmatprep.mubr.msk.f32.mxu0 %vm8873_vm7, %v8872_v1 }
 0x290   :  { %v1434_v20 = vpop.permute.xlu1 %1433 }
 0x294   :  { %v1432_v23 = vpop.permute.xlu1 %1431 }
 0x298   :  { %v1601_v26 = vpop.permute.xlu1 %1600 }
 0x29c   :  { %v1599_v27 = vpop.permute.xlu1 %1598 }
 0x32c   :  { %v487_v61 = vpop.f32.mrf.mxu1 }
 0x32d   :  { %v491_v63 = vmul.f32 0.35355338, %v487_v61 }
 0x32e   :  { %v7907_v0 = vpop.f32.mrf.mxu1 }
 0x32f   :  { %v492_v2 = vsel %vm9175_vm9, %v491_v63, -1e+30 }
 0x330   :  { %v493_v3 = vsel %vm416_vm8, %v492_v2, -inf }
 0x331   :  { %494 = vmax.xlane.f32.xlu0 %v493_v3 }
 0x33d   :  { %v821_v4 = vpop.f32.mrf.mxu0 }
 0x33e   :  { %v825_v10 = vmul.f32 0.35355338, %v821_v4 }
 0x33f   :  { %v7927_v5 = vpop.f32.mrf.mxu0 }
 0x340   :  { %v9188_v12 = vsel %vm9175_vm9, %v825_v10, -1e+30 }
 0x341   :  { %v827_v13 = vsel %vm416_vm8, %v9188_v12, -inf }
 0x345   :  { %v988_v6 = vpop.f32.mrf.mxu0 }
 0x346   :  { %v992_v11 = vmul.f32 0.35355338, %v988_v6 }
 0x347   :  { %1266 = vrot.lane.b32.xlu0 %v9134_v48, %s8876_s5  ;;  %v7937_v7 = vpop.f32.mrf.mxu0 }
 0x348   :  { %v9194_v15 = vsel %vm9175_vm9, %v992_v11, -1e+30 }
 0x349   :  { %v994_v16 = vsel %vm416_vm8, %v9194_v15, -inf }
 0x34b   :  { %669 = vrot.lane.b32.xlu0 %v9116_v47, %s8882_s8 }
 0x34c   :  { %v1171_v8 = vpop.f32.mrf.mxu0 }
 0x34d   :  { %v1175_v14 = vmul.f32 0.35355338, %v1171_v8 }
 0x34e   :  { %v7947_v9 = vpop.f32.mrf.mxu0 }
 0x34f   :  { %v9200_v17 = vsel %vm9175_vm9, %v1175_v14, -1e+30 }
 0x350   :  { %v1177_v18 = vsel %vm416_vm8, %v9200_v17, -inf }
 0x36a   :  { %828 = vmax.xlane.f32.xlu0 %v827_v13 }
 0x36e   :  { %995 = vmax.xlane.f32.xlu0 %v994_v16 }
 0x372   :  { %1178 = vmax.xlane.f32.xlu0 %v1177_v18 }
 0x3ba   :  { %v495_v21 = vpop.xlane.xlu0 %494 }
 0x3bb   :  { %v496_v22 = vsub.f32 %v492_v2, %v495_v21 }
 0x3bd   :  { %v497_v24 = vmul.f32 1.442695, %v496_v22 }
 0x3be   :  { %v1267_v25 = vpop.permute.xlu0 %1266 }
 0x3bf   :  { %8441 = vpow2.f32 %v497_v24  ;;  %7954 = vmatpush3.xpose.msk.msra.mxu0 %vm416_vm8, %v1267_v25 }
 0x3c0   :  { %7963 = vmatprep.subr.mxu0 %v8872_v1 }
 0x3c2   :  { %7956 = vmatmul.mubr.msk.f32.vlgmr.msra.gmra.mxu0 %vm416_vm8, %v1265_v19  ;;  %v670_v29 = vpop.permute.xlu0 %669 }
 0x3c3   :  { %7964 = vmatpush3.xpose.msk.msra.mxu0 %vm416_vm8, %v1434_v20  ;;  %7965 = vmatprep.mubr.msk.f32.mxu0 %vm8873_vm7, %v8872_v1 }
 0x3c4   :  { %7973 = vmatprep.subr.mxu0 %v8872_v1 }
 0x3c6   :  { %7966 = vmatmul.mubr.msk.f32.vlgmr.msra.gmra.mxu0 %vm416_vm8, %v1432_v23 }
 0x3c7   :  { %7974 = vmatpush3.xpose.msk.msra.mxu0 %vm416_vm8, %v1601_v26  ;;  %7975 = vmatprep.mubr.msk.f32.mxu0 %vm8873_vm7, %v8872_v1 }
 0x3ca   :  { %7976 = vmatmul.mubr.msk.f32.vlgmr.msra.gmra.mxu0 %vm416_vm8, %v1599_v27 }
 0x3cc   :  { %v9216_v28 = vpop.eup %8441 }
 0x3cd   :  { %7911 = vmatmul.mubr.msk.f32.vlgmr.msra.gmra.mxu1 %vm416_vm8, %v9216_v28 }
 0x3ce   :  { %7914 = vmatpush3.xpose.msk.msra.mxu1 %vm416_vm8, %v9155_v51  ;;  %7915 = vmatprep.mubr.msk.f32.mxu1 %vm8873_vm7, %v8872_v1 }
 0x3cf   :  { %7918 = vmatprep.subr.mxu1 %v8872_v1 }
 0x3d1   :  { %7916 = vmatmul.mubr.msk.f32.vlgmr.msra.gmra.mxu1 %vm416_vm8, %v9157_v52 }
 0x3d2   :  { %7919 = vmatpush3.msra.mxu1 %v670_v29  ;;  %7920 = vmatprep.mubr.msk.f32.mxu1 %vm8873_vm7, %v8872_v1 }
 0x3d3   :  { %7928 = vmatprep.subr.mxu1 %v8872_v1 }
 0x3f3   :  { %v829_v56 = vpop.xlane.xlu0 %828 }
 0x3f4   :  { %v830_v57 = vsub.f32 %v9188_v12, %v829_v56 }
 0x3f6   :  { %v831_v58 = vmul.f32 1.442695, %v830_v57 }
 0x3f7   :  { %v996_v61 = vpop.xlane.xlu0 %995 }
 0x3f8   :  { %8443 = vpow2.f32 %v831_v58  ;;  %v997_v63 = vsub.f32 %v9194_v15, %v996_v61 }
 0x3fa   :  { %v998_v3 = vmul.f32 1.442695, %v997_v63 }
 0x405   :  { %v8444_v59 = vpop.eup %8443 }
 0x406   :  { %v833_v60 = vsel %vm416_vm8, %v8444_v59, 0.0 }
 0x482   :  { %v1338_v30 = vpop.f32.mrf.mxu0 }
 0x483   :  { %v1342_v31 = vmul.f32 0.35355338, %v1338_v30 }
 0x484   :  { %v7957_v32 = vpop.f32.mrf.mxu0 }
 0x485   :  { %v1343_v33 = vsel %vm9175_vm9, %v1342_v31, -1e+30  ;;  %v499_v31 = vsel %vm416_vm8, %v9216_v28, 0.0 }
 0x486   :  { %v1505_v34 = vpop.f32.mrf.mxu0  ;;  %v1344_v35 = vsel %vm416_vm8, %v1343_v33, -inf }
 0x487   :  { %v1509_v36 = vmul.f32 0.35355338, %v1505_v34  ;;  %1345 = vmax.xlane.f32.xlu1 %v1344_v35 }
 0x488   :  { %v7967_v37 = vpop.f32.mrf.mxu0 }
 0x489   :  { %v1510_v38 = vsel %vm9175_vm9, %v1509_v36, -1e+30 }
 0x48a   :  { %v1672_v39 = vpop.f32.mrf.mxu0  ;;  %v1511_v40 = vsel %vm416_vm8, %v1510_v38, -inf }
 0x48b   :  { %v1676_v42 = vmul.f32 0.35355338, %v1672_v39  ;;  %1512 = vmax.xlane.f32.xlu0 %v1511_v40 }
 0x48c   :  { %v7977_v44 = vpop.f32.mrf.mxu0 }
 0x48d   :  { %v9236_v45 = vpop.f32.mrf.mxu1  ;;  %v1677_v46 = vsel %vm9175_vm9, %v1676_v42, -1e+30 }
 0x48e   :  { %v1678_v49 = vsel %vm416_vm8, %v1677_v46, -inf }
 0x48f   :  { %v7912_v50 = vpop.f32.mrf.mxu1  ;;  %1679 = vmax.xlane.f32.xlu1 %v1678_v49 }
 0x491   :  { %v654_v51 = vpop.f32.mrf.mxu1 }
 0x492   :  { %v658_v52 = vmul.f32 0.35355338, %v654_v51 }
 0x493   :  { %v7917_v53 = vpop.f32.mrf.mxu1 }
 0x494   :  { %v659_v54 = vsel %vm9175_vm9, %v658_v52, -1e+30  ;;  %v1783_v52 = vld [vmem:[%s10031_s24 + $0x18] sm:$0xff]  ;;  %v1782_v53 = vld [vmem:[%s10031_s24 + $0x10] sm:$0xff] }
 0x495   :  { %v660_v55 = vsel %vm416_vm8, %v659_v54, -inf  ;;  %7983 = vmatprep.subr.mxu0 %v1783_v52 }
 0x496   :  { %661 = vmax.xlane.f32.xlu1 %v660_v55  ;;  %7984 = vmatpush3.msra.mxu0 %v1783_v52 }
 0x497   :  { %7985 = vmatprep.subr.mxu0 %v1782_v53 }
 0x498   :  { %7986 = vmatpush3.msra.mxu0 %v1782_v53 }
 0x4a1   :  { %1353 = vrot.lane.b32.xlu0 %v9134_v48, %s8882_s8 }
 0x4a5   :  { %1687 = vrot.lane.b32.xlu0 %v9134_v48, %s8883_s9 }
 0x4a7   :  { %836 = vrot.lane.b32.xlu1 %v9116_v47, %s8884_s0 }
 0x4ab   :  { %1003 = vrot.lane.b32.xlu1 %v9116_v47, %s8883_s9  ;;  %v1179_v47 = vpop.xlane.xlu0 %1178 }
 0x4ac   :  { %v1180_v5 = vsub.f32 %v9200_v17, %v1179_v47 }
 0x4ae   :  { %v1181_v8 = vmul.f32 1.442695, %v1180_v5 }
 0x4af   :  { %1186 = vrot.lane.b32.xlu1 %v9134_v48, %s8875_s18 }
 0x4b3   :  { %1520 = vrot.lane.b32.xlu1 %v9134_v48, %s8884_s0 }
 0x4c4   :  { %834 = vadd.xlane.f32.xlu0 %v833_v60  ;;  %v1780_v60 = vld [vmem:[%s10031_s24] sm:$0xff] }
 0x510   :  { %v1346_v0 = vpop.xlane.xlu1 %1345 }
 0x511   :  { %v1347_v2 = vsub.f32 %v1343_v33, %v1346_v0 }
 0x513   :  { %v1348_v4 = vmul.f32 1.442695, %v1347_v2 }
 0x514   :  { %v1513_v48 = vpop.xlane.xlu0 %1512 }
 0x515   :  { %8445 = vpow2.f32 %v1348_v4  ;;  %v1514_v10 = vsub.f32 %v1510_v38, %v1513_v48 }
 0x516   :  { %8447 = vpow2.f32 %v998_v3 }
 0x517   :  { %v1515_v14 = vmul.f32 1.442695, %v1514_v10 }
 0x518   :  { %v1680_v6 = vpop.xlane.xlu1 %1679  ;;  %v1354_v32 = vpop.permute.xlu0 %1353 }
 0x519   :  { %v1681_v7 = vsub.f32 %v1677_v46, %v1680_v6 }
 0x51b   :  { %v1682_v9 = vmul.f32 1.442695, %v1681_v7 }
 0x51c   :  { %v1688_v28 = vpop.permute.xlu0 %1687 }
 0x51d   :  { %8449 = vpow2.f32 %v1682_v9 }
 0x51e   :  { %8451 = vpow2.f32 %v1181_v8 }
 0x51f   :  { %v662_v11 = vpop.xlane.xlu1 %661 }
 0x520   :  { %v663_v12 = vsub.f32 %v659_v54, %v662_v11 }
 0x522   :  { %v8446_v13 = vpop.eup %8445  ;;  %v664_v15 = vmul.f32 1.442695, %v663_v12 }
 0x523   :  { %v1350_v16 = vsel %vm416_vm8, %v8446_v13, 0.0  ;;  %v8448_v18 = vpop.eup %8447  ;;  %v837_v22 = vpop.permute.xlu1 %836 }
 0x524   :  { %8453 = vpow2.f32 %v664_v15  ;;  %1351 = vadd.xlane.f32.xlu0 %v1350_v16  ;;  %v1000_v17 = vsel %vm416_vm8, %v8448_v18, 0.0 }
 0x525   :  { %8455 = vpow2.f32 %v1515_v14 }
 0x527   :  { %v1004_v27 = vpop.permute.xlu1 %1003 }
 0x528   :  { %1001 = vadd.xlane.f32.xlu0 %v1000_v17 }
 0x52a   :  { %v8450_v19 = vpop.eup %8449 }
 0x52b   :  { %v1684_v20 = vsel %vm416_vm8, %v8450_v19, 0.0  ;;  %v8452_v21 = vpop.eup %8451  ;;  %v1187_v30 = vpop.permute.xlu1 %1186 }
 0x52c   :  { %1685 = vadd.xlane.f32.xlu0 %v1684_v20  ;;  %v1183_v23 = vsel %vm416_vm8, %v8452_v21, 0.0 }
 0x52f   :  { %v1521_v33 = vpop.permute.xlu1 %1520 }
 0x530   :  { %1184 = vadd.xlane.f32.xlu0 %v1183_v23 }
 0x531   :  { %v8454_v24 = vpop.eup %8453 }
 0x532   :  { %7921 = vmatmul.mubr.msk.f32.vlgmr.msra.gmra.mxu1 %vm416_vm8, %v8454_v24  ;;  %v666_v25 = vsel %vm416_vm8, %v8454_v24, 0.0  ;;  %v8456_v26 = vpop.eup %8455 }
 0x533   :  { %7929 = vmatpush3.msra.mxu1 %v837_v22  ;;  %667 = vadd.xlane.f32.xlu1 %v666_v25  ;;  %v1517_v29 = vsel %vm416_vm8, %v8456_v26, 0.0 }
 0x534   :  { %7930 = vmatprep.mubr.msk.f32.mxu1 %vm8873_vm7, %v8872_v1  ;;  %7938 = vmatprep.subr.mxu1 %v8872_v1 }
 0x536   :  { %7931 = vmatmul.mubr.msk.f32.vlgmr.msra.gmra.mxu1 %vm416_vm8, %v8444_v59  ;;  %v1781_v59 = vld [vmem:[%s10031_s24 + $0x8] sm:$0xff] }
 0x537   :  { %7939 = vmatpush3.msra.mxu1 %v1004_v27  ;;  %1518 = vadd.xlane.f32.xlu1 %v1517_v29  ;;  %v7517_v29 = vld [vmem:[%s10032_s30] ss:$0 sm:$0xff] }
 0x538   :  { %7940 = vmatprep.mubr.msk.f32.mxu1 %vm8873_vm7, %v8872_v1  ;;  %7948 = vmatprep.subr.mxu1 %v8872_v1 }
 0x539   :  { %7987 = vmatprep.subr.mxu0 %v1781_v59 }
 0x53a   :  { %7941 = vmatmul.mubr.msk.f32.vlgmr.msra.gmra.mxu1 %vm416_vm8, %v8448_v18  ;;  %7988 = vmatpush3.msra.mxu0 %v1781_v59 }
 0x53b   :  { %7949 = vmatpush3.msra.mxu1 %v1187_v30  ;;  %500 = vadd.xlane.f32.xlu1 %v499_v31 }
 0x53c   :  { %7950 = vmatprep.mubr.msk.f32.mxu1 %vm8873_vm7, %v8872_v1  ;;  %7958 = vmatprep.subr.mxu1 %v8872_v1 }
 0x53d   :  { %7989 = vmatprep.subr.mxu0 %v1780_v60 }
 0x53e   :  { %7951 = vmatmul.mubr.msk.f32.vlgmr.msra.gmra.mxu1 %vm416_vm8, %v8452_v21  ;;  %7990 = vmatpush3.msra.mxu0 %v1780_v60 }
 0x53f   :  { %7959 = vmatpush3.msra.mxu1 %v1354_v32  ;;  %7960 = vmatprep.mubr.msk.f32.mxu1 %vm8873_vm7, %v8872_v1 }
 0x540   :  { %7968 = vmatprep.subr.mxu1 %v8872_v1 }
 0x542   :  { %7961 = vmatmul.mubr.msk.f32.vlgmr.msra.gmra.mxu1 %vm416_vm8, %v8446_v13 }
 0x543   :  { %7969 = vmatpush3.msra.mxu1 %v1521_v33  ;;  %7970 = vmatprep.mubr.msk.f32.mxu1 %vm8873_vm7, %v8872_v1 }
 0x544   :  { %7978 = vmatprep.subr.mxu1 %v8872_v1 }
 0x546   :  { %7971 = vmatmul.mubr.msk.f32.vlgmr.msra.gmra.mxu1 %vm416_vm8, %v8456_v26 }
 0x547   :  { %7979 = vmatpush3.msra.mxu1 %v1688_v28  ;;  %7980 = vmatprep.mubr.msk.f32.mxu1 %vm8873_vm7, %v8872_v1 }
 0x54a   :  { %7981 = vmatmul.mubr.msk.f32.vlgmr.msra.gmra.mxu1 %vm416_vm8, %v8450_v19 }
 0x54d   :  { %v835_v34 = vpop.xlane.xlu0 %834 }
 0x5ad   :  { %v1352_v36 = vpop.xlane.xlu0 %1351 }
 0x5b1   :  { %v1002_v37 = vpop.xlane.xlu0 %1001 }
 0x5b5   :  { %v1686_v55 = vpop.xlane.xlu0 %1685 }
 0x5b9   :  { %v1185_v12 = vpop.xlane.xlu0 %1184 }
 0x5bc   :  { %v668_v35 = vpop.xlane.xlu1 %667 }
 0x5bd   :  { %8457 = vrcp.f32 %v668_v35 }
 0x5be   :  { %8459 = vrcp.f32 %v835_v34 }
 0x5bf   :  { %8461 = vrcp.f32 %v1002_v37  ;;  %v1922_v37 = vld [vmem:[%s10033_s26 + $0x18] sm:$0xff] }
 0x5c0   :  { %8463 = vrcp.f32 %v1352_v36  ;;  %v1519_v46 = vpop.xlane.xlu1 %1518  ;;  %7994 = vmatprep.subr.mxu1 %v1922_v37 }
 0x5c1   :  { %8465 = vrcp.f32 %v1519_v46  ;;  %7995 = vmatpush3.msra.mxu1 %v1922_v37 }
 0x5c2   :  { %8467 = vrcp.f32 %v1686_v55 }
 0x5c4   :  { %v501_v11 = vpop.xlane.xlu1 %500 }
 0x5c5   :  { %8469 = vrcp.f32 %v501_v11 }
 0x5c6   :  { %8471 = vrcp.f32 %v1185_v12 }
 0x5ca   :  { %v8458_v38 = vpop.eup %8457 }
 0x5cb   :  { %v8460_v44 = vpop.eup %8459 }
 0x5cc   :  { %v8462_v54 = vpop.eup %8461 }
 0x5cd   :  { %v8464_v0 = vpop.eup %8463 }
 0x5ce   :  { %v8466_v47 = vpop.eup %8465 }
 0x5cf   :  { %v8468_v8 = vpop.eup %8467 }
 0x5d2   :  { %v8470_v13 = vpop.eup %8469 }
 0x5d3   :  { %v579_v15 = vmul.f32 %v8470_v13, %v9236_v45  ;;  %v8472_v22 = vpop.eup %8471 }
 0x5f2   :  { %v741_v39 = vpop.f32.mrf.mxu1 }
 0x5f3   :  { %v746_v40 = vmul.f32 %v8458_v38, %v741_v39  ;;  %v1920_v38 = vld [vmem:[%s10033_s26 + $0x8] sm:$0xff]  ;;  %v1921_v39 = vld [vmem:[%s10033_s26 + $0x10] sm:$0xff] }
 0x5f4   :  { %v7922_v42 = vpop.f32.mrf.mxu1  ;;  %7996 = vmatprep.subr.mxu1 %v1921_v39 }
 0x5f5   :  { %1082 = vrot.lane.b32.xlu1 %v746_v40, %s8863_s6  ;;  %7997 = vmatpush3.msra.mxu1 %v1921_v39  ;;  %v1919_v40 = vld [vmem:[%s10033_s26] sm:$0xff] }
 0x5f6   :  { %v908_v49 = vpop.f32.mrf.mxu1  ;;  %7998 = vmatprep.subr.mxu1 %v1920_v38 }
 0x5f7   :  { %v913_v50 = vmul.f32 %v8460_v44, %v908_v49  ;;  %7999 = vmatpush3.msra.mxu1 %v1920_v38 }
 0x5f8   :  { %v7932_v51 = vpop.f32.mrf.mxu1  ;;  %8000 = vmatprep.subr.mxu1 %v1919_v40 }
 0x5f9   :  { %1086 = vrot.lane.b32.xlu0 %v913_v50, %s8856_s25  ;;  %8001 = vmatpush3.msra.mxu1 %v1919_v40 }
 0x5fa   :  { %v1075_v56 = vpop.f32.mrf.mxu1  ;;  %8016 = vmatprep.subr.mxu1 %v8872_v1 }
 0x5fb   :  { %v1080_v57 = vmul.f32 %v8462_v54, %v1075_v56 }
 0x5fc   :  { %v7942_v58 = vpop.f32.mrf.mxu1 }
 0x5fd   :  { %1090 = vrot.lane.b32.xlu1 %v1080_v57, %s10014_s27  ;;  %v7522_v57 = vld [vmem:[#allocation4] ss:$0 sm:$0xff] }
 0x5fe   :  { %v1258_v61 = vpop.f32.mrf.mxu1 }
 0x5ff   :  { %v1263_v23 = vmul.f32 %v8472_v22, %v1258_v61 }
 0x600   :  { %v7952_v63 = vpop.f32.mrf.mxu1 }
 0x602   :  { %v1425_v2 = vpop.f32.mrf.mxu1 }
 0x603   :  { %v1430_v3 = vmul.f32 %v8464_v0, %v1425_v2 }
 0x604   :  { %v7962_v4 = vpop.f32.mrf.mxu1 }
 0x605   :  { %1766 = vrot.lane.b32.xlu1 %v1430_v3, %s8863_s6 }
 0x606   :  { %v1592_v5 = vpop.f32.mrf.mxu1 }
 0x607   :  { %v1597_v6 = vmul.f32 %v8466_v47, %v1592_v5 }
 0x608   :  { %v7972_v7 = vpop.f32.mrf.mxu1 }
 0x609   :  { %1770 = vrot.lane.b32.xlu1 %v1597_v6, %s8856_s25  ;;  %v7520_v6 = vld [vmem:[#allocation9] ss:$0 sm:$0xff] }
 0x60a   :  { %v1759_v48 = vpop.f32.mrf.mxu1 }
 0x60b   :  { %v1764_v9 = vmul.f32 %v8468_v8, %v1759_v48 }
 0x60c   :  { %v7982_v10 = vpop.f32.mrf.mxu1 }
 0x60d   :  { %1774 = vrot.lane.b32.xlu0 %v1764_v9, %s10014_s27  ;;  %v7521_v9 = vld [vmem:[#allocation10] ss:$0 sm:$0xff] }
 0x667   :  { %v1083_v14 = vpop.permute.xlu1 %1082 }
 0x668   :  { %v1093_v18 = vsel %vm416_vm8, %v579_v15, %v1083_v14 }
 0x66b   :  { %v1087_v16 = vpop.permute.xlu0 %1086 }
 0x66c   :  { %v1095_v17 = vsel %vm1094_vm10, %v1093_v18, %v1087_v16 }
 0x66f   :  { %v1091_v19 = vpop.permute.xlu1 %1090 }
 0x670   :  { %v1097_v20 = vsel %vm1096_vm11, %v1095_v17, %v1091_v19 }
 0x671   :  { %7991 = vmatprep.mubr.msk.f32.mxu0 %vm331_vm6, %v1097_v20 }
 0x677   :  { %v1767_v21 = vpop.permute.xlu1 %1766 }
 0x678   :  { %v1777_v25 = vsel %vm416_vm8, %v1263_v23, %v1767_v21 }
 0x67b   :  { %v1771_v24 = vpop.permute.xlu1 %1770 }
 0x67c   :  { %v1778_v45 = vsel %vm1094_vm10, %v1777_v25, %v1771_v24 }
 0x67f   :  { %v1775_v26 = vpop.permute.xlu0 %1774 }
 0x680   :  { %v1779_v27 = vsel %vm1096_vm11, %v1778_v45, %v1775_v26 }
 0x681   :  { %7992 = vmatmul.mubr.msk.f32.vlgmr.msra.gmra.mxu0 %vm331_vm6, %v1779_v27 }
 0x682   :  { %8013 = vmatprep.mubr.msk.f32.mxu0 %vm331_vm6, %v9101_v41 }
 0x741   :  { %v7993_v30 = vpop.f32.mrf.mxu0 }
 0x742   :  { %v1869_v31 = vadd.f32 %v7993_v30, %v7517_v29 }
 0x743   :  { %v1863_v32 = vpop.f32.mrf.mxu0 }
 0x744   :  { %v1864_v33 = vadd.f32 %v7517_v29, %v1863_v32  ;;  %v1873_v28 = vadd.f32 %v1869_v31, %v9105_v43 }
 0x746   :  { %v1879_v34 = vsel %vm331_vm6, %v1873_v28, 0.0  ;;  %v1872_v35 = vadd.f32 %v1864_v33, %v9101_v41 }
 0x747   :  { %1880 = vadd.xlane.f32.xlu0 %v1879_v34 }
 0x748   :  { %v1876_v36 = vsel %vm331_vm6, %v1872_v35, 0.0 }
 0x749   :  { %1877 = vadd.xlane.f32.xlu1 %v1876_v36 }
 0x75a   :  { %2021 = vrot.lane.b32.xlu1 %v1922_v37, %s8874_s7 }
 0x75e   :  { %2017 = vrot.lane.b32.xlu1 %v1920_v38, %s8874_s7 }
 0x762   :  { %2015 = vrot.lane.b32.xlu1 %v1919_v40, %s8874_s7 }
 0x766   :  { %2027 = vrot.lane.b32.xlu1 %v7522_v57, %s8874_s7 }
 0x7d0   :  { %v1881_v42 = vpop.xlane.xlu0 %1880 }
 0x7d1   :  { %v1884_v44 = vmul.f32 0.03125, %v1881_v42 }
 0x7d2   :  { %v1878_v46 = vpop.xlane.xlu1 %1877 }
 0x7d3   :  { %v1886_v49 = vsub.f32 %v1873_v28, %v1884_v44  ;;  %v1883_v50 = vmul.f32 0.03125, %v1878_v46 }
 0x7d5   :  { %v1885_v51 = vsub.f32 %v1872_v35, %v1883_v50  ;;  %v1888_v52 = vmul.f32 %v1886_v49, %v1886_v49 }
 0x7d6   :  { %v2022_v56 = vpop.permute.xlu1 %2021 }
 0x7d7   :  { %v1892_v53 = vsel %vm331_vm6, %v1888_v52, 0.0  ;;  %v1887_v54 = vmul.f32 %v1885_v51, %v1885_v51  ;;  %8005 = vmatprep.subr.mxu0 %v2022_v56 }
 0x7d8   :  { %1893 = vadd.xlane.f32.xlu0 %v1892_v53  ;;  %8006 = vmatpush3.msra.mxu0 %v2022_v56 }
 0x7d9   :  { %v1889_v55 = vsel %vm331_vm6, %v1887_v54, 0.0 }
 0x7da   :  { %v2018_v63 = vpop.permute.xlu1 %2017 }
 0x7dc   :  { %1890 = vadd.xlane.f32.xlu0 %v1889_v55 }
 0x7de   :  { %v2016_v4 = vpop.permute.xlu1 %2015 }
 0x7e2   :  { %v2028_v14 = vpop.permute.xlu1 %2027 }
 0x7f2   :  { %2019 = vrot.lane.b32.xlu0 %v1921_v39, %s8874_s7 }
 0x861   :  { %v1894_v58 = vpop.xlane.xlu0 %1893 }
 0x862   :  { %v1896_v59 = vmul.f32 0.03125, %v1894_v58 }
 0x864   :  { %v1898_v60 = vadd.f32 1e-05, %v1896_v59 }
 0x865   :  { %v1891_v61 = vpop.xlane.xlu0 %1890 }
 0x866   :  { %8473 = vrsqrt.f32 %v1898_v60  ;;  %v1895_v0 = vmul.f32 0.03125, %v1891_v61 }
 0x868   :  { %v1897_v2 = vadd.f32 1e-05, %v1895_v0 }
 0x869   :  { %v2020_v3 = vpop.permute.xlu0 %2019 }
 0x86a   :  { %8475 = vrsqrt.f32 %v1897_v2  ;;  %8007 = vmatprep.subr.mxu0 %v2020_v3 }
 0x86b   :  { %8008 = vmatpush3.msra.mxu0 %v2020_v3 }
 0x86c   :  { %8009 = vmatprep.subr.mxu0 %v2018_v63 }
 0x86d   :  { %8010 = vmatpush3.msra.mxu0 %v2018_v63 }
 0x86e   :  { %8011 = vmatprep.subr.mxu0 %v2016_v4 }
 0x86f   :  { %8012 = vmatpush3.msra.mxu0 %v2016_v4 }
 0x870   :  { %8014 = vmatmul.mubr.msk.f32.vlgmr.msra.gmra.mxu0 %vm331_vm6, %v9105_v43  ;;  %8026 = vmatprep.subr.mxu0 %v8872_v1 }
 0x871   :  { %8028 = vmatprep.mubr.msk.f32.mxu0 %vm8873_vm7, %v8872_v1 }
 0x873   :  { %v8474_v47 = vpop.eup %8473 }
 0x874   :  { %v1902_v5 = vmul.f32 %v8474_v47, %v1886_v49 }
 0x876   :  { %v1910_v48 = vmul.f32 %v7520_v6, %v1902_v5 }
 0x877   :  { %v8476_v7 = vpop.eup %8475 }
 0x878   :  { %v1901_v8 = vmul.f32 %v8476_v7, %v1885_v51  ;;  %v9355_v12 = vadd.f32 %v7521_v9, %v1910_v48 }
 0x87a   :  { %v1909_v10 = vmul.f32 %v7520_v6, %v1901_v8 }
 0x87c   :  { %v9353_v11 = vadd.f32 %v7521_v9, %v1909_v10 }
 0x87e   :  { %8002 = vmatprep.mubr.msk.f32.mxu1 %vm331_vm6, %v9353_v11 }
 0x87f   :  { %8003 = vmatmul.mubr.msk.f32.vlgmr.msra.gmra.mxu1 %vm331_vm6, %v9355_v12 }
 0x880   :  { %8018 = vmatprep.mubr.msk.f32.mxu1 %vm8873_vm7, %v8872_v1 }
 0x930   :  { %v8015_v13 = vpop.f32.mrf.mxu0 }
 0x931   :  { %v9368_v18 = vadd.f32 %v8015_v13, %v2028_v14 }
 0x932   :  { %v2096_v15 = vpop.f32.mrf.mxu0 }
 0x933   :  { %v2097_v16 = vadd.f32 %v2096_v15, %v2028_v14 }
 0x935   :  { %2271 = vrot.lane.b32.xlu0 %v2097_v16, %s8877_s29  ;;  %8017 = vmatpush3.xpose.msk.msra.mxu1 %vm416_vm8, %v2097_v16 }
 0x936   :  { %8021 = vmatprep.subr.mxu1 %v8872_v1 }
 0x939   :  { %2437 = vrot.lane.b32.xlu0 %v2097_v16, %s8879_s22 }
 0x93d   :  { %2603 = vrot.lane.b32.xlu0 %v2097_v16, %s8881_s3 }
 0x93f   :  { %v8004_v17 = vpop.f32.mrf.mxu1 }
 0x940   :  { %v2008_v21 = vadd.f32 %v8004_v17, %v7522_v57 }
 0x941   :  { %v2002_v19 = vpop.f32.mrf.mxu1  ;;  %2948 = vrot.lane.b32.xlu0 %v9368_v18, %s8877_s29 }
 0x942   :  { %v2003_v20 = vadd.f32 %v7522_v57, %v2002_v19 }
 0x944   :  { %2269 = vrot.lane.b32.xlu1 %v2003_v20, %s8877_s29  ;;  %8019 = vmatmul.mubr.msk.f32.vlgmr.msra.gmra.mxu1 %vm416_vm8, %v2003_v20 }
 0x945   :  { %3114 = vrot.lane.b32.xlu0 %v9368_v18, %s8879_s22  ;;  %8023 = vmatprep.mubr.msk.f32.mxu1 %vm8873_vm7, %v8872_v1 }
 0x948   :  { %2435 = vrot.lane.b32.xlu1 %v2003_v20, %s8879_s22 }
 0x949   :  { %3280 = vrot.lane.b32.xlu0 %v9368_v18, %s8881_s3 }
 0x94c   :  { %2601 = vrot.lane.b32.xlu1 %v2003_v20, %s8881_s3 }
 0x94d   :  { %2191 = vrot.lane.b32.xlu0 %v2097_v16, %s8874_s7 }
 0x950   :  { %2946 = vrot.lane.b32.xlu1 %v2008_v21, %s8877_s29 }
 0x954   :  { %3112 = vrot.lane.b32.xlu1 %v2008_v21, %s8879_s22 }
 0x958   :  { %3278 = vrot.lane.b32.xlu1 %v2008_v21, %s8881_s3 }
 0x95c   :  { %2357 = vrot.lane.b32.xlu1 %v2097_v16, %s8876_s5 }
 0x960   :  { %2523 = vrot.lane.b32.xlu1 %v2097_v16, %s8878_s21 }
 0x964   :  { %2689 = vrot.lane.b32.xlu1 %v2097_v16, %s8880_s2 }
 0x9a7   :  { %v2272_v22 = vpop.permute.xlu0 %2271 }
 0x9a8   :  { %8027 = vmatpush3.xpose.msk.msra.mxu0 %vm416_vm8, %v2272_v22 }
 0x9a9   :  { %8036 = vmatprep.subr.mxu0 %v8872_v1 }
 0x9ab   :  { %v2438_v23 = vpop.permute.xlu0 %2437 }
 0x9af   :  { %v2604_v24 = vpop.permute.xlu0 %2603 }
 0x9b3   :  { %v2949_v25 = vpop.permute.xlu0 %2948 }
 0x9b6   :  { %v2270_v45 = vpop.permute.xlu1 %2269 }
 0x9b7   :  { %v3115_v26 = vpop.permute.xlu0 %3114  ;;  %8029 = vmatmul.mubr.msk.f32.vlgmr.msra.gmra.mxu0 %vm416_vm8, %v2270_v45 }
 0x9b8   :  { %8037 = vmatpush3.xpose.msk.msra.mxu0 %vm416_vm8, %v2438_v23  ;;  %8038 = vmatprep.mubr.msk.f32.mxu0 %vm8873_vm7, %v8872_v1 }
 0x9b9   :  { %8046 = vmatprep.subr.mxu0 %v8872_v1 }
 0x9ba   :  { %v2436_v27 = vpop.permute.xlu1 %2435 }
 0x9bb   :  { %v3281_v29 = vpop.permute.xlu0 %3280  ;;  %8039 = vmatmul.mubr.msk.f32.vlgmr.msra.gmra.mxu0 %vm416_vm8, %v2436_v27 }
 0x9bc   :  { %8047 = vmatpush3.xpose.msk.msra.mxu0 %vm416_vm8, %v2604_v24  ;;  %8048 = vmatprep.mubr.msk.f32.mxu0 %vm8873_vm7, %v8872_v1 }
 0x9bd   :  { %8056 = vmatprep.subr.mxu0 %v8872_v1 }
 0x9be   :  { %v2602_v30 = vpop.permute.xlu1 %2601 }
 0x9bf   :  { %v2192_v31 = vpop.permute.xlu0 %2191  ;;  %8049 = vmatmul.mubr.msk.f32.vlgmr.msra.gmra.mxu0 %vm416_vm8, %v2602_v30 }
 0x9c0   :  { %8057 = vmatpush3.xpose.msk.msra.mxu0 %vm416_vm8, %v9368_v18  ;;  %8022 = vmatpush3.msra.mxu1 %v2192_v31 }
 0x9c1   :  { %8058 = vmatprep.mubr.msk.f32.mxu0 %vm8873_vm7, %v8872_v1  ;;  %8066 = vmatprep.subr.mxu0 %v8872_v1 }
 0x9c2   :  { %v2947_v32 = vpop.permute.xlu1 %2946  ;;  %8031 = vmatprep.subr.mxu1 %v8872_v1 }
 0x9c3   :  { %8059 = vmatmul.mubr.msk.f32.vlgmr.msra.gmra.mxu0 %vm416_vm8, %v2008_v21 }
 0x9c4   :  { %8067 = vmatpush3.xpose.msk.msra.mxu0 %vm416_vm8, %v2949_v25  ;;  %8068 = vmatprep.mubr.msk.f32.mxu0 %vm8873_vm7, %v8872_v1 }
 0x9c5   :  { %8076 = vmatprep.subr.mxu0 %v8872_v1 }
 0x9c6   :  { %v3113_v33 = vpop.permute.xlu1 %3112 }
 0x9c7   :  { %8069 = vmatmul.mubr.msk.f32.vlgmr.msra.gmra.mxu0 %vm416_vm8, %v2947_v32 }
 0x9c8   :  { %8077 = vmatpush3.xpose.msk.msra.mxu0 %vm416_vm8, %v3115_v26  ;;  %8078 = vmatprep.mubr.msk.f32.mxu0 %vm8873_vm7, %v8872_v1 }
 0x9c9   :  { %8086 = vmatprep.subr.mxu0 %v8872_v1 }
 0x9ca   :  { %v3279_v28 = vpop.permute.xlu1 %3278 }
 0x9cb   :  { %8079 = vmatmul.mubr.msk.f32.vlgmr.msra.gmra.mxu0 %vm416_vm8, %v3113_v33 }
 0x9cc   :  { %8087 = vmatpush3.xpose.msk.msra.mxu0 %vm416_vm8, %v3281_v29  ;;  %8088 = vmatprep.mubr.msk.f32.mxu0 %vm8873_vm7, %v8872_v1 }
 0x9ce   :  { %v2358_v6 = vpop.permute.xlu1 %2357 }
 0x9cf   :  { %8089 = vmatmul.mubr.msk.f32.vlgmr.msra.gmra.mxu0 %vm416_vm8, %v3279_v28 }
 0x9d2   :  { %v2524_v14 = vpop.permute.xlu1 %2523 }
 0x9d6   :  { %v2690_v15 = vpop.permute.xlu1 %2689 }
 0xa04   :  { %v2177_v34 = vpop.f32.mrf.mxu1 }
 0xa05   :  { %v2181_v35 = vmul.f32 0.35355338, %v2177_v34 }
 0xa06   :  { %v8020_v36 = vpop.f32.mrf.mxu1 }
 0xa07   :  { %v2182_v37 = vsel %vm416_vm8, %v2181_v35, -inf }
 0xa08   :  { %2183 = vmax.xlane.f32.xlu0 %v2182_v37 }
 0xa77   :  { %v2343_v38 = vpop.f32.mrf.mxu0 }
 0xa78   :  { %v2347_v39 = vmul.f32 0.35355338, %v2343_v38 }
 0xa79   :  { %v8030_v40 = vpop.f32.mrf.mxu0 }
 0xa7a   :  { %v2348_v42 = vsel %vm416_vm8, %v2347_v39, -inf }
 0xa7b   :  { %2349 = vmax.xlane.f32.xlu1 %v2348_v42  ;;  %v2509_v44 = vpop.f32.mrf.mxu0 }
 0xa7c   :  { %v2513_v46 = vmul.f32 0.35355338, %v2509_v44 }
 0xa7d   :  { %v8040_v49 = vpop.f32.mrf.mxu0 }
 0xa7e   :  { %v2514_v50 = vsel %vm416_vm8, %v2513_v46, -inf }
 0xa7f   :  { %2515 = vmax.xlane.f32.xlu0 %v2514_v50  ;;  %v2675_v51 = vpop.f32.mrf.mxu0 }
 0xa80   :  { %v2679_v52 = vmul.f32 0.35355338, %v2675_v51 }
 0xa81   :  { %v8050_v53 = vpop.f32.mrf.mxu0 }
 0xa82   :  { %v2680_v54 = vsel %vm416_vm8, %v2679_v52, -inf }
 0xa83   :  { %2681 = vmax.xlane.f32.xlu0 %v2680_v54  ;;  %v2854_v55 = vpop.f32.mrf.mxu0 }
 0xa84   :  { %v2858_v56 = vmul.f32 0.35355338, %v2854_v55 }
 0xa85   :  { %v8060_v57 = vpop.f32.mrf.mxu0 }
 0xa86   :  { %v2859_v58 = vsel %vm416_vm8, %v2858_v56, -inf }
 0xa87   :  { %2860 = vmax.xlane.f32.xlu0 %v2859_v58  ;;  %v3020_v59 = vpop.f32.mrf.mxu0 }
 0xa88   :  { %v3024_v7 = vmul.f32 0.35355338, %v3020_v59 }
 0xa89   :  { %v8070_v60 = vpop.f32.mrf.mxu0 }
 0xa8a   :  { %v3025_v48 = vsel %vm416_vm8, %v3024_v7, -inf }
 0xa8b   :  { %v3186_v61 = vpop.f32.mrf.mxu0 }
 0xa8c   :  { %3034 = vrot.lane.b32.xlu1 %v9368_v18, %s8876_s5  ;;  %v3190_v10 = vmul.f32 0.35355338, %v3186_v61 }
 0xa8d   :  { %v8080_v63 = vpop.f32.mrf.mxu0 }
 0xa8e   :  { %v3191_v13 = vsel %vm416_vm8, %v3190_v10, -inf }
 0xa8f   :  { %v3352_v0 = vpop.f32.mrf.mxu0 }
 0xa90   :  { %v3356_v8 = vmul.f32 0.35355338, %v3352_v0 }
 0xa91   :  { %v2184_v2 = vpop.xlane.xlu0 %2183  ;;  %v8090_v3 = vpop.f32.mrf.mxu0 }
 0xa92   :  { %v2185_v4 = vsub.f32 %v2181_v35, %v2184_v2  ;;  %v3357_v9 = vsel %vm416_vm8, %v3356_v8, -inf }
 0xa94   :  { %v2186_v47 = vmul.f32 1.442695, %v2185_v4 }
 0xa96   :  { %8477 = vpow2.f32 %v2186_v47 }
 0xa9d   :  { %2868 = vrot.lane.b32.xlu0 %v9368_v18, %s8874_s7 }
 0xaa3   :  { %v9432_v5 = vpop.eup %8477 }
 0xaa4   :  { %8024 = vmatmul.mubr.msk.f32.vlgmr.msra.gmra.mxu1 %vm416_vm8, %v9432_v5  ;;  %v2188_v59 = vsel %vm416_vm8, %v9432_v5, 0.0 }
 0xaa5   :  { %8032 = vmatpush3.msra.mxu1 %v2358_v6  ;;  %8033 = vmatprep.mubr.msk.f32.mxu1 %vm8873_vm7, %v8872_v1 }
 0xaa6   :  { %8041 = vmatprep.subr.mxu1 %v8872_v1 }
 0xab0   :  { %3026 = vmax.xlane.f32.xlu1 %v3025_v48 }
 0xab4   :  { %3358 = vmax.xlane.f32.xlu1 %v3357_v9 }
 0xabc   :  { %3192 = vmax.xlane.f32.xlu0 %v3191_v13 }
 0xac5   :  { %3366 = vrot.lane.b32.xlu1 %v9368_v18, %s8880_s2 }
 0xad2   :  { %3200 = vrot.lane.b32.xlu0 %v9368_v18, %s8878_s21 }
 0xb04   :  { %v2350_v16 = vpop.xlane.xlu1 %2349 }
 0xb05   :  { %v2351_v17 = vsub.f32 %v2347_v39, %v2350_v16 }
 0xb07   :  { %v2352_v19 = vmul.f32 1.442695, %v2351_v17 }
 0xb08   :  { %v2516_v20 = vpop.xlane.xlu0 %2515  ;;  %v3035_v35 = vpop.permute.xlu1 %3034 }
 0xb09   :  { %8479 = vpow2.f32 %v2352_v19  ;;  %v2517_v21 = vsub.f32 %v2513_v46, %v2516_v20  ;;  %v3462_v19 = vld [vmem:[#allocation6 + $0x18] sm:$0xff]  ;;  %v3461_v20 = vld [vmem:[#allocation6 + $0x10] sm:$0xff] }
 0xb0a   :  { %8096 = vmatprep.subr.mxu0 %v3462_v19 }
 0xb0b   :  { %v2518_v22 = vmul.f32 1.442695, %v2517_v21  ;;  %8097 = vmatpush3.msra.mxu0 %v3462_v19 }
 0xb0c   :  { %v2682_v23 = vpop.xlane.xlu0 %2681  ;;  %8098 = vmatprep.subr.mxu0 %v3461_v20 }
 0xb0d   :  { %8481 = vpow2.f32 %v2518_v22  ;;  %v2683_v24 = vsub.f32 %v2679_v52, %v2682_v23  ;;  %8099 = vmatpush3.msra.mxu0 %v3461_v20 }
 0xb0f   :  { %v2684_v25 = vmul.f32 1.442695, %v2683_v24 }
 0xb10   :  { %v2861_v45 = vpop.xlane.xlu0 %2860 }
 0xb11   :  { %8483 = vpow2.f32 %v2684_v25  ;;  %v2862_v26 = vsub.f32 %v2858_v56, %v2861_v45 }
 0xb13   :  { %v2863_v27 = vmul.f32 1.442695, %v2862_v26  ;;  %v3460_v26 = vld [vmem:[#allocation6 + $0x8] sm:$0xff] }
 0xb14   :  { %v2869_v33 = vpop.permute.xlu0 %2868  ;;  %8100 = vmatprep.subr.mxu0 %v3460_v26 }
 0xb15   :  { %8485 = vpow2.f32 %v2863_v27  ;;  %v3459_v27 = vld [vmem:[#allocation6] sm:$0xff]  ;;  %8101 = vmatpush3.msra.mxu0 %v3460_v26 }
 0xb16   :  { %v8480_v29 = vpop.eup %8479  ;;  %8102 = vmatprep.subr.mxu0 %v3459_v27  ;;  %v7555_v26 = vld [vmem:[#allocation12] ss:$0 sm:$0xff] }
 0xb17   :  { %8034 = vmatmul.mubr.msk.f32.vlgmr.msra.gmra.mxu1 %vm416_vm8, %v8480_v29  ;;  %v2354_v18 = vsel %vm416_vm8, %v8480_v29, 0.0  ;;  %8103 = vmatpush3.msra.mxu0 %v3459_v27 }
 0xb18   :  { %8042 = vmatpush3.msra.mxu1 %v2524_v14  ;;  %2355 = vadd.xlane.f32.xlu0 %v2354_v18 }
 0xb19   :  { %8043 = vmatprep.mubr.msk.f32.mxu1 %vm8873_vm7, %v8872_v1  ;;  %8051 = vmatprep.subr.mxu1 %v8872_v1 }
 0xb1a   :  { %v8482_v30 = vpop.eup %8481 }
 0xb1b   :  { %8044 = vmatmul.mubr.msk.f32.vlgmr.msra.gmra.mxu1 %vm416_vm8, %v8482_v30  ;;  %v2520_v31 = vsel %vm416_vm8, %v8482_v30, 0.0 }
 0xb1c   :  { %8052 = vmatpush3.msra.mxu1 %v2690_v15  ;;  %2521 = vadd.xlane.f32.xlu1 %v2520_v31 }
 0xb1d   :  { %8053 = vmatprep.mubr.msk.f32.mxu1 %vm8873_vm7, %v8872_v1  ;;  %8061 = vmatprep.subr.mxu1 %v8872_v1 }
 0xb1e   :  { %v8484_v32 = vpop.eup %8483 }
 0xb1f   :  { %8054 = vmatmul.mubr.msk.f32.vlgmr.msra.gmra.mxu1 %vm416_vm8, %v8484_v32  ;;  %v2686_v28 = vsel %vm416_vm8, %v8484_v32, 0.0 }
 0xb20   :  { %8062 = vmatpush3.msra.mxu1 %v2869_v33  ;;  %2687 = vadd.xlane.f32.xlu0 %v2686_v28 }
 0xb21   :  { %8063 = vmatprep.mubr.msk.f32.mxu1 %vm8873_vm7, %v8872_v1  ;;  %8071 = vmatprep.subr.mxu1 %v8872_v1 }
 0xb22   :  { %v8486_v34 = vpop.eup %8485 }
 0xb23   :  { %8064 = vmatmul.mubr.msk.f32.vlgmr.msra.gmra.mxu1 %vm416_vm8, %v8486_v34  ;;  %v2865_v55 = vsel %vm416_vm8, %v8486_v34, 0.0 }
 0xb24   :  { %8072 = vmatpush3.msra.mxu1 %v3035_v35  ;;  %8073 = vmatprep.mubr.msk.f32.mxu1 %vm8873_vm7, %v8872_v1 }
 0xb25   :  { %8081 = vmatprep.subr.mxu1 %v8872_v1 }
 0xb39   :  { %v3027_v36 = vpop.xlane.xlu1 %3026 }
 0xb3a   :  { %v3028_v37 = vsub.f32 %v3024_v7, %v3027_v36 }
 0xb3c   :  { %v3029_v38 = vmul.f32 1.442695, %v3028_v37 }
 0xb3d   :  { %v3359_v39 = vpop.xlane.xlu1 %3358 }
 0xb3e   :  { %8487 = vpow2.f32 %v3029_v38  ;;  %v3360_v40 = vsub.f32 %v3356_v8, %v3359_v39 }
 0xb40   :  { %v3361_v42 = vmul.f32 1.442695, %v3360_v40 }
 0xb41   :  { %v3367_v57 = vpop.permute.xlu1 %3366 }
 0xb42   :  { %8489 = vpow2.f32 %v3361_v42 }
 0xb45   :  { %v3193_v44 = vpop.xlane.xlu0 %3192 }
 0xb46   :  { %v3194_v46 = vsub.f32 %v3190_v10, %v3193_v44 }
 0xb48   :  { %v3195_v49 = vmul.f32 1.442695, %v3194_v46 }
 0xb49   :  { %v3201_v51 = vpop.permute.xlu0 %3200 }
 0xb4a   :  { %8491 = vpow2.f32 %v3195_v49 }
 0xb4b   :  { %v8488_v50 = vpop.eup %8487 }
 0xb4c   :  { %8074 = vmatmul.mubr.msk.f32.vlgmr.msra.gmra.mxu1 %vm416_vm8, %v8488_v50  ;;  %v3031_v52 = vsel %vm416_vm8, %v8488_v50, 0.0 }
 0xb4d   :  { %8082 = vmatpush3.msra.mxu1 %v3201_v51  ;;  %3032 = vadd.xlane.f32.xlu0 %v3031_v52 }
 0xb4e   :  { %8083 = vmatprep.mubr.msk.f32.mxu1 %vm8873_vm7, %v8872_v1  ;;  %8091 = vmatprep.subr.mxu1 %v8872_v1 }
 0xb4f   :  { %v8490_v53 = vpop.eup %8489 }
 0xb50   :  { %v3363_v54 = vsel %vm416_vm8, %v8490_v53, 0.0 }
 0xb51   :  { %3364 = vadd.xlane.f32.xlu1 %v3363_v54 }
 0xb55   :  { %2866 = vadd.xlane.f32.xlu1 %v2865_v55 }
 0xb57   :  { %v8492_v56 = vpop.eup %8491 }
 0xb58   :  { %8084 = vmatmul.mubr.msk.f32.vlgmr.msra.gmra.mxu1 %vm416_vm8, %v8492_v56  ;;  %v3197_v58 = vsel %vm416_vm8, %v8492_v56, 0.0 }
 0xb59   :  { %8092 = vmatpush3.msra.mxu1 %v3367_v57  ;;  %3198 = vadd.xlane.f32.xlu0 %v3197_v58  ;;  %v7551_v58 = vld [vmem:[#allocation7] ss:$0 sm:$0xff] }
 0xb5a   :  { %8093 = vmatprep.mubr.msk.f32.mxu1 %vm8873_vm7, %v8872_v1 }
 0xb5c   :  { %8094 = vmatmul.mubr.msk.f32.vlgmr.msra.gmra.mxu1 %vm416_vm8, %v8490_v53 }
 0xb5d   :  { %2189 = vadd.xlane.f32.xlu0 %v2188_v59 }
 0xb64   :  { %v9479_v60 = vpop.f32.mrf.mxu1 }
 0xb66   :  { %v8025_v61 = vpop.f32.mrf.mxu1 }
 0xba1   :  { %v2356_v63 = vpop.xlane.xlu0 %2355 }
 0xba2   :  { %8493 = vrcp.f32 %v2356_v63 }
 0xba5   :  { %v2522_v0 = vpop.xlane.xlu1 %2521 }
 0xba6   :  { %8495 = vrcp.f32 %v2522_v0 }
 0xba9   :  { %v2688_v2 = vpop.xlane.xlu0 %2687 }
 0xbaa   :  { %8497 = vrcp.f32 %v2688_v2 }
 0xbaf   :  { %v8494_v3 = vpop.eup %8493 }
 0xbb3   :  { %v8496_v7 = vpop.eup %8495 }
 0xbb7   :  { %v8498_v9 = vpop.eup %8497 }
 0xbd6   :  { %v3033_v17 = vpop.xlane.xlu0 %3032 }
 0xbd7   :  { %v2429_v4 = vpop.f32.mrf.mxu1  ;;  %8499 = vrcp.f32 %v3033_v17 }
 0xbd8   :  { %v2434_v47 = vmul.f32 %v8494_v3, %v2429_v4 }
 0xbd9   :  { %v8035_v6 = vpop.f32.mrf.mxu1 }
 0xbda   :  { %2768 = vrot.lane.b32.xlu0 %v2434_v47, %s8863_s6  ;;  %v3365_v23 = vpop.xlane.xlu1 %3364 }
 0xbdb   :  { %v2595_v8 = vpop.f32.mrf.mxu1 }
 0xbdc   :  { %v2600_v48 = vmul.f32 %v8496_v7, %v2595_v8 }
 0xbdd   :  { %v8045_v5 = vpop.f32.mrf.mxu1 }
 0xbde   :  { %2772 = vrot.lane.b32.xlu1 %v2600_v48, %s8856_s25  ;;  %v2867_v36 = vpop.xlane.xlu1 %2866 }
 0xbdf   :  { %v2761_v10 = vpop.f32.mrf.mxu1 }
 0xbe0   :  { %v2766_v13 = vmul.f32 %v8498_v9, %v2761_v10 }
 0xbe1   :  { %v8055_v14 = vpop.f32.mrf.mxu1 }
 0xbe2   :  { %2776 = vrot.lane.b32.xlu1 %v2766_v13, %s10014_s27  ;;  %v3199_v21 = vpop.xlane.xlu0 %3198  ;;  %v3600_v14 = vld [vmem:[#allocation13 + $0x18] sm:$0xff] }
 0xbe3   :  { %v2940_v15 = vpop.f32.mrf.mxu1  ;;  %8501 = vrcp.f32 %v3199_v21  ;;  %8107 = vmatprep.subr.mxu1 %v3600_v14 }
 0xbe4   :  { %v8500_v22 = vpop.eup %8499  ;;  %8503 = vrcp.f32 %v3365_v23  ;;  %8108 = vmatpush3.msra.mxu1 %v3600_v14 }
 0xbe5   :  { %v8065_v16 = vpop.f32.mrf.mxu1 }
 0xbe6   :  { %v2190_v35 = vpop.xlane.xlu0 %2189  ;;  %v3597_v16 = vld [vmem:[#allocation13] sm:$0xff] }
 0xbe7   :  { %8505 = vrcp.f32 %v2190_v35  ;;  %v3703_v35 = vld [vmem:[%s10003_s19 + $0x20] sm:$0xff] }
 0xbe8   :  { %8507 = vrcp.f32 %v2867_v36  ;;  %v3702_v36 = vld [vmem:[%s10003_s19 + $0x18] sm:$0xff] }
 0xbf0   :  { %v8502_v29 = vpop.eup %8501 }
 0xbf1   :  { %v8504_v32 = vpop.eup %8503 }
 0xbf4   :  { %v8506_v37 = vpop.eup %8505 }
 0xbf5   :  { %v2268_v40 = vmul.f32 %v8506_v37, %v9479_v60  ;;  %v8508_v50 = vpop.eup %8507  ;;  %v3701_v37 = vld [vmem:[%s10003_s19 + $0x10] sm:$0xff] }
 0xbf6   :  { %v2945_v52 = vmul.f32 %v8508_v50, %v2940_v15  ;;  %v3598_v15 = vld [vmem:[#allocation13 + $0x8] sm:$0xff] }
 0xc0c   :  { %v3106_v24 = vpop.f32.mrf.mxu1 }
 0xc0d   :  { %v3111_v25 = vmul.f32 %v8500_v22, %v3106_v24 }
 0xc0e   :  { %v8075_v45 = vpop.f32.mrf.mxu1 }
 0xc0f   :  { %3445 = vrot.lane.b32.xlu1 %v3111_v25, %s8863_s6  ;;  %v7554_v25 = vld [vmem:[%s9997_s13] ss:$0 sm:$0xff] }
 0xc18   :  { %v3272_v18 = vpop.f32.mrf.mxu1 }
 0xc19   :  { %v3277_v30 = vmul.f32 %v8502_v29, %v3272_v18 }
 0xc1a   :  { %v8085_v31 = vpop.f32.mrf.mxu1 }
 0xc1b   :  { %3449 = vrot.lane.b32.xlu0 %v3277_v30, %s8856_s25 }
 0xc1c   :  { %v3438_v33 = vpop.f32.mrf.mxu1 }
 0xc1d   :  { %v3443_v28 = vmul.f32 %v8504_v32, %v3438_v33  ;;  %v3706_v33 = vld [vmem:[%s10003_s19 + $0x38] sm:$0xff] }
 0xc1e   :  { %v8095_v34 = vpop.f32.mrf.mxu1  ;;  %8118 = vmatprep.subr.mxu0 %v3706_v33 }
 0xc1f   :  { %3453 = vrot.lane.b32.xlu1 %v3443_v28, %s10014_s27  ;;  %v3705_v28 = vld [vmem:[%s10003_s19 + $0x30] sm:$0xff]  ;;  %v3704_v34 = vld [vmem:[%s10003_s19 + $0x28] sm:$0xff] }
 0xc4c   :  { %v2769_v38 = vpop.permute.xlu0 %2768 }
 0xc4d   :  { %v2779_v42 = vsel %vm416_vm8, %v2268_v40, %v2769_v38  ;;  %v3700_v38 = vld [vmem:[%s10003_s19 + $0x8] sm:$0xff] }
 0xc4e   :  { %v7556_v40 = vld [vmem:[#allocation15] ss:$0 sm:$0xff] }
 0xc50   :  { %v2773_v39 = vpop.permute.xlu1 %2772 }
 0xc51   :  { %v2780_v44 = vsel %vm1094_vm10, %v2779_v42, %v2773_v39  ;;  %v3699_v39 = vld [vmem:[%s10003_s19] sm:$0xff] }
 0xc54   :  { %v2777_v46 = vpop.permute.xlu1 %2776 }
 0xc55   :  { %v2781_v49 = vsel %vm1096_vm11, %v2780_v44, %v2777_v46 }
 0xc56   :  { %8104 = vmatprep.mubr.msk.f32.mxu0 %vm331_vm6, %v2781_v49 }
 0xc81   :  { %v3446_v51 = vpop.permute.xlu1 %3445 }
 0xc82   :  { %v3456_v54 = vsel %vm416_vm8, %v2945_v52, %v3446_v51 }
 0xc8d   :  { %v3450_v53 = vpop.permute.xlu0 %3449 }
 0xc8e   :  { %v3457_v55 = vsel %vm1094_vm10, %v3456_v54, %v3450_v53 }
 0xc91   :  { %v3454_v56 = vpop.permute.xlu1 %3453 }
 0xc92   :  { %v3458_v57 = vsel %vm1096_vm11, %v3457_v55, %v3454_v56 }
 0xc93   :  { %8105 = vmatmul.mubr.msk.f32.vlgmr.msra.gmra.mxu0 %vm331_vm6, %v3458_v57 }
 0xc94   :  { %8119 = vmatpush3.msra.mxu0 %v3706_v33 }
 0xc95   :  { %8120 = vmatprep.subr.mxu0 %v3705_v28 }
 0xc96   :  { %8121 = vmatpush3.msra.mxu0 %v3705_v28 }
 0xc97   :  { %8122 = vmatprep.subr.mxu0 %v3704_v34 }
 0xc98   :  { %8123 = vmatpush3.msra.mxu0 %v3704_v34 }
 0xc99   :  { %8124 = vmatprep.subr.mxu0 %v3703_v35 }
 0xc9a   :  { %8125 = vmatpush3.msra.mxu0 %v3703_v35  ;;  %v7569_v35 = vld [vmem:[%s10028_s12 + $0x1] ss:$0 sm:$0xff]  ;;  %s10034_s12 = smov 24  }
 0xc9b   :  { %8126 = vmatprep.subr.mxu0 %v3702_v36 }
 0xc9c   :  { %8127 = vmatpush3.msra.mxu0 %v3702_v36 }
 0xc9d   :  { %8128 = vmatprep.subr.mxu0 %v3701_v37 }
 0xc9e   :  { %8129 = vmatpush3.msra.mxu0 %v3701_v37 }
 0xc9f   :  { %8130 = vmatprep.subr.mxu0 %v3700_v38 }
 0xca0   :  { %8131 = vmatpush3.msra.mxu0 %v3700_v38 }
 0xca1   :  { %8132 = vmatprep.subr.mxu0 %v3699_v39 }
 0xca2   :  { %8133 = vmatpush3.msra.mxu0 %v3699_v39 }
 0xca3   :  { %8158 = vmatprep.subr.mxu0 %v8872_v1 }
 0xd53   :  { %v8106_v59 = vpop.f32.mrf.mxu0 }
 0xd54   :  { %v3548_v60 = vadd.f32 %v8106_v59, %v7551_v58 }
 0xd55   :  { %v3542_v61 = vpop.f32.mrf.mxu0 }
 0xd56   :  { %v3552_v63 = vadd.f32 %v3548_v60, %v9355_v12  ;;  %v3543_v0 = vadd.f32 %v7551_v58, %v3542_v61  ;;  %v7559_v60 = vld [vmem:[#allocation16] ss:$0 sm:$0xff] }
 0xd58   :  { %v3558_v2 = vsel %vm331_vm6, %v3552_v63, 0.0  ;;  %v3551_v3 = vadd.f32 %v3543_v0, %v9353_v11  ;;  %v3599_v11 = vld [vmem:[#allocation13 + $0x10] sm:$0xff] }
 0xd59   :  { %3559 = vadd.xlane.f32.xlu1 %v3558_v2  ;;  %8109 = vmatprep.subr.mxu1 %v3599_v11 }
 0xd5a   :  { %v3555_v4 = vsel %vm331_vm6, %v3551_v3, 0.0  ;;  %8110 = vmatpush3.msra.mxu1 %v3599_v11 }
 0xd5b   :  { %3556 = vadd.xlane.f32.xlu0 %v3555_v4  ;;  %8111 = vmatprep.subr.mxu1 %v3598_v15 }
 0xd5c   :  { %8112 = vmatpush3.msra.mxu1 %v3598_v15  ;;  %v7567_v15 = vld [vmem:[%s10026_s17 + $0x38] sm:$0xff] }
 0xd5d   :  { %8113 = vmatprep.subr.mxu1 %v3597_v16 }
 0xd5e   :  { %8114 = vmatpush3.msra.mxu1 %v3597_v16  ;;  %v7566_v16 = vld [vmem:[%s10026_s17 + $0x30] sm:$0xff] }
 0xd5f   :  { %8137 = vmatprep.subr.mxu1 %v7567_v15 }
 0xde2   :  { %v3560_v47 = vpop.xlane.xlu1 %3559 }
 0xde3   :  { %v3562_v6 = vmul.f32 0.03125, %v3560_v47 }
 0xde4   :  { %v3557_v7 = vpop.xlane.xlu0 %3556 }
 0xde5   :  { %v3561_v8 = vmul.f32 0.03125, %v3557_v7  ;;  %v3564_v48 = vsub.f32 %v3552_v63, %v3562_v6 }
 0xde7   :  { %v3563_v5 = vsub.f32 %v3551_v3, %v3561_v8  ;;  %v3566_v13 = vmul.f32 %v3564_v48, %v3564_v48 }
 0xde9   :  { %v3565_v9 = vmul.f32 %v3563_v5, %v3563_v5  ;;  %v3570_v12 = vsel %vm331_vm6, %v3566_v13, 0.0 }
 0xdeb   :  { %v3567_v10 = vsel %vm331_vm6, %v3565_v9, 0.0 }
 0xdec   :  { %3568 = vadd.xlane.f32.xlu0 %v3567_v10 }
 0xdf0   :  { %3571 = vadd.xlane.f32.xlu0 %v3570_v12 }
 0xe75   :  { %v3569_v17 = vpop.xlane.xlu0 %3568 }
 0xe76   :  { %v3573_v19 = vmul.f32 0.03125, %v3569_v17  ;;  %v7565_v17 = vld [vmem:[%s10026_s17 + $0x28] sm:$0xff] }
 0xe78   :  { %v3575_v20 = vadd.f32 1e-05, %v3573_v19  ;;  %v7564_v19 = vld [vmem:[%s10026_s17 + $0x20] sm:$0xff] }
 0xe79   :  { %v3572_v21 = vpop.xlane.xlu0 %3571 }
 0xe7a   :  { %8509 = vrsqrt.f32 %v3575_v20  ;;  %v3574_v22 = vmul.f32 0.03125, %v3572_v21 }
 0xe7c   :  { %v3576_v23 = vadd.f32 1e-05, %v3574_v22 }
 0xe7e   :  { %8511 = vrsqrt.f32 %v3576_v23 }
 0xe87   :  { %v8510_v24 = vpop.eup %8509 }
 0xe88   :  { %v3579_v45 = vmul.f32 %v8510_v24, %v3563_v5 }
 0xe8a   :  { %v3587_v27 = vmul.f32 %v7554_v25, %v3579_v45 }
 0xe8b   :  { %v8512_v29 = vpop.eup %8511 }
 0xe8c   :  { %v3580_v18 = vmul.f32 %v8512_v29, %v3564_v48  ;;  %v3595_v30 = vadd.f32 %v7555_v26, %v3587_v27 }
 0xe8e   :  { %v3588_v31 = vmul.f32 %v7554_v25, %v3580_v18  ;;  %8115 = vmatprep.mubr.msk.f32.mxu1 %vm331_vm6, %v3595_v30 }
 0xe90   :  { %v3596_v32 = vadd.f32 %v7555_v26, %v3588_v31  ;;  %v7562_v26 = vld [vmem:[%s9999_s15] ss:$0 sm:$0xff] }
 0xe91   :  { %v7563_v31 = vld [vmem:[%s10000_s16] ss:$0 sm:$0xff] }
 0xe92   :  { %8116 = vmatmul.mubr.msk.f32.vlgmr.msra.gmra.mxu1 %vm331_vm6, %v3596_v32 }
 0xe93   :  { %8138 = vmatpush3.msra.mxu1 %v7567_v15 }
 0xe94   :  { %8139 = vmatprep.subr.mxu1 %v7566_v16 }
 0xe95   :  { %8140 = vmatpush3.msra.mxu1 %v7566_v16 }
 0xe96   :  { %8141 = vmatprep.subr.mxu1 %v7565_v17 }
 0xe97   :  { %8142 = vmatpush3.msra.mxu1 %v7565_v17 }
 0xe98   :  { %8143 = vmatprep.subr.mxu1 %v7564_v19 }
 0xe99   :  { %8144 = vmatpush3.msra.mxu1 %v7564_v19 }
 0xe9a   :  { %8148 = vmatprep.subr.mxu1 %v8872_v1 }
 0xf52   :  { %v8117_v42 = vpop.f32.mrf.mxu1 }
 0xf53   :  { %v3686_v44 = vadd.f32 %v8117_v42, %v7556_v40 }
 0xf54   :  { %v3680_v46 = vpop.f32.mrf.mxu1 }
 0xf55   :  { %v3692_v49 = vmul.f32 0.70710677, %v3686_v44  ;;  %v3681_v50 = vadd.f32 %v7556_v40, %v3680_v46  ;;  %v3690_v57 = vmul.f32 0.5, %v3686_v44 }
 0xf57   :  { %8513 = verf.f32 %v3692_v49  ;;  %v3691_v51 = vmul.f32 0.70710677, %v3681_v50  ;;  %v3689_v55 = vmul.f32 0.5, %v3681_v50 }
 0xf59   :  { %8515 = verf.f32 %v3691_v51 }
 0xf64   :  { %v8514_v52 = vpop.eup %8513 }
 0xf65   :  { %v3696_v54 = vadd.f32 1.0, %v8514_v52 }
 0xf66   :  { %v8516_v53 = vpop.eup %8515 }
 0xf67   :  { %v3695_v56 = vadd.f32 1.0, %v8516_v53  ;;  %v3698_v59 = vmul.f32 %v3696_v54, %v3690_v57 }
 0xf69   :  { %v3697_v58 = vmul.f32 %v3695_v56, %v3689_v55 }
 0xf6b   :  { %8134 = vmatprep.mubr.msk.f32.mxu0 %vm3714_vm12, %v3697_v58 }
 0xf6c   :  { %8135 = vmatmul.mubr.msk.f32.vlgmr.msra.gmra.mxu0 %vm3714_vm12, %v3698_v59 }
 0xf6d   :  { %8160 = vmatprep.mubr.msk.f32.mxu0 %vm8873_vm7, %v8872_v1 }
0x102c   :  { %v8136_v61 = vpop.f32.mrf.mxu0 }
0x102d   :  { %v3793_v63 = vadd.f32 %v8136_v61, %v7559_v60 }
0x102e   :  { %v3787_v0 = vpop.f32.mrf.mxu0 }
0x102f   :  { %v3797_v2 = vadd.f32 %v3793_v63, %v3596_v32  ;;  %v3788_v3 = vadd.f32 %v7559_v60, %v3787_v0 }
0x1031   :  { %v3803_v4 = vsel %vm331_vm6, %v3797_v2, 0.0  ;;  %v3796_v47 = vadd.f32 %v3788_v3, %v3595_v30 }
0x1032   :  { %3804 = vadd.xlane.f32.xlu1 %v3803_v4 }
0x1033   :  { %v3800_v6 = vsel %vm331_vm6, %v3796_v47, 0.0 }
0x1034   :  { %3801 = vadd.xlane.f32.xlu0 %v3800_v6 }
0x10bb   :  { %v3805_v7 = vpop.xlane.xlu1 %3804 }
0x10bc   :  { %v3807_v8 = vmul.f32 0.03125, %v3805_v7 }
0x10bd   :  { %v3802_v48 = vpop.xlane.xlu0 %3801 }
0x10be   :  { %v3809_v5 = vsub.f32 %v3797_v2, %v3807_v8  ;;  %v3806_v9 = vmul.f32 0.03125, %v3802_v48 }
0x10c0   :  { %v3808_v10 = vsub.f32 %v3796_v47, %v3806_v9  ;;  %v3811_v13 = vmul.f32 %v3809_v5, %v3809_v5 }
0x10c2   :  { %v3815_v12 = vsel %vm331_vm6, %v3811_v13, 0.0  ;;  %v3810_v14 = vmul.f32 %v3808_v10, %v3808_v10 }
0x10c3   :  { %3816 = vadd.xlane.f32.xlu1 %v3815_v12 }
0x10c4   :  { %v3812_v11 = vsel %vm331_vm6, %v3810_v14, 0.0 }
0x10c5   :  { %3813 = vadd.xlane.f32.xlu0 %v3812_v11 }
0x114c   :  { %v3817_v20 = vpop.xlane.xlu1 %3816 }
0x114d   :  { %v3819_v21 = vmul.f32 0.03125, %v3817_v20 }
0x114e   :  { %v3814_v22 = vpop.xlane.xlu0 %3813 }
0x114f   :  { %v3821_v23 = vadd.f32 1e-05, %v3819_v21  ;;  %v3818_v24 = vmul.f32 0.03125, %v3814_v22 }
0x1151   :  { %8517 = vrsqrt.f32 %v3821_v23  ;;  %v3820_v25 = vadd.f32 1e-05, %v3818_v24 }
0x1153   :  { %8519 = vrsqrt.f32 %v3820_v25 }
0x115e   :  { %v8518_v45 = vpop.eup %8517 }
0x115f   :  { %v3825_v27 = vmul.f32 %v8518_v45, %v3809_v5 }
0x1160   :  { %v8520_v29 = vpop.eup %8519 }
0x1161   :  { %v3824_v18 = vmul.f32 %v8520_v29, %v3808_v10  ;;  %v3833_v30 = vmul.f32 %v7562_v26, %v3825_v27 }
0x1163   :  { %v3832_v32 = vmul.f32 %v7562_v26, %v3824_v18  ;;  %v9561_v28 = vadd.f32 %v7563_v31, %v3833_v30 }
0x1165   :  { %v9559_v33 = vadd.f32 %v7563_v31, %v3832_v32 }
0x1167   :  { %8145 = vmatprep.mubr.msk.f32.mxu1 %vm331_vm6, %v9559_v33 }
0x1168   :  { %8146 = vmatmul.mubr.msk.f32.vlgmr.msra.gmra.mxu1 %vm331_vm6, %v9561_v28 }
0x1169   :  { %8150 = vmatprep.mubr.msk.f32.mxu1 %vm8873_vm7, %v8872_v1 }
0x1228   :  { %v8147_v34 = vpop.f32.mrf.mxu1 }
0x1229   :  { %v9578_v38 = vadd.f32 %v8147_v34, %v7569_v35 }
0x122a   :  { %v3927_v36 = vpop.f32.mrf.mxu1 }
0x122b   :  { %v3928_v37 = vadd.f32 %v7569_v35, %v3927_v36 }
0x122d   :  { %4104 = vrot.lane.b32.xlu1 %v3928_v37, %s8876_s5  ;;  %3937 = vrot.lane.b32.xlu0 %v3928_v37, %s8874_s7 }
0x1231   :  { %4102 = vrot.lane.b32.xlu1 %v3928_v37, %s8877_s29  ;;  %4269 = vrot.lane.b32.xlu0 %v3928_v37, %s8879_s22 }
0x1235   :  { %4271 = vrot.lane.b32.xlu1 %v3928_v37, %s8878_s21  ;;  %4436 = vrot.lane.b32.xlu0 %v3928_v37, %s8881_s3 }
0x1239   :  { %4438 = vrot.lane.b32.xlu1 %v3928_v37, %s8880_s2  ;;  %4786 = vrot.lane.b32.xlu0 %v9578_v38, %s8876_s5 }
0x123d   :  { %4619 = vrot.lane.b32.xlu1 %v9578_v38, %s8874_s7  ;;  %4953 = vrot.lane.b32.xlu0 %v9578_v38, %s8878_s21 }
0x1241   :  { %4784 = vrot.lane.b32.xlu1 %v9578_v38, %s8877_s29  ;;  %5120 = vrot.lane.b32.xlu0 %v9578_v38, %s8880_s2 }
0x1245   :  { %4951 = vrot.lane.b32.xlu1 %v9578_v38, %s8879_s22  ;;  %4024 = vrot.lane.b32.xlu0 %v3928_v37, %s8875_s18 }
0x1249   :  { %5118 = vrot.lane.b32.xlu1 %v9578_v38, %s8881_s3 }
0x124d   :  { %4191 = vrot.lane.b32.xlu1 %v3928_v37, %s8882_s8 }
0x1251   :  { %4358 = vrot.lane.b32.xlu1 %v3928_v37, %s8884_s0 }
0x1255   :  { %4525 = vrot.lane.b32.xlu1 %v3928_v37, %s8883_s9 }
0x129f   :  { %v4105_v39 = vpop.permute.xlu1 %4104  ;;  %v3938_v40 = vpop.permute.xlu0 %3937 }
0x12a0   :  { %8149 = vmatpush3.xpose.msk.msra.mxu1 %vm416_vm8, %v3938_v40  ;;  %8159 = vmatpush3.xpose.msk.msra.mxu0 %vm416_vm8, %v4105_v39 }
0x12a1   :  { %8168 = vmatprep.subr.mxu0 %v8872_v1  ;;  %8153 = vmatprep.subr.mxu1 %v8872_v1 }
0x12a3   :  { %v4103_v42 = vpop.permute.xlu1 %4102  ;;  %8151 = vmatmul.mubr.msk.f32.vlgmr.msra.gmra.mxu1 %vm416_vm8, %v3928_v37  ;;  %v4270_v44 = vpop.permute.xlu0 %4269 }
0x12a4   :  { %8161 = vmatmul.mubr.msk.f32.vlgmr.msra.gmra.mxu0 %vm416_vm8, %v4103_v42  ;;  %8155 = vmatprep.mubr.msk.f32.mxu1 %vm8873_vm7, %v8872_v1 }
0x12a5   :  { %8170 = vmatprep.mubr.msk.f32.mxu0 %vm8873_vm7, %v8872_v1 }
0x12a7   :  { %v4272_v46 = vpop.permute.xlu1 %4271  ;;  %v4437_v49 = vpop.permute.xlu0 %4436 }
0x12a8   :  { %8169 = vmatpush3.xpose.msk.msra.mxu0 %vm416_vm8, %v4272_v46 }
0x12a9   :  { %8178 = vmatprep.subr.mxu0 %v8872_v1 }
0x12ab   :  { %v4439_v50 = vpop.permute.xlu1 %4438  ;;  %8171 = vmatmul.mubr.msk.f32.vlgmr.msra.gmra.mxu0 %vm416_vm8, %v4270_v44  ;;  %v4787_v51 = vpop.permute.xlu0 %4786 }
0x12ac   :  { %8179 = vmatpush3.xpose.msk.msra.mxu0 %vm416_vm8, %v4439_v50  ;;  %8180 = vmatprep.mubr.msk.f32.mxu0 %vm8873_vm7, %v8872_v1 }
0x12ad   :  { %8188 = vmatprep.subr.mxu0 %v8872_v1 }
0x12af   :  { %v4620_v52 = vpop.permute.xlu1 %4619  ;;  %8181 = vmatmul.mubr.msk.f32.vlgmr.msra.gmra.mxu0 %vm416_vm8, %v4437_v49  ;;  %v4954_v53 = vpop.permute.xlu0 %4953 }
0x12b0   :  { %8189 = vmatpush3.xpose.msk.msra.mxu0 %vm416_vm8, %v4620_v52  ;;  %8190 = vmatprep.mubr.msk.f32.mxu0 %vm8873_vm7, %v8872_v1 }
0x12b1   :  { %8198 = vmatprep.subr.mxu0 %v8872_v1 }
0x12b3   :  { %v4785_v54 = vpop.permute.xlu1 %4784  ;;  %8191 = vmatmul.mubr.msk.f32.vlgmr.msra.gmra.mxu0 %vm416_vm8, %v9578_v38  ;;  %v5121_v55 = vpop.permute.xlu0 %5120 }
0x12b4   :  { %8199 = vmatpush3.xpose.msk.msra.mxu0 %vm416_vm8, %v4787_v51  ;;  %8200 = vmatprep.mubr.msk.f32.mxu0 %vm8873_vm7, %v8872_v1 }
0x12b5   :  { %8208 = vmatprep.subr.mxu0 %v8872_v1 }
0x12b7   :  { %8201 = vmatmul.mubr.msk.f32.vlgmr.msra.gmra.mxu0 %vm416_vm8, %v4785_v54  ;;  %v4025_v56 = vpop.permute.xlu0 %4024  ;;  %v4952_v57 = vpop.permute.xlu1 %4951 }
0x12b8   :  { %8154 = vmatpush3.msra.mxu1 %v4025_v56  ;;  %8209 = vmatpush3.xpose.msk.msra.mxu0 %vm416_vm8, %v4954_v53 }
0x12b9   :  { %8210 = vmatprep.mubr.msk.f32.mxu0 %vm8873_vm7, %v8872_v1  ;;  %8218 = vmatprep.subr.mxu0 %v8872_v1 }
0x12ba   :  { %8163 = vmatprep.subr.mxu1 %v8872_v1 }
0x12bb   :  { %8211 = vmatmul.mubr.msk.f32.vlgmr.msra.gmra.mxu0 %vm416_vm8, %v4952_v57  ;;  %v5119_v58 = vpop.permute.xlu1 %5118 }
0x12bc   :  { %8219 = vmatpush3.xpose.msk.msra.mxu0 %vm416_vm8, %v5121_v55  ;;  %8220 = vmatprep.mubr.msk.f32.mxu0 %vm8873_vm7, %v8872_v1 }
0x12bf   :  { %8221 = vmatmul.mubr.msk.f32.vlgmr.msra.gmra.mxu0 %vm416_vm8, %v5119_v58  ;;  %v4192_v36 = vpop.permute.xlu1 %4191 }
0x12c3   :  { %v4359_v37 = vpop.permute.xlu1 %4358 }
0x12c7   :  { %v4526_v39 = vpop.permute.xlu1 %4525 }
0x1363   :  { %v4009_v59 = vpop.f32.mrf.mxu1 }
0x1364   :  { %v4013_v60 = vmul.f32 0.35355338, %v4009_v59  ;;  %v4176_v61 = vpop.f32.mrf.mxu0 }
0x1365   :  { %v4180_v63 = vmul.f32 0.35355338, %v4176_v61  ;;  %v8152_v0 = vpop.f32.mrf.mxu1 }
0x1366   :  { %v4014_v2 = vsel %vm9175_vm9, %v4013_v60, -1e+30  ;;  %v8162_v3 = vpop.f32.mrf.mxu0 }
0x1367   :  { %v4181_v4 = vsel %vm9175_vm9, %v4180_v63, -1e+30  ;;  %v4015_v47 = vsel %vm416_vm8, %v4014_v2, -inf }
0x1368   :  { %4016 = vmax.xlane.f32.xlu0 %v4015_v47  ;;  %v4182_v6 = vsel %vm416_vm8, %v4181_v4, -inf }
0x1369   :  { %4183 = vmax.xlane.f32.xlu1 %v4182_v6 }
0x136b   :  { %v4343_v7 = vpop.f32.mrf.mxu0 }
0x136c   :  { %v4347_v8 = vmul.f32 0.35355338, %v4343_v7 }
0x136d   :  { %v8172_v48 = vpop.f32.mrf.mxu0 }
0x136e   :  { %v4348_v5 = vsel %vm9175_vm9, %v4347_v8, -1e+30 }
0x136f   :  { %v4510_v9 = vpop.f32.mrf.mxu0  ;;  %v4349_v10 = vsel %vm416_vm8, %v4348_v5, -inf }
0x1370   :  { %v4514_v13 = vmul.f32 0.35355338, %v4510_v9  ;;  %4350 = vmax.xlane.f32.xlu0 %v4349_v10 }
0x1371   :  { %v8182_v12 = vpop.f32.mrf.mxu0 }
0x1372   :  { %v4515_v14 = vsel %vm9175_vm9, %v4514_v13, -1e+30 }
0x1373   :  { %v4691_v11 = vpop.f32.mrf.mxu0  ;;  %v4516_v15 = vsel %vm416_vm8, %v4515_v14, -inf }
0x1374   :  { %v4695_v16 = vmul.f32 0.35355338, %v4691_v11  ;;  %4517 = vmax.xlane.f32.xlu0 %v4516_v15 }
0x1375   :  { %v8192_v17 = vpop.f32.mrf.mxu0 }
0x1376   :  { %v4696_v19 = vsel %vm9175_vm9, %v4695_v16, -1e+30 }
0x1377   :  { %v4858_v20 = vpop.f32.mrf.mxu0  ;;  %v4697_v21 = vsel %vm416_vm8, %v4696_v19, -inf }
0x1378   :  { %4698 = vmax.xlane.f32.xlu0 %v4697_v21  ;;  %v4862_v26 = vmul.f32 0.35355338, %v4858_v20 }
0x1379   :  { %v8202_v22 = vpop.f32.mrf.mxu0 }
0x137a   :  { %4873 = vrot.lane.b32.xlu1 %v9578_v38, %s8882_s8  ;;  %v9659_v27 = vsel %vm9175_vm9, %v4862_v26, -1e+30 }
0x137b   :  { %v5025_v23 = vpop.f32.mrf.mxu0  ;;  %v4864_v18 = vsel %vm416_vm8, %v9659_v27, -inf }
0x137c   :  { %v5029_v32 = vmul.f32 0.35355338, %v5025_v23 }
0x137d   :  { %v8212_v24 = vpop.f32.mrf.mxu0 }
0x137e   :  { %v9671_v34 = vsel %vm9175_vm9, %v5029_v32, -1e+30 }
0x137f   :  { %v5192_v25 = vpop.f32.mrf.mxu0  ;;  %v5031_v35 = vsel %vm416_vm8, %v9671_v34, -inf }
0x1380   :  { %v5196_v29 = vmul.f32 0.35355338, %v5192_v25 }
0x1381   :  { %v8222_v45 = vpop.f32.mrf.mxu0 }
0x1382   :  { %v9665_v30 = vsel %vm9175_vm9, %v5196_v29, -1e+30 }
0x1383   :  { %v5198_v31 = vsel %vm416_vm8, %v9665_v30, -inf }
0x138e   :  { %4706 = vrot.lane.b32.xlu0 %v9578_v38, %s8875_s18 }
0x139e   :  { %4865 = vmax.xlane.f32.xlu1 %v4864_v18 }
0x13a2   :  { %5199 = vmax.xlane.f32.xlu1 %v5198_v31 }
0x13ad   :  { %5032 = vmax.xlane.f32.xlu0 %v5031_v35 }
0x13b3   :  { %5207 = vrot.lane.b32.xlu1 %v9578_v38, %s8883_s9 }
0x13c3   :  { %5040 = vrot.lane.b32.xlu0 %v9578_v38, %s8884_s0 }
0x13f1   :  { %v4017_v40 = vpop.xlane.xlu0 %4016 }
0x13f2   :  { %v4018_v42 = vsub.f32 %v4014_v2, %v4017_v40  ;;  %v4184_v44 = vpop.xlane.xlu1 %4183 }
0x13f3   :  { %v4185_v46 = vsub.f32 %v4181_v4, %v4184_v44 }
0x13f4   :  { %v4019_v62 = vmul.f32 1.442695, %v4018_v42 }
0x13f5   :  { %v4186_v49 = vmul.f32 1.442695, %v4185_v46 }
0x13f6   :  { %8521 = vpow2.f32 %v4019_v62  ;;  %v4874_v47 = vpop.permute.xlu1 %4873 }
0x13f7   :  { %8523 = vpow2.f32 %v4186_v49  ;;  %v7599_v49 = vld [vmem:[%s10031_s24 + $0x38] sm:$0xff] }
0x13f8   :  { %8228 = vmatprep.subr.mxu0 %v7599_v49 }
0x13f9   :  { %v4351_v50 = vpop.xlane.xlu0 %4350  ;;  %8229 = vmatpush3.msra.mxu0 %v7599_v49 }
0x13fa   :  { %v4352_v51 = vsub.f32 %v4348_v5, %v4351_v50  ;;  %v7598_v50 = vld [vmem:[%s10031_s24 + $0x30] sm:$0xff] }
0x13fb   :  { %8230 = vmatprep.subr.mxu0 %v7598_v50 }
0x13fc   :  { %v4353_v52 = vmul.f32 1.442695, %v4352_v51  ;;  %8231 = vmatpush3.msra.mxu0 %v7598_v50 }
0x13fd   :  { %v4518_v53 = vpop.xlane.xlu0 %4517 }
0x13fe   :  { %8525 = vpow2.f32 %v4353_v52  ;;  %v4519_v54 = vsub.f32 %v4515_v14, %v4518_v53 }
0x1400   :  { %v4520_v55 = vmul.f32 1.442695, %v4519_v54 }
0x1401   :  { %v4699_v56 = vpop.xlane.xlu0 %4698 }
0x1402   :  { %8527 = vpow2.f32 %v4520_v55  ;;  %v4700_v38 = vsub.f32 %v4696_v19, %v4699_v56 }
0x1403   :  { %v9679_v57 = vpop.eup %8521 }
0x1404   :  { %v8524_v58 = vpop.eup %8523  ;;  %v4701_v59 = vmul.f32 1.442695, %v4700_v38  ;;  %8156 = vmatmul.mubr.msk.f32.vlgmr.msra.gmra.mxu1 %vm416_vm8, %v9679_v57  ;;  %v4021_v23 = vsel %vm416_vm8, %v9679_v57, 0.0  ;;  %v7597_v38 = vld [vmem:[%s10031_s24 + $0x28] sm:$0xff]  ;;  %v7596_v57 = vld [vmem:[%s10031_s24 + $0x20] sm:$0xff] }
0x1405   :  { %8164 = vmatpush3.msra.mxu1 %v4192_v36  ;;  %v4188_v60 = vsel %vm416_vm8, %v8524_v58, 0.0  ;;  %8165 = vmatprep.mubr.msk.f32.mxu1 %vm8873_vm7, %v8872_v1  ;;  %v4707_v2 = vpop.permute.xlu0 %4706 }
0x1406   :  { %8529 = vpow2.f32 %v4701_v59  ;;  %4189 = vadd.xlane.f32.xlu0 %v4188_v60  ;;  %8173 = vmatprep.subr.mxu1 %v8872_v1 }
0x1407   :  { %8232 = vmatprep.subr.mxu0 %v7597_v38 }
0x1408   :  { %8166 = vmatmul.mubr.msk.f32.vlgmr.msra.gmra.mxu1 %vm416_vm8, %v8524_v58  ;;  %8233 = vmatpush3.msra.mxu0 %v7597_v38 }
0x1409   :  { %8174 = vmatpush3.msra.mxu1 %v4359_v37  ;;  %8175 = vmatprep.mubr.msk.f32.mxu1 %vm8873_vm7, %v8872_v1 }
0x140a   :  { %8183 = vmatprep.subr.mxu1 %v8872_v1  ;;  %8234 = vmatprep.subr.mxu0 %v7596_v57 }
0x140b   :  { %v8526_v61 = vpop.eup %8525  ;;  %8235 = vmatpush3.msra.mxu0 %v7596_v57 }
0x140c   :  { %8176 = vmatmul.mubr.msk.f32.vlgmr.msra.gmra.mxu1 %vm416_vm8, %v8526_v61  ;;  %v4355_v63 = vsel %vm416_vm8, %v8526_v61, 0.0 }
0x140d   :  { %8184 = vmatpush3.msra.mxu1 %v4526_v39  ;;  %4356 = vadd.xlane.f32.xlu1 %v4355_v63 }
0x140e   :  { %8185 = vmatprep.mubr.msk.f32.mxu1 %vm8873_vm7, %v8872_v1  ;;  %8193 = vmatprep.subr.mxu1 %v8872_v1 }
0x140f   :  { %v8528_v0 = vpop.eup %8527 }
0x1410   :  { %8186 = vmatmul.mubr.msk.f32.vlgmr.msra.gmra.mxu1 %vm416_vm8, %v8528_v0  ;;  %v4522_v3 = vsel %vm416_vm8, %v8528_v0, 0.0 }
0x1411   :  { %8194 = vmatpush3.msra.mxu1 %v4707_v2  ;;  %4523 = vadd.xlane.f32.xlu0 %v4522_v3 }
0x1412   :  { %8195 = vmatprep.mubr.msk.f32.mxu1 %vm8873_vm7, %v8872_v1  ;;  %8203 = vmatprep.subr.mxu1 %v8872_v1 }
0x1413   :  { %v8530_v4 = vpop.eup %8529 }
0x1414   :  { %8196 = vmatmul.mubr.msk.f32.vlgmr.msra.gmra.mxu1 %vm416_vm8, %v8530_v4  ;;  %v4703_v19 = vsel %vm416_vm8, %v8530_v4, 0.0 }
0x1415   :  { %8204 = vmatpush3.msra.mxu1 %v4874_v47  ;;  %8205 = vmatprep.mubr.msk.f32.mxu1 %vm8873_vm7, %v8872_v1 }
0x1416   :  { %8213 = vmatprep.subr.mxu1 %v8872_v1 }
0x1427   :  { %v4866_v6 = vpop.xlane.xlu1 %4865 }
0x1428   :  { %v4867_v7 = vsub.f32 %v9659_v27, %v4866_v6 }
0x142a   :  { %v4868_v8 = vmul.f32 1.442695, %v4867_v7 }
0x142b   :  { %v5200_v48 = vpop.xlane.xlu1 %5199 }
0x142c   :  { %8531 = vpow2.f32 %v4868_v8  ;;  %v5201_v5 = vsub.f32 %v9665_v30, %v5200_v48 }
0x142e   :  { %v5202_v9 = vmul.f32 1.442695, %v5201_v5 }
0x142f   :  { %v5208_v21 = vpop.permute.xlu1 %5207 }
0x1430   :  { %8533 = vpow2.f32 %v5202_v9 }
0x1436   :  { %v5033_v10 = vpop.xlane.xlu0 %5032 }
0x1437   :  { %v5034_v13 = vsub.f32 %v9671_v34, %v5033_v10 }
0x1439   :  { %v8532_v12 = vpop.eup %8531  ;;  %v5035_v14 = vmul.f32 1.442695, %v5034_v13 }
0x143a   :  { %8206 = vmatmul.mubr.msk.f32.vlgmr.msra.gmra.mxu1 %vm416_vm8, %v8532_v12  ;;  %v5041_v11 = vpop.permute.xlu0 %5040  ;;  %v4870_v15 = vsel %vm416_vm8, %v8532_v12, 0.0 }
0x143b   :  { %8535 = vpow2.f32 %v5035_v14  ;;  %4871 = vadd.xlane.f32.xlu0 %v4870_v15  ;;  %8214 = vmatpush3.msra.mxu1 %v5041_v11 }
0x143c   :  { %8215 = vmatprep.mubr.msk.f32.mxu1 %vm8873_vm7, %v8872_v1  ;;  %8223 = vmatprep.subr.mxu1 %v8872_v1 }
0x143d   :  { %v8534_v16 = vpop.eup %8533 }
0x143e   :  { %v5204_v17 = vsel %vm416_vm8, %v8534_v16, 0.0 }
0x143f   :  { %5205 = vadd.xlane.f32.xlu1 %v5204_v17 }
0x1443   :  { %4704 = vadd.xlane.f32.xlu1 %v4703_v19 }
0x1448   :  { %v8536_v20 = vpop.eup %8535 }
0x1449   :  { %8216 = vmatmul.mubr.msk.f32.vlgmr.msra.gmra.mxu1 %vm416_vm8, %v8536_v20  ;;  %v5037_v22 = vsel %vm416_vm8, %v8536_v20, 0.0 }
0x144a   :  { %8224 = vmatpush3.msra.mxu1 %v5208_v21  ;;  %5038 = vadd.xlane.f32.xlu0 %v5037_v22  ;;  %v7601_v21 = vld [vmem:[%s10032_s30 + $0x1] ss:$0 sm:$0xff] }
0x144b   :  { %8225 = vmatprep.mubr.msk.f32.mxu1 %vm8873_vm7, %v8872_v1 }
0x144d   :  { %8226 = vmatmul.mubr.msk.f32.vlgmr.msra.gmra.mxu1 %vm416_vm8, %v8534_v16 }
0x144e   :  { %4022 = vadd.xlane.f32.xlu0 %v4021_v23 }
0x148f   :  { %v4190_v24 = vpop.xlane.xlu0 %4189 }
0x1490   :  { %8537 = vrcp.f32 %v4190_v24 }
0x1496   :  { %v4357_v25 = vpop.xlane.xlu1 %4356 }
0x1497   :  { %8539 = vrcp.f32 %v4357_v25 }
0x149a   :  { %v4524_v45 = vpop.xlane.xlu0 %4523 }
0x149b   :  { %8541 = vrcp.f32 %v4524_v45 }
0x149d   :  { %v8538_v29 = vpop.eup %8537 }
0x14a4   :  { %v8540_v32 = vpop.eup %8539 }
0x14a8   :  { %v8542_v37 = vpop.eup %8541 }
0x14c4   :  { %v4096_v26 = vpop.f32.mrf.mxu1  ;;  %v4872_v62 = vpop.xlane.xlu0 %4871 }
0x14c5   :  { %8543 = vrcp.f32 %v4872_v62 }
0x14c6   :  { %v8157_v27 = vpop.f32.mrf.mxu1 }
0x14c8   :  { %v4263_v18 = vpop.f32.mrf.mxu1  ;;  %v5206_v56 = vpop.xlane.xlu1 %5205 }
0x14c9   :  { %v4268_v30 = vmul.f32 %v8538_v29, %v4263_v18  ;;  %v7609_v18 = vld [vmem:[%s10033_s26 + $0x38] sm:$0xff] }
0x14ca   :  { %v8167_v31 = vpop.f32.mrf.mxu1  ;;  %8239 = vmatprep.subr.mxu1 %v7609_v18 }
0x14cb   :  { %4604 = vrot.lane.b32.xlu0 %v4268_v30, %s8863_s6  ;;  %8240 = vmatpush3.msra.mxu1 %v7609_v18 }
0x14cc   :  { %v4430_v34 = vpop.f32.mrf.mxu1  ;;  %v4705_v47 = vpop.xlane.xlu1 %4704 }
0x14cd   :  { %v4435_v35 = vmul.f32 %v8540_v32, %v4430_v34 }
0x14ce   :  { %v8177_v36 = vpop.f32.mrf.mxu1 }
0x14cf   :  { %4608 = vrot.lane.b32.xlu1 %v4435_v35, %s8856_s25 }
0x14d0   :  { %v4597_v39 = vpop.f32.mrf.mxu1 }
0x14d1   :  { %v4602_v40 = vmul.f32 %v8542_v37, %v4597_v39 }
0x14d2   :  { %v8187_v42 = vpop.f32.mrf.mxu1  ;;  %v8544_v52 = vpop.eup %8543 }
0x14d3   :  { %4612 = vrot.lane.b32.xlu1 %v4602_v40, %s10034_s12  ;;  %v5039_v51 = vpop.xlane.xlu0 %5038 }
0x14d4   :  { %v4778_v44 = vpop.f32.mrf.mxu1  ;;  %8545 = vrcp.f32 %v5039_v51 }
0x14d5   :  { %8547 = vrcp.f32 %v5206_v56 }
0x14d6   :  { %v8197_v46 = vpop.f32.mrf.mxu1 }
0x14d7   :  { %v4023_v4 = vpop.xlane.xlu0 %4022 }
0x14d8   :  { %8549 = vrcp.f32 %v4023_v4 }
0x14d9   :  { %8551 = vrcp.f32 %v4705_v47 }
0x14e1   :  { %v8546_v58 = vpop.eup %8545 }
0x14e2   :  { %v8548_v63 = vpop.eup %8547 }
0x14e5   :  { %v8550_v6 = vpop.eup %8549 }
0x14e6   :  { %v4101_v48 = vmul.f32 %v8550_v6, %v4096_v26  ;;  %v8552_v12 = vpop.eup %8551 }
0x14e7   :  { %v4783_v11 = vmul.f32 %v8552_v12, %v4778_v44  ;;  %v7610_v44 = vld [vmem:[#allocation4 + $0x1] ss:$0 sm:$0xff] }
0x14fa   :  { %v4945_v53 = vpop.f32.mrf.mxu1 }
0x14fb   :  { %v4950_v54 = vmul.f32 %v8544_v52, %v4945_v53 }
0x14fc   :  { %v8207_v55 = vpop.f32.mrf.mxu1 }
0x14fd   :  { %5286 = vrot.lane.b32.xlu1 %v4950_v54, %s8863_s6 }
0x1509   :  { %v5112_v59 = vpop.f32.mrf.mxu1 }
0x150a   :  { %v5117_v60 = vmul.f32 %v8546_v58, %v5112_v59  ;;  %v7604_v58 = vld [vmem:[#allocation9 + $0x1] ss:$0 sm:$0xff] }
0x150b   :  { %v8217_v61 = vpop.f32.mrf.mxu1 }
0x150c   :  { %5290 = vrot.lane.b32.xlu0 %v5117_v60, %s8856_s25 }
0x150d   :  { %v5279_v0 = vpop.f32.mrf.mxu1 }
0x150e   :  { %v5284_v2 = vmul.f32 %v8548_v63, %v5279_v0  ;;  %v7605_v63 = vld [vmem:[#allocation10 + $0x1] ss:$0 sm:$0xff] }
0x150f   :  { %v8227_v3 = vpop.f32.mrf.mxu1 }
0x1510   :  { %5294 = vrot.lane.b32.xlu1 %v5284_v2, %s10034_s12 }
0x153d   :  { %v4605_v7 = vpop.permute.xlu0 %4604 }
0x153e   :  { %v4615_v5 = vsel %vm416_vm8, %v4101_v48, %v4605_v7 }
0x1541   :  { %v4609_v8 = vpop.permute.xlu1 %4608 }
0x1542   :  { %v4616_v9 = vsel %vm1094_vm10, %v4615_v5, %v4609_v8 }
0x1545   :  { %v4613_v10 = vpop.permute.xlu1 %4612 }
0x1546   :  { %v4617_v13 = vsel %vm1096_vm11, %v4616_v9, %v4613_v10 }
0x1547   :  { %8236 = vmatprep.mubr.msk.f32.mxu0 %vm331_vm6, %v4617_v13 }
0x156f   :  { %v5287_v14 = vpop.permute.xlu1 %5286 }
0x1570   :  { %v5297_v16 = vsel %vm416_vm8, %v4783_v11, %v5287_v14 }
0x157e   :  { %v5291_v15 = vpop.permute.xlu0 %5290 }
0x157f   :  { %v5298_v17 = vsel %vm1094_vm10, %v5297_v16, %v5291_v15 }
0x1582   :  { %v5295_v19 = vpop.permute.xlu1 %5294 }
0x1583   :  { %v5299_v20 = vsel %vm1096_vm11, %v5298_v17, %v5295_v19 }
0x1584   :  { %8237 = vmatmul.mubr.msk.f32.vlgmr.msra.gmra.mxu0 %vm331_vm6, %v5299_v20 }
0x1585   :  { %8258 = vmatprep.mubr.msk.f32.mxu0 %vm331_vm6, %v9101_v41  ;;  %v7608_v41 = vld [vmem:[%s10033_s26 + $0x30] sm:$0xff] }
0x1586   :  { %8241 = vmatprep.subr.mxu1 %v7608_v41 }
0x1587   :  { %8242 = vmatpush3.msra.mxu1 %v7608_v41 }
0x1644   :  { %v8238_v22 = vpop.f32.mrf.mxu0 }
0x1645   :  { %v5391_v23 = vadd.f32 %v8238_v22, %v7601_v21 }
0x1646   :  { %v5385_v24 = vpop.f32.mrf.mxu0 }
0x1647   :  { %v5395_v25 = vadd.f32 %v5391_v23, %v9561_v28  ;;  %v5386_v45 = vadd.f32 %v7601_v21, %v5385_v24  ;;  %v7606_v28 = vld [vmem:[%s10033_s26 + $0x20] sm:$0xff] }
0x1649   :  { %v5394_v26 = vadd.f32 %v5386_v45, %v9559_v33  ;;  %v5403_v27 = vsel %vm331_vm6, %v5395_v25, 0.0  ;;  %v7607_v33 = vld [vmem:[%s10033_s26 + $0x28] sm:$0xff] }
0x164a   :  { %5404 = vadd.xlane.f32.xlu1 %v5403_v27  ;;  %8243 = vmatprep.subr.mxu1 %v7607_v33 }
0x164b   :  { %v5400_v29 = vsel %vm331_vm6, %v5394_v26, 0.0  ;;  %8244 = vmatpush3.msra.mxu1 %v7607_v33 }
0x164c   :  { %5401 = vadd.xlane.f32.xlu0 %v5400_v29  ;;  %8245 = vmatprep.subr.mxu1 %v7606_v28 }
0x164d   :  { %8246 = vmatpush3.msra.mxu1 %v7606_v28 }
0x164e   :  { %8261 = vmatprep.subr.mxu1 %v8872_v1 }
0x165b   :  { %5544 = vrot.lane.b32.xlu1 %v7608_v41, %s8874_s7 }
0x165f   :  { %5542 = vrot.lane.b32.xlu1 %v7607_v33, %s8874_s7 }
0x1663   :  { %5540 = vrot.lane.b32.xlu1 %v7606_v28, %s8874_s7 }
0x16d3   :  { %v5405_v30 = vpop.xlane.xlu1 %5404 }
0x16d4   :  { %v5407_v31 = vmul.f32 0.03125, %v5405_v30 }
0x16d5   :  { %v5402_v32 = vpop.xlane.xlu0 %5401 }
0x16d6   :  { %v5409_v34 = vsub.f32 %v5395_v25, %v5407_v31  ;;  %v5406_v35 = vmul.f32 0.03125, %v5402_v32 }
0x16d7   :  { %v5545_v62 = vpop.permute.xlu1 %5544 }
0x16d8   :  { %v5408_v36 = vsub.f32 %v5394_v26, %v5406_v35  ;;  %v5411_v37 = vmul.f32 %v5409_v34, %v5409_v34 }
0x16da   :  { %v5415_v39 = vsel %vm331_vm6, %v5411_v37, 0.0  ;;  %v5410_v40 = vmul.f32 %v5408_v36, %v5408_v36 }
0x16db   :  { %5416 = vadd.xlane.f32.xlu0 %v5415_v39  ;;  %v5543_v53 = vpop.permute.xlu1 %5542 }
0x16dc   :  { %v5412_v42 = vsel %vm331_vm6, %v5410_v40, 0.0 }
0x16df   :  { %5413 = vadd.xlane.f32.xlu0 %v5412_v42  ;;  %v5541_v56 = vpop.permute.xlu1 %5540 }
0x16f5   :  { %5546 = vrot.lane.b32.xlu0 %v7609_v18, %s8874_s7 }
0x16f9   :  { %5552 = vrot.lane.b32.xlu0 %v7610_v44, %s8874_s7 }
0x1764   :  { %v5417_v46 = vpop.xlane.xlu0 %5416 }
0x1765   :  { %v5419_v49 = vmul.f32 0.03125, %v5417_v46 }
0x1767   :  { %v5421_v50 = vadd.f32 1e-05, %v5419_v49 }
0x1768   :  { %v5414_v51 = vpop.xlane.xlu0 %5413 }
0x1769   :  { %8553 = vrsqrt.f32 %v5421_v50  ;;  %v5418_v52 = vmul.f32 0.03125, %v5414_v51 }
0x176b   :  { %v5420_v54 = vadd.f32 1e-05, %v5418_v52 }
0x176c   :  { %v5547_v55 = vpop.permute.xlu0 %5546 }
0x176d   :  { %8555 = vrsqrt.f32 %v5420_v54  ;;  %8250 = vmatprep.subr.mxu0 %v5547_v55 }
0x176e   :  { %8251 = vmatpush3.msra.mxu0 %v5547_v55 }
0x176f   :  { %8252 = vmatprep.subr.mxu0 %v5545_v62 }
0x1770   :  { %8253 = vmatpush3.msra.mxu0 %v5545_v62  ;;  %v5553_v4 = vpop.permute.xlu0 %5552 }
0x1771   :  { %8254 = vmatprep.subr.mxu0 %v5543_v53 }
0x1772   :  { %8255 = vmatpush3.msra.mxu0 %v5543_v53 }
0x1773   :  { %8256 = vmatprep.subr.mxu0 %v5541_v56 }
0x1774   :  { %8257 = vmatpush3.msra.mxu0 %v5541_v56 }
0x1775   :  { %8259 = vmatmul.mubr.msk.f32.vlgmr.msra.gmra.mxu0 %vm331_vm6, %v9105_v43  ;;  %8271 = vmatprep.subr.mxu0 %v8872_v1 }
0x1776   :  { %v8554_v38 = vpop.eup %8553  ;;  %8273 = vmatprep.mubr.msk.f32.mxu0 %vm8873_vm7, %v8872_v1 }
0x1777   :  { %v5425_v57 = vmul.f32 %v8554_v38, %v5409_v34 }
0x1779   :  { %v5433_v61 = vmul.f32 %v7604_v58, %v5425_v57 }
0x177a   :  { %v8556_v59 = vpop.eup %8555 }
0x177b   :  { %v5424_v60 = vmul.f32 %v8556_v59, %v5408_v36  ;;  %v9784_v3 = vadd.f32 %v7605_v63, %v5433_v61 }
0x177d   :  { %v5432_v0 = vmul.f32 %v7604_v58, %v5424_v60 }
0x177f   :  { %v9782_v2 = vadd.f32 %v7605_v63, %v5432_v0 }
0x1781   :  { %8247 = vmatprep.mubr.msk.f32.mxu1 %vm331_vm6, %v9782_v2 }
0x1782   :  { %8248 = vmatmul.mubr.msk.f32.vlgmr.msra.gmra.mxu1 %vm331_vm6, %v9784_v3 }
0x1783   :  { %8263 = vmatprep.mubr.msk.f32.mxu1 %vm8873_vm7, %v8872_v1 }
0x1835   :  { %v8260_v43 = vpop.f32.mrf.mxu0 }
0x1836   :  { %v9797_v8 = vadd.f32 %v8260_v43, %v5553_v4 }
0x1837   :  { %v5621_v47 = vpop.f32.mrf.mxu0 }
0x1838   :  { %v5622_v6 = vadd.f32 %v5621_v47, %v5553_v4 }
0x183a   :  { %5796 = vrot.lane.b32.xlu1 %v5622_v6, %s8877_s29  ;;  %8262 = vmatpush3.xpose.msk.msra.mxu1 %vm416_vm8, %v5622_v6 }
0x183b   :  { %8266 = vmatprep.subr.mxu1 %v8872_v1 }
0x183e   :  { %5962 = vrot.lane.b32.xlu1 %v5622_v6, %s8879_s22 }
0x1842   :  { %v8249_v7 = vpop.f32.mrf.mxu1  ;;  %6128 = vrot.lane.b32.xlu1 %v5622_v6, %s8881_s3 }
0x1843   :  { %v5533_v9 = vadd.f32 %v8249_v7, %v7610_v44 }
0x1844   :  { %v5527_v48 = vpop.f32.mrf.mxu1 }
0x1845   :  { %v5528_v5 = vadd.f32 %v7610_v44, %v5527_v48 }
0x1846   :  { %6473 = vrot.lane.b32.xlu1 %v9797_v8, %s8877_s29 }
0x1847   :  { %5794 = vrot.lane.b32.xlu0 %v5528_v5, %s8877_s29  ;;  %8264 = vmatmul.mubr.msk.f32.vlgmr.msra.gmra.mxu1 %vm416_vm8, %v5528_v5 }
0x1848   :  { %8268 = vmatprep.mubr.msk.f32.mxu1 %vm8873_vm7, %v8872_v1 }
0x184a   :  { %6639 = vrot.lane.b32.xlu1 %v9797_v8, %s8879_s22 }
0x184b   :  { %5960 = vrot.lane.b32.xlu0 %v5528_v5, %s8879_s22 }
0x184e   :  { %6805 = vrot.lane.b32.xlu1 %v9797_v8, %s8881_s3 }
0x184f   :  { %6126 = vrot.lane.b32.xlu0 %v5528_v5, %s8881_s3 }
0x1852   :  { %5716 = vrot.lane.b32.xlu1 %v5622_v6, %s8874_s7 }
0x1853   :  { %6471 = vrot.lane.b32.xlu0 %v5533_v9, %s8877_s29 }
0x1856   :  { %6048 = vrot.lane.b32.xlu1 %v5622_v6, %s8878_s21 }
0x1857   :  { %6637 = vrot.lane.b32.xlu0 %v5533_v9, %s8879_s22 }
0x185a   :  { %6214 = vrot.lane.b32.xlu1 %v5622_v6, %s8880_s2 }
0x185b   :  { %6803 = vrot.lane.b32.xlu0 %v5533_v9, %s8881_s3 }
0x185f   :  { %5882 = vrot.lane.b32.xlu0 %v5622_v6, %s8876_s5 }
0x18ac   :  { %v5797_v10 = vpop.permute.xlu1 %5796 }
0x18ad   :  { %8272 = vmatpush3.xpose.msk.msra.mxu0 %vm416_vm8, %v5797_v10 }
0x18ae   :  { %8281 = vmatprep.subr.mxu0 %v8872_v1 }
0x18b0   :  { %v5963_v13 = vpop.permute.xlu1 %5962 }
0x18b4   :  { %v6129_v12 = vpop.permute.xlu1 %6128 }
0x18b8   :  { %v6474_v14 = vpop.permute.xlu1 %6473 }
0x18b9   :  { %v5795_v11 = vpop.permute.xlu0 %5794 }
0x18ba   :  { %8274 = vmatmul.mubr.msk.f32.vlgmr.msra.gmra.mxu0 %vm416_vm8, %v5795_v11 }
0x18bb   :  { %8282 = vmatpush3.xpose.msk.msra.mxu0 %vm416_vm8, %v5963_v13  ;;  %8283 = vmatprep.mubr.msk.f32.mxu0 %vm8873_vm7, %v8872_v1 }
0x18bc   :  { %v6640_v15 = vpop.permute.xlu1 %6639  ;;  %8291 = vmatprep.subr.mxu0 %v8872_v1 }
0x18bd   :  { %v5961_v16 = vpop.permute.xlu0 %5960 }
0x18be   :  { %8284 = vmatmul.mubr.msk.f32.vlgmr.msra.gmra.mxu0 %vm416_vm8, %v5961_v16 }
0x18bf   :  { %8292 = vmatpush3.xpose.msk.msra.mxu0 %vm416_vm8, %v6129_v12  ;;  %8293 = vmatprep.mubr.msk.f32.mxu0 %vm8873_vm7, %v8872_v1 }
0x18c0   :  { %v6806_v17 = vpop.permute.xlu1 %6805  ;;  %8301 = vmatprep.subr.mxu0 %v8872_v1 }
0x18c1   :  { %v6127_v19 = vpop.permute.xlu0 %6126 }
0x18c2   :  { %8294 = vmatmul.mubr.msk.f32.vlgmr.msra.gmra.mxu0 %vm416_vm8, %v6127_v19 }
0x18c3   :  { %8302 = vmatpush3.xpose.msk.msra.mxu0 %vm416_vm8, %v9797_v8  ;;  %8303 = vmatprep.mubr.msk.f32.mxu0 %vm8873_vm7, %v8872_v1 }
0x18c4   :  { %v5717_v20 = vpop.permute.xlu1 %5716  ;;  %8311 = vmatprep.subr.mxu0 %v8872_v1 }
0x18c5   :  { %8267 = vmatpush3.msra.mxu1 %v5717_v20  ;;  %v6472_v21 = vpop.permute.xlu0 %6471 }
0x18c6   :  { %8304 = vmatmul.mubr.msk.f32.vlgmr.msra.gmra.mxu0 %vm416_vm8, %v5533_v9  ;;  %8276 = vmatprep.subr.mxu1 %v8872_v1 }
0x18c7   :  { %8312 = vmatpush3.xpose.msk.msra.mxu0 %vm416_vm8, %v6474_v14  ;;  %8313 = vmatprep.mubr.msk.f32.mxu0 %vm8873_vm7, %v8872_v1 }
0x18c8   :  { %8321 = vmatprep.subr.mxu0 %v8872_v1  ;;  %v6049_v44 = vpop.permute.xlu1 %6048 }
0x18c9   :  { %v6638_v22 = vpop.permute.xlu0 %6637 }
0x18ca   :  { %8314 = vmatmul.mubr.msk.f32.vlgmr.msra.gmra.mxu0 %vm416_vm8, %v6472_v21 }
0x18cb   :  { %8322 = vmatpush3.xpose.msk.msra.mxu0 %vm416_vm8, %v6640_v15  ;;  %8323 = vmatprep.mubr.msk.f32.mxu0 %vm8873_vm7, %v8872_v1 }
0x18cc   :  { %8331 = vmatprep.subr.mxu0 %v8872_v1  ;;  %v6215_v53 = vpop.permute.xlu1 %6214 }
0x18cd   :  { %v6804_v23 = vpop.permute.xlu0 %6803 }
0x18ce   :  { %8324 = vmatmul.mubr.msk.f32.vlgmr.msra.gmra.mxu0 %vm416_vm8, %v6638_v22 }
0x18cf   :  { %8332 = vmatpush3.xpose.msk.msra.mxu0 %vm416_vm8, %v6806_v17  ;;  %8333 = vmatprep.mubr.msk.f32.mxu0 %vm8873_vm7, %v8872_v1 }
0x18d1   :  { %v5883_v61 = vpop.permute.xlu0 %5882 }
0x18d2   :  { %8334 = vmatmul.mubr.msk.f32.vlgmr.msra.gmra.mxu0 %vm416_vm8, %v6804_v23 }
0x1907   :  { %v5702_v24 = vpop.f32.mrf.mxu1 }
0x1908   :  { %v5706_v25 = vmul.f32 0.35355338, %v5702_v24 }
0x1909   :  { %v8265_v45 = vpop.f32.mrf.mxu1 }
0x190a   :  { %v5707_v26 = vsel %vm416_vm8, %v5706_v25, -inf }
0x190b   :  { %5708 = vmax.xlane.f32.xlu1 %v5707_v26 }
0x191c   :  { %6393 = vrot.lane.b32.xlu1 %v9797_v8, %s8874_s7 }
0x197a   :  { %v5868_v27 = vpop.f32.mrf.mxu0 }
0x197b   :  { %v5872_v29 = vmul.f32 0.35355338, %v5868_v27 }
0x197c   :  { %v8275_v41 = vpop.f32.mrf.mxu0 }
0x197d   :  { %v5873_v18 = vsel %vm416_vm8, %v5872_v29, -inf }
0x197e   :  { %5874 = vmax.xlane.f32.xlu0 %v5873_v18  ;;  %v6034_v33 = vpop.f32.mrf.mxu0 }
0x197f   :  { %v6038_v28 = vmul.f32 0.35355338, %v6034_v33 }
0x1980   :  { %v8285_v30 = vpop.f32.mrf.mxu0 }
0x1981   :  { %v6039_v31 = vsel %vm416_vm8, %v6038_v28, -inf }
0x1982   :  { %6040 = vmax.xlane.f32.xlu0 %v6039_v31  ;;  %v6200_v32 = vpop.f32.mrf.mxu0 }
0x1983   :  { %v6204_v34 = vmul.f32 0.35355338, %v6200_v32 }
0x1984   :  { %v8295_v35 = vpop.f32.mrf.mxu0 }
0x1985   :  { %v6205_v36 = vsel %vm416_vm8, %v6204_v34, -inf }
0x1986   :  { %6206 = vmax.xlane.f32.xlu0 %v6205_v36  ;;  %v6379_v37 = vpop.f32.mrf.mxu0 }
0x1987   :  { %v6383_v39 = vmul.f32 0.35355338, %v6379_v37 }
0x1988   :  { %v8305_v40 = vpop.f32.mrf.mxu0 }
0x1989   :  { %v6384_v42 = vsel %vm416_vm8, %v6383_v39, -inf }
0x198a   :  { %6385 = vmax.xlane.f32.xlu1 %v6384_v42  ;;  %v6545_v46 = vpop.f32.mrf.mxu0 }
0x198b   :  { %v6549_v62 = vmul.f32 0.35355338, %v6545_v46 }
0x198c   :  { %v8315_v49 = vpop.f32.mrf.mxu0 }
0x198d   :  { %v6550_v50 = vsel %vm416_vm8, %v6549_v62, -inf }
0x198e   :  { %6551 = vmax.xlane.f32.xlu0 %v6550_v50  ;;  %v6711_v51 = vpop.f32.mrf.mxu0 }
0x198f   :  { %v6715_v52 = vmul.f32 0.35355338, %v6711_v51 }
0x1990   :  { %v8325_v54 = vpop.f32.mrf.mxu0 }
0x1991   :  { %v6716_v55 = vsel %vm416_vm8, %v6715_v52, -inf }
0x1992   :  { %6717 = vmax.xlane.f32.xlu1 %v6716_v55  ;;  %v6877_v56 = vpop.f32.mrf.mxu0 }
0x1993   :  { %v9872_v63 = vmul.f32 0.35355338, %v6877_v56 }
0x1994   :  { %v5709_v38 = vpop.xlane.xlu1 %5708  ;;  %v8335_v57 = vpop.f32.mrf.mxu0 }
0x1995   :  { %v5710_v58 = vsub.f32 %v5706_v25, %v5709_v38  ;;  %v6882_v0 = vsel %vm416_vm8, %v9872_v63, -inf }
0x1997   :  { %v5711_v59 = vmul.f32 1.442695, %v5710_v58 }
0x1998   :  { %v6394_v5 = vpop.permute.xlu1 %6393 }
0x1999   :  { %8557 = vpow2.f32 %v5711_v59 }
0x19a3   :  { %6725 = vrot.lane.b32.xlu1 %v9797_v8, %s8878_s21 }
0x19a4   :  { %6559 = vrot.lane.b32.xlu0 %v9797_v8, %s8876_s5 }
0x19a6   :  { %v9865_v60 = vpop.eup %8557 }
0x19a7   :  { %8269 = vmatmul.mubr.msk.f32.vlgmr.msra.gmra.mxu1 %vm416_vm8, %v9865_v60  ;;  %v5713_v30 = vsel %vm416_vm8, %v9865_v60, 0.0 }
0x19a8   :  { %8277 = vmatpush3.msra.mxu1 %v5883_v61  ;;  %8278 = vmatprep.mubr.msk.f32.mxu1 %vm8873_vm7, %v8872_v1  ;;  %v6988_v61 = vld [vmem:[#allocation6 + $0x38] sm:$0xff] }
0x19a9   :  { %8286 = vmatprep.subr.mxu1 %v8872_v1  ;;  %8341 = vmatprep.subr.mxu0 %v6988_v61 }
0x19aa   :  { %8342 = vmatpush3.msra.mxu0 %v6988_v61 }
0x19c3   :  { %6883 = vmax.xlane.f32.xlu0 %v6882_v0 }
0x19d9   :  { %6891 = vrot.lane.b32.xlu0 %v9797_v8, %s8880_s2 }
0x1a07   :  { %v5875_v43 = vpop.xlane.xlu0 %5874 }
0x1a08   :  { %v5876_v4 = vsub.f32 %v5872_v29, %v5875_v43  ;;  %v6986_v43 = vld [vmem:[#allocation6 + $0x28] sm:$0xff] }
0x1a0a   :  { %v5877_v47 = vmul.f32 1.442695, %v5876_v4 }
0x1a0b   :  { %v6041_v6 = vpop.xlane.xlu0 %6040 }
0x1a0c   :  { %8559 = vpow2.f32 %v5877_v47  ;;  %v6042_v7 = vsub.f32 %v6038_v28, %v6041_v6  ;;  %v6985_v47 = vld [vmem:[#allocation6 + $0x20] sm:$0xff] }
0x1a0e   :  { %v6043_v48 = vmul.f32 1.442695, %v6042_v7 }
0x1a0f   :  { %v6207_v9 = vpop.xlane.xlu0 %6206 }
0x1a10   :  { %8561 = vpow2.f32 %v6043_v48  ;;  %v6208_v10 = vsub.f32 %v6204_v34, %v6207_v9 }
0x1a12   :  { %v6209_v13 = vmul.f32 1.442695, %v6208_v10 }
0x1a13   :  { %v6386_v12 = vpop.xlane.xlu1 %6385 }
0x1a14   :  { %8563 = vpow2.f32 %v6209_v13  ;;  %v6387_v14 = vsub.f32 %v6383_v39, %v6386_v12 }
0x1a16   :  { %v6388_v11 = vmul.f32 1.442695, %v6387_v14 }
0x1a17   :  { %v6552_v15 = vpop.xlane.xlu0 %6551 }
0x1a18   :  { %8565 = vpow2.f32 %v6388_v11  ;;  %v6553_v16 = vsub.f32 %v6549_v62, %v6552_v15 }
0x1a19   :  { %v8560_v8 = vpop.eup %8559 }
0x1a1a   :  { %v6554_v17 = vmul.f32 1.442695, %v6553_v16  ;;  %8279 = vmatmul.mubr.msk.f32.vlgmr.msra.gmra.mxu1 %vm416_vm8, %v8560_v8  ;;  %v5879_v19 = vsel %vm416_vm8, %v8560_v8, 0.0 }
0x1a1b   :  { %8287 = vmatpush3.msra.mxu1 %v6049_v44  ;;  %v6718_v20 = vpop.xlane.xlu1 %6717  ;;  %5880 = vadd.xlane.f32.xlu1 %v5879_v19  ;;  %v6560_v27 = vpop.permute.xlu0 %6559 }
0x1a1c   :  { %8567 = vpow2.f32 %v6554_v17  ;;  %v6719_v21 = vsub.f32 %v6715_v52, %v6718_v20  ;;  %8288 = vmatprep.mubr.msk.f32.mxu1 %vm8873_vm7, %v8872_v1  ;;  %8296 = vmatprep.subr.mxu1 %v8872_v1 }
0x1a1d   :  { %v8562_v22 = vpop.eup %8561 }
0x1a1e   :  { %v6720_v23 = vmul.f32 1.442695, %v6719_v21  ;;  %8289 = vmatmul.mubr.msk.f32.vlgmr.msra.gmra.mxu1 %vm416_vm8, %v8562_v22  ;;  %v6045_v24 = vsel %vm416_vm8, %v8562_v22, 0.0 }
0x1a1f   :  { %8297 = vmatpush3.msra.mxu1 %v6215_v53  ;;  %6046 = vadd.xlane.f32.xlu0 %v6045_v24  ;;  %v6726_v41 = vpop.permute.xlu1 %6725 }
0x1a20   :  { %8569 = vpow2.f32 %v6720_v23  ;;  %8298 = vmatprep.mubr.msk.f32.mxu1 %vm8873_vm7, %v8872_v1  ;;  %8306 = vmatprep.subr.mxu1 %v8872_v1 }
0x1a21   :  { %v8564_v25 = vpop.eup %8563 }
0x1a22   :  { %8299 = vmatmul.mubr.msk.f32.vlgmr.msra.gmra.mxu1 %vm416_vm8, %v8564_v25  ;;  %v6211_v45 = vsel %vm416_vm8, %v8564_v25, 0.0 }
0x1a23   :  { %8307 = vmatpush3.msra.mxu1 %v6394_v5  ;;  %6212 = vadd.xlane.f32.xlu0 %v6211_v45 }
0x1a24   :  { %8308 = vmatprep.mubr.msk.f32.mxu1 %vm8873_vm7, %v8872_v1  ;;  %8316 = vmatprep.subr.mxu1 %v8872_v1 }
0x1a25   :  { %v8566_v26 = vpop.eup %8565 }
0x1a26   :  { %8309 = vmatmul.mubr.msk.f32.vlgmr.msra.gmra.mxu1 %vm416_vm8, %v8566_v26  ;;  %v6390_v39 = vsel %vm416_vm8, %v8566_v26, 0.0 }
0x1a27   :  { %8317 = vmatpush3.msra.mxu1 %v6560_v27  ;;  %8318 = vmatprep.mubr.msk.f32.mxu1 %vm8873_vm7, %v8872_v1 }
0x1a28   :  { %8326 = vmatprep.subr.mxu1 %v8872_v1 }
0x1a29   :  { %v8568_v29 = vpop.eup %8567 }
0x1a2a   :  { %8319 = vmatmul.mubr.msk.f32.vlgmr.msra.gmra.mxu1 %vm416_vm8, %v8568_v29  ;;  %v6556_v18 = vsel %vm416_vm8, %v8568_v29, 0.0 }
0x1a2b   :  { %8327 = vmatpush3.msra.mxu1 %v6726_v41  ;;  %6557 = vadd.xlane.f32.xlu0 %v6556_v18 }
0x1a2c   :  { %8328 = vmatprep.mubr.msk.f32.mxu1 %vm8873_vm7, %v8872_v1  ;;  %8336 = vmatprep.subr.mxu1 %v8872_v1 }
0x1a2d   :  { %v8570_v33 = vpop.eup %8569 }
0x1a2e   :  { %8329 = vmatmul.mubr.msk.f32.vlgmr.msra.gmra.mxu1 %vm416_vm8, %v8570_v33  ;;  %v6722_v28 = vsel %vm416_vm8, %v8570_v33, 0.0 }
0x1a2f   :  { %6723 = vadd.xlane.f32.xlu1 %v6722_v28  ;;  %8338 = vmatprep.mubr.msk.f32.mxu1 %vm8873_vm7, %v8872_v1 }
0x1a33   :  { %5714 = vadd.xlane.f32.xlu1 %v5713_v30 }
0x1a4c   :  { %v6884_v31 = vpop.xlane.xlu0 %6883 }
0x1a4d   :  { %v6885_v32 = vsub.f32 %v9872_v63, %v6884_v31  ;;  %v6987_v63 = vld [vmem:[#allocation6 + $0x30] sm:$0xff] }
0x1a4e   :  { %8343 = vmatprep.subr.mxu0 %v6987_v63 }
0x1a4f   :  { %v6886_v34 = vmul.f32 1.442695, %v6885_v32  ;;  %8344 = vmatpush3.msra.mxu0 %v6987_v63  ;;  %v7639_v32 = vld [vmem:[#allocation7 + $0x1] ss:$0 sm:$0xff] }
0x1a50   :  { %v6892_v35 = vpop.permute.xlu0 %6891  ;;  %8345 = vmatprep.subr.mxu0 %v6986_v43 }
0x1a51   :  { %8571 = vpow2.f32 %v6886_v34  ;;  %8337 = vmatpush3.msra.mxu1 %v6892_v35  ;;  %8346 = vmatpush3.msra.mxu0 %v6986_v43  ;;  %v7643_v43 = vld [vmem:[%s9997_s13 + $0x1] ss:$0 sm:$0xff] }
0x1a52   :  { %8347 = vmatprep.subr.mxu0 %v6985_v47 }
0x1a53   :  { %8348 = vmatpush3.msra.mxu0 %v6985_v47  ;;  %v7644_v47 = vld [vmem:[#allocation12 + $0x1] ss:$0 sm:$0xff] }
0x1a5e   :  { %v8572_v36 = vpop.eup %8571 }
0x1a5f   :  { %8339 = vmatmul.mubr.msk.f32.vlgmr.msra.gmra.mxu1 %vm416_vm8, %v8572_v36  ;;  %v6888_v37 = vsel %vm416_vm8, %v8572_v36, 0.0 }
0x1a60   :  { %6889 = vadd.xlane.f32.xlu0 %v6888_v37 }
0x1a64   :  { %6391 = vadd.xlane.f32.xlu0 %v6390_v39 }
0x1a67   :  { %v9912_v1 = vpop.f32.mrf.mxu1 }
0x1a69   :  { %v8270_v40 = vpop.f32.mrf.mxu1 }
0x1aa4   :  { %v5881_v42 = vpop.xlane.xlu1 %5880 }
0x1aa5   :  { %8573 = vrcp.f32 %v5881_v42 }
0x1aa8   :  { %v6047_v44 = vpop.xlane.xlu0 %6046 }
0x1aa9   :  { %8575 = vrcp.f32 %v6047_v44 }
0x1aac   :  { %v6213_v46 = vpop.xlane.xlu0 %6212 }
0x1aad   :  { %8577 = vrcp.f32 %v6213_v46 }
0x1ab2   :  { %v8574_v62 = vpop.eup %8573 }
0x1ab4   :  { %v6558_v49 = vpop.xlane.xlu0 %6557 }
0x1ab5   :  { %8579 = vrcp.f32 %v6558_v49 }
0x1ab6   :  { %v8576_v53 = vpop.eup %8575 }
0x1ab8   :  { %v6724_v54 = vpop.xlane.xlu1 %6723 }
0x1ab9   :  { %8581 = vrcp.f32 %v6724_v54 }
0x1aba   :  { %v8578_v57 = vpop.eup %8577 }
0x1abc   :  { %v5715_v17 = vpop.xlane.xlu1 %5714 }
0x1ac2   :  { %v8580_v6 = vpop.eup %8579 }
0x1ac6   :  { %v8582_v9 = vpop.eup %8581 }
0x1ada   :  { %v5954_v50 = vpop.f32.mrf.mxu1 }
0x1adb   :  { %v5959_v51 = vmul.f32 %v8574_v62, %v5954_v50 }
0x1adc   :  { %v8280_v52 = vpop.f32.mrf.mxu1 }
0x1add   :  { %6293 = vrot.lane.b32.xlu1 %v5959_v51, %s8863_s6 }
0x1ade   :  { %v6120_v55 = vpop.f32.mrf.mxu1 }
0x1adf   :  { %v6125_v56 = vmul.f32 %v8576_v53, %v6120_v55  ;;  %v7129_v55 = vld [vmem:[#allocation13 + $0x30] sm:$0xff] }
0x1ae0   :  { %v8290_v38 = vpop.f32.mrf.mxu1 }
0x1ae1   :  { %6297 = vrot.lane.b32.xlu0 %v6125_v56, %s8856_s25  ;;  %v7128_v56 = vld [vmem:[#allocation13 + $0x28] sm:$0xff]  ;;  %v7127_v38 = vld [vmem:[#allocation13 + $0x20] sm:$0xff] }
0x1ae2   :  { %v6286_v58 = vpop.f32.mrf.mxu1 }
0x1ae3   :  { %v6291_v59 = vmul.f32 %v8578_v57, %v6286_v58 }
0x1ae4   :  { %v8300_v60 = vpop.f32.mrf.mxu1 }
0x1ae5   :  { %6301 = vrot.lane.b32.xlu1 %v6291_v59, %s10034_s12 }
0x1ae6   :  { %v6465_v0 = vpop.f32.mrf.mxu1 }
0x1ae8   :  { %v8310_v4 = vpop.f32.mrf.mxu1 }
0x1ae9   :  { %v6890_v14 = vpop.xlane.xlu0 %6889 }
0x1aea   :  { %v6631_v7 = vpop.f32.mrf.mxu1  ;;  %8583 = vrcp.f32 %v6890_v14  ;;  %v7653_v14 = vld [vmem:[%s10003_s19 + $0x68] sm:$0xff] }
0x1aeb   :  { %v6636_v48 = vmul.f32 %v8580_v6, %v6631_v7  ;;  %8585 = vrcp.f32 %v5715_v17  ;;  %v7648_v17 = vld [vmem:[%s10003_s19 + $0x40] sm:$0xff] }
0x1aec   :  { %v8320_v5 = vpop.f32.mrf.mxu1 }
0x1aed   :  { %6970 = vrot.lane.b32.xlu1 %v6636_v48, %s8863_s6  ;;  %v6392_v19 = vpop.xlane.xlu0 %6391 }
0x1aee   :  { %v6797_v10 = vpop.f32.mrf.mxu1  ;;  %8587 = vrcp.f32 %v6392_v19  ;;  %v7645_v19 = vld [vmem:[#allocation15 + $0x1] ss:$0 sm:$0xff] }
0x1aef   :  { %v6802_v13 = vmul.f32 %v8582_v9, %v6797_v10 }
0x1af0   :  { %v8330_v12 = vpop.f32.mrf.mxu1 }
0x1af1   :  { %6974 = vrot.lane.b32.xlu1 %v6802_v13, %s8856_s25  ;;  %v7655_v13 = vld [vmem:[%s10003_s19 + $0x78] sm:$0xff]  ;;  %v7654_v12 = vld [vmem:[%s10003_s19 + $0x70] sm:$0xff] }
0x1af2   :  { %8363 = vmatprep.subr.mxu0 %v7655_v13 }
0x1af7   :  { %v8584_v11 = vpop.eup %8583 }
0x1af8   :  { %v8586_v20 = vpop.eup %8585 }
0x1af9   :  { %v5793_v22 = vmul.f32 %v8586_v20, %v9912_v1 }
0x1afb   :  { %v8588_v29 = vpop.eup %8587 }
0x1afc   :  { %v6470_v41 = vmul.f32 %v8588_v29, %v6465_v0 }
0x1b1f   :  { %v6963_v15 = vpop.f32.mrf.mxu1 }
0x1b20   :  { %v6968_v16 = vmul.f32 %v8584_v11, %v6963_v15  ;;  %v7652_v11 = vld [vmem:[%s10003_s19 + $0x60] sm:$0xff]  ;;  %v7651_v15 = vld [vmem:[%s10003_s19 + $0x58] sm:$0xff] }
0x1b21   :  { %v8340_v8 = vpop.f32.mrf.mxu1 }
0x1b22   :  { %6978 = vrot.lane.b32.xlu0 %v6968_v16, %s10034_s12  ;;  %v7650_v16 = vld [vmem:[%s10003_s19 + $0x50] sm:$0xff]  ;;  %v7649_v8 = vld [vmem:[%s10003_s19 + $0x48] sm:$0xff] }
0x1b4f   :  { %v6294_v21 = vpop.permute.xlu1 %6293 }
0x1b50   :  { %v6304_v24 = vsel %vm416_vm8, %v5793_v22, %v6294_v21 }
0x1b53   :  { %v6298_v23 = vpop.permute.xlu0 %6297 }
0x1b54   :  { %v6305_v25 = vsel %vm1094_vm10, %v6304_v24, %v6298_v23 }
0x1b57   :  { %v6302_v45 = vpop.permute.xlu1 %6301 }
0x1b58   :  { %v6306_v26 = vsel %vm1096_vm11, %v6305_v25, %v6302_v45 }
0x1b59   :  { %8349 = vmatprep.mubr.msk.f32.mxu0 %vm331_vm6, %v6306_v26 }
0x1b5f   :  { %v6971_v27 = vpop.permute.xlu1 %6970 }
0x1b60   :  { %v6981_v33 = vsel %vm416_vm8, %v6470_v41, %v6971_v27 }
0x1b63   :  { %v6975_v18 = vpop.permute.xlu1 %6974 }
0x1b64   :  { %v6982_v28 = vsel %vm1094_vm10, %v6981_v33, %v6975_v18 }
0x1b94   :  { %v6979_v30 = vpop.permute.xlu0 %6978 }
0x1b95   :  { %v6983_v31 = vsel %vm1096_vm11, %v6982_v28, %v6979_v30  ;;  %v7656_v30 = vld [vmem:[#allocation16 + $0x1] ss:$0 sm:$0xff] }
0x1b96   :  { %8350 = vmatmul.mubr.msk.f32.vlgmr.msra.gmra.mxu0 %vm331_vm6, %v6983_v31 }
0x1b97   :  { %8364 = vmatpush3.msra.mxu0 %v7655_v13 }
0x1b98   :  { %8365 = vmatprep.subr.mxu0 %v7654_v12 }
0x1b99   :  { %8366 = vmatpush3.msra.mxu0 %v7654_v12 }
0x1b9a   :  { %8367 = vmatprep.subr.mxu0 %v7653_v14 }
0x1b9b   :  { %8368 = vmatpush3.msra.mxu0 %v7653_v14 }
0x1b9c   :  { %8369 = vmatprep.subr.mxu0 %v7652_v11 }
0x1b9d   :  { %8370 = vmatpush3.msra.mxu0 %v7652_v11 }
0x1b9e   :  { %8371 = vmatprep.subr.mxu0 %v7651_v15 }
0x1b9f   :  { %8372 = vmatpush3.msra.mxu0 %v7651_v15 }
0x1ba0   :  { %8373 = vmatprep.subr.mxu0 %v7650_v16 }
0x1ba1   :  { %8374 = vmatpush3.msra.mxu0 %v7650_v16 }
0x1ba2   :  { %8375 = vmatprep.subr.mxu0 %v7649_v8 }
0x1ba3   :  { %8376 = vmatpush3.msra.mxu0 %v7649_v8 }
0x1ba4   :  { %8377 = vmatprep.subr.mxu0 %v7648_v17 }
0x1ba5   :  { %8378 = vmatpush3.msra.mxu0 %v7648_v17 }
0x1c56   :  { %v8351_v34 = vpop.f32.mrf.mxu0 }
0x1c57   :  { %v7075_v35 = vadd.f32 %v8351_v34, %v7639_v32 }
0x1c58   :  { %v7069_v36 = vpop.f32.mrf.mxu0 }
0x1c59   :  { %v7079_v37 = vadd.f32 %v7075_v35, %v9784_v3  ;;  %v7070_v39 = vadd.f32 %v7639_v32, %v7069_v36 }
0x1c5b   :  { %v7078_v1 = vadd.f32 %v7070_v39, %v9782_v2  ;;  %v7087_v40 = vsel %vm331_vm6, %v7079_v37, 0.0  ;;  %v7130_v2 = vld [vmem:[#allocation13 + $0x38] sm:$0xff] }
0x1c5c   :  { %7088 = vadd.xlane.f32.xlu0 %v7087_v40  ;;  %8352 = vmatprep.subr.mxu1 %v7130_v2 }
0x1c5d   :  { %v7084_v42 = vsel %vm331_vm6, %v7078_v1, 0.0  ;;  %8353 = vmatpush3.msra.mxu1 %v7130_v2  ;;  %v7377_v2 = vld [vmem:[#allocation18 + $0x8] sm:$0xff] }
0x1c5e   :  { %7085 = vadd.xlane.f32.xlu1 %v7084_v42  ;;  %8354 = vmatprep.subr.mxu1 %v7129_v55 }
0x1c5f   :  { %8355 = vmatpush3.msra.mxu1 %v7129_v55  ;;  %v7376_v55 = vld [vmem:[#allocation18] sm:$0xff] }
0x1c60   :  { %8356 = vmatprep.subr.mxu1 %v7128_v56 }
0x1c61   :  { %8357 = vmatpush3.msra.mxu1 %v7128_v56 }
0x1c62   :  { %8358 = vmatprep.subr.mxu1 %v7127_v38 }
0x1c63   :  { %8359 = vmatpush3.msra.mxu1 %v7127_v38 }
0x1ce5   :  { %v7089_v44 = vpop.xlane.xlu0 %7088 }
0x1ce6   :  { %v7091_v46 = vmul.f32 0.03125, %v7089_v44 }
0x1ce7   :  { %v7086_v62 = vpop.xlane.xlu1 %7085 }
0x1ce8   :  { %v7090_v49 = vmul.f32 0.03125, %v7086_v62  ;;  %v7093_v50 = vsub.f32 %v7079_v37, %v7091_v46 }
0x1cea   :  { %v7092_v51 = vsub.f32 %v7078_v1, %v7090_v49  ;;  %v7095_v54 = vmul.f32 %v7093_v50, %v7093_v50 }
0x1cec   :  { %v7094_v52 = vmul.f32 %v7092_v51, %v7092_v51  ;;  %v7099_v3 = vsel %vm331_vm6, %v7095_v54, 0.0  ;;  %v7379_v54 = vld [vmem:[#allocation18 + $0x18] sm:$0xff] }
0x1ced   :  { %8382 = vmatprep.subr.mxu1 %v7379_v54 }
0x1cee   :  { %v7096_v53 = vsel %vm331_vm6, %v7094_v52, 0.0 }
0x1cef   :  { %7097 = vadd.xlane.f32.xlu0 %v7096_v53 }
0x1cf3   :  { %7100 = vadd.xlane.f32.xlu0 %v7099_v3  ;;  %v7378_v3 = vld [vmem:[#allocation18 + $0x10] sm:$0xff] }
0x1d78   :  { %v7098_v57 = vpop.xlane.xlu0 %7097 }
0x1d79   :  { %v7102_v58 = vmul.f32 0.03125, %v7098_v57 }
0x1d7b   :  { %v7104_v59 = vadd.f32 1e-05, %v7102_v58 }
0x1d7c   :  { %v7101_v60 = vpop.xlane.xlu0 %7100 }
0x1d7d   :  { %8589 = vrsqrt.f32 %v7104_v59  ;;  %v7103_v61 = vmul.f32 0.03125, %v7101_v60 }
0x1d7f   :  { %v7105_v63 = vadd.f32 1e-05, %v7103_v61 }
0x1d81   :  { %8591 = vrsqrt.f32 %v7105_v63  ;;  %v7661_v63 = vld [vmem:[%s9999_s15 + $0x1] ss:$0 sm:$0xff] }
0x1d8a   :  { %v8590_v0 = vpop.eup %8589 }
0x1d8b   :  { %v7108_v4 = vmul.f32 %v8590_v0, %v7092_v51 }
0x1d8d   :  { %v7116_v6 = vmul.f32 %v7643_v43, %v7108_v4 }
0x1d8e   :  { %v8592_v7 = vpop.eup %8591 }
0x1d8f   :  { %v7109_v48 = vmul.f32 %v8592_v7, %v7093_v50  ;;  %v7124_v5 = vadd.f32 %v7644_v47, %v7116_v6  ;;  %v7662_v6 = vld [vmem:[%s10000_s16 + $0x1] ss:$0 sm:$0xff] }
0x1d91   :  { %v7117_v9 = vmul.f32 %v7643_v43, %v7109_v48  ;;  %8360 = vmatprep.mubr.msk.f32.mxu1 %vm331_vm6, %v7124_v5 }
0x1d93   :  { %v7125_v10 = vadd.f32 %v7644_v47, %v7117_v9  ;;  %v7663_v9 = vld [vmem:[#allocation19] ss:$0 sm:$0xff] }
0x1d95   :  { %8361 = vmatmul.mubr.msk.f32.vlgmr.msra.gmra.mxu1 %vm331_vm6, %v7125_v10 }
0x1d96   :  { %8383 = vmatpush3.msra.mxu1 %v7379_v54 }
0x1d97   :  { %8384 = vmatprep.subr.mxu1 %v7378_v3 }
0x1d98   :  { %8385 = vmatpush3.msra.mxu1 %v7378_v3 }
0x1d99   :  { %8386 = vmatprep.subr.mxu1 %v7377_v2 }
0x1d9a   :  { %8387 = vmatpush3.msra.mxu1 %v7377_v2 }
0x1d9b   :  { %8388 = vmatprep.subr.mxu1 %v7376_v55 }
0x1d9c   :  { %8389 = vmatpush3.msra.mxu1 %v7376_v55 }
0x1e55   :  { %v8362_v20 = vpop.f32.mrf.mxu1 }
0x1e56   :  { %v7217_v21 = vadd.f32 %v8362_v20, %v7645_v19 }
0x1e57   :  { %v7211_v22 = vpop.f32.mrf.mxu1 }
0x1e58   :  { %v7223_v23 = vmul.f32 0.70710677, %v7217_v21  ;;  %v7212_v24 = vadd.f32 %v7645_v19, %v7211_v22  ;;  %v7221_v18 = vmul.f32 0.5, %v7217_v21 }
0x1e5a   :  { %8593 = verf.f32 %v7223_v23  ;;  %v7222_v25 = vmul.f32 0.70710677, %v7212_v24  ;;  %v7220_v29 = vmul.f32 0.5, %v7212_v24 }
0x1e5c   :  { %8595 = verf.f32 %v7222_v25 }
0x1e67   :  { %v8594_v45 = vpop.eup %8593 }
0x1e68   :  { %v7227_v27 = vadd.f32 1.0, %v8594_v45 }
0x1e69   :  { %v8596_v26 = vpop.eup %8595 }
0x1e6a   :  { %v7226_v41 = vadd.f32 1.0, %v8596_v26  ;;  %v7229_v28 = vmul.f32 %v7227_v27, %v7221_v18 }
0x1e6c   :  { %v7228_v33 = vmul.f32 %v7226_v41, %v7220_v29 }
0x1e6e   :  { %8379 = vmatprep.mubr.msk.f32.mxu0 %vm3714_vm12, %v7228_v33 }
0x1e6f   :  { %8380 = vmatmul.mubr.msk.f32.vlgmr.msra.gmra.mxu0 %vm3714_vm12, %v7229_v28 }
0x1f2f   :  { %v8381_v31 = vpop.f32.mrf.mxu0 }
0x1f30   :  { %v7325_v32 = vadd.f32 %v8381_v31, %v7656_v30 }
0x1f31   :  { %v7319_v34 = vpop.f32.mrf.mxu0 }
0x1f32   :  { %v7329_v35 = vadd.f32 %v7325_v32, %v7125_v10  ;;  %v7320_v36 = vadd.f32 %v7656_v30, %v7319_v34 }
0x1f34   :  { %v7328_v37 = vadd.f32 %v7320_v36, %v7124_v5  ;;  %v7337_v39 = vsel %vm331_vm6, %v7329_v35, 0.0 }
0x1f35   :  { %7338 = vadd.xlane.f32.xlu0 %v7337_v39 }
0x1f36   :  { %v7334_v1 = vsel %vm331_vm6, %v7328_v37, 0.0 }
0x1f37   :  { %7335 = vadd.xlane.f32.xlu1 %v7334_v1 }
0x1fbe   :  { %v7339_v40 = vpop.xlane.xlu0 %7338 }
0x1fbf   :  { %v7341_v42 = vmul.f32 0.03125, %v7339_v40 }
0x1fc0   :  { %v7336_v44 = vpop.xlane.xlu1 %7335 }
0x1fc1   :  { %v7343_v46 = vsub.f32 %v7329_v35, %v7341_v42  ;;  %v7340_v62 = vmul.f32 0.03125, %v7336_v44 }
0x1fc3   :  { %v7342_v49 = vsub.f32 %v7328_v37, %v7340_v62  ;;  %v7345_v50 = vmul.f32 %v7343_v46, %v7343_v46 }
0x1fc5   :  { %v7349_v51 = vsel %vm331_vm6, %v7345_v50, 0.0  ;;  %v7344_v52 = vmul.f32 %v7342_v49, %v7342_v49 }
0x1fc6   :  { %7350 = vadd.xlane.f32.xlu0 %v7349_v51 }
0x1fc7   :  { %v7346_v53 = vsel %vm331_vm6, %v7344_v52, 0.0 }
0x1fc8   :  { %7347 = vadd.xlane.f32.xlu1 %v7346_v53 }
0x204f   :  { %v7351_v56 = vpop.xlane.xlu0 %7350 }
0x2050   :  { %v7353_v38 = vmul.f32 0.03125, %v7351_v56 }
0x2051   :  { %v7348_v57 = vpop.xlane.xlu1 %7347 }
0x2052   :  { %v7355_v58 = vadd.f32 1e-05, %v7353_v38  ;;  %v7352_v59 = vmul.f32 0.03125, %v7348_v57 }
0x2054   :  { %8597 = vrsqrt.f32 %v7355_v58  ;;  %v7354_v60 = vadd.f32 1e-05, %v7352_v59 }
0x2056   :  { %8599 = vrsqrt.f32 %v7354_v60 }
0x2061   :  { %v8598_v61 = vpop.eup %8597 }
0x2062   :  { %v7359_v0 = vmul.f32 %v8598_v61, %v7343_v46 }
0x2063   :  { %v8600_v43 = vpop.eup %8599 }
0x2064   :  { %v7358_v4 = vmul.f32 %v8600_v43, %v7342_v49  ;;  %v7367_v47 = vmul.f32 %v7661_v63, %v7359_v0 }
0x2066   :  { %v7366_v7 = vmul.f32 %v7661_v63, %v7358_v4  ;;  %v7375_v5 = vadd.f32 %v7662_v6, %v7367_v47 }
0x2068   :  { %v7374_v48 = vadd.f32 %v7662_v6, %v7366_v7 }
0x206a   :  { %8390 = vmatprep.mubr.msk.f32.mxu1 %vm331_vm6, %v7374_v48 }
0x206b   :  { %8391 = vmatmul.mubr.msk.f32.vlgmr.msra.gmra.mxu1 %vm331_vm6, %v7375_v5 }
0x212b   :  { %v8392_v10 = vpop.f32.mrf.mxu1 }
0x212c   :  { %v7465_v13 = vadd.f32 %v8392_v10, %v7663_v9 }
0x212d   :  { %v7459_v12 = vpop.f32.mrf.mxu1 }
0x212e   :  { %7469 = vst [vmem:[%s10007_s23 + $0x8] sm:$0xff] %v7465_v13  ;;  %v7460_v14 = vadd.f32 %v7663_v9, %v7459_v12 }
0x2130   :  { %7468 = vst [vmem:[%s10007_s23] sm:$0xff] %v7460_v14 }
0x2131   :  { %7474 = vsyncpa [#allocation3], 1 }
0x2132   :  { %7475 = vsyncpa [#allocation5], 1 }
0x2133   :  { %7476 = vsyncpa [#allocation8], 1 }
0x2134   :  { %7477 = vsyncpa [#allocation11], 1 }
0x2135   :  { %7478 = vsyncpa [#allocation14], 1 }
0x2136   :  { %7479 = vsyncpa [#allocation17], 1 }
0x2137   :  { %7480 = vsyncpa [#allocation20], 1 }

</bundles_post_ra>
